<compile_context>
chip_gen: v5e
topology: v5e:2x2
jax: 0.10.0
libtpu: 0.0.40
codegen_flags: <defaults>
</compile_context>

<pallas_src>
import functools

import jax
import jax.numpy as jnp
from jax.experimental import pallas as pl
from jax.experimental.pallas import tpu as pltpu


# ---------------------------------------------------------------------------
# Fused ASFF_4 kernel: one group of images per grid step, (C, H*W) tiles (NCHW).
# ---------------------------------------------------------------------------
def asff4_kernel(x0_ref, x1_ref, x2_ref, x3_ref,
                 wl_ref, slc_ref, blc_ref, wlev_ref, blev_ref,
                 w9_ref, s3_ref, b3_ref, mask_ref,
                 out_ref, zcat_ref, patch_ref,
                 *, H, W, n_img, exact_softmax):
    HW = H * W
    C = out_ref.shape[1]
    cc = zcat_ref.shape[0] // 4

    # Resident constants: load once per grid step (hoisted out of the loops).
    msk = mask_ref[...]                               # (9, HW) 0/1 f32
    s3 = s3_ref[...]                                  # (C, 1)
    b3 = b3_ref[...]                                  # (C, 1)
    x_refs = (x0_ref, x1_ref, x2_ref, x3_ref)

    for b in range(n_img):                            # static unroll over group
        xs = [r[b] for r in x_refs]                   # (C, HW) each

        # --- four 1x1 compress convs + BN + ReLU, streamed into scratch -----
        # (per-level K=C matmuls; no (4C, HW) concat copy)
        for i in range(4):
            z = jnp.dot(wl_ref[i], xs[i], preferred_element_type=jnp.float32)
            zcat_ref[i * cc:(i + 1) * cc, :] = jnp.maximum(
                z * slc_ref[i] + blc_ref[i], 0.0)

        # --- weight_levels 1x1 conv (+bias) and softmax over the 4 levels ---
        logits = jnp.dot(wlev_ref[...], zcat_ref[...],
                         preferred_element_type=jnp.float32) + blev_ref[...]
        m = jnp.max(logits, axis=0, keepdims=True)
        e = jnp.exp(logits - m)
        den = jnp.sum(e, axis=0, keepdims=True)
        if exact_softmax:
            wsm = e / den
        else:
            # EUP approx reciprocal (~2^-12 rel err): weights may not sum to
            # exactly 1; pass exact_softmax=True for a trained detect head.
            wsm = e * pl.reciprocal(den, approx=True)

        # --- weighted fusion of the 4 inputs (VPU, sublane-broadcast rows) --
        fused = (xs[0] * wsm[0:1, :] + xs[1] * wsm[1:2, :]
                 + xs[2] * wsm[2:3, :] + xs[3] * wsm[3:4, :])   # (C, HW) f32

        # --- 3x3 conv (stride 1, zero pad 1): stream 9 masked lane-rolled ---
        # taps into the bf16 patch scratch (keeps <=1 tap live in vregs).
        t = 0
        for dh in (-1, 0, 1):
            for dw in (-1, 0, 1):
                off = dh * W + dw
                if off == 0:
                    tap = fused                       # centre tap: always valid
                else:
                    # tap[:, i] = fused[:, i + off] (cyclic); host mask zeroes
                    # wrapped / out-of-image lanes -> zero padding.
                    tap = (pltpu.roll(fused, shift=(-off) % HW, axis=1)
                           * msk[t:t + 1, :])
                patch_ref[t * C:(t + 1) * C, :] = tap.astype(patch_ref.dtype)
                t += 1

        # --- single K=9C bf16 MXU matmul + BN + ReLU -------------------------
        y = jnp.dot(w9_ref[...], patch_ref[...],
                    preferred_element_type=jnp.float32)          # (C, HW) f32
        out_ref[b] = jnp.maximum(y * s3 + b3, 0.0).astype(out_ref.dtype)


def _const_spec(shape):
    nd = len(shape)

    def index_map(g):
        return (0,) * nd

    return pl.BlockSpec(shape, index_map)


# ---------------------------------------------------------------------------
# Wrapper
# ---------------------------------------------------------------------------
def asff4_forward(params, input0, input1, input2, input3, *, exact_softmax=False):
    B, C, H, W = input0.shape                  # PyTorch NCHW inputs
    HW = H * W
    cc = params["sl"].shape[1]                 # compress_c (= 8)

    # ---- fold BN / pack parameters into the kernel layouts (tiny) ----------
    wl = params["wl"]                          # (4, cc, C)
    slc = params["sl"][:, :, None]             # (4, cc, 1)
    blc = params["bl"][:, :, None]             # (4, cc, 1)
    wlev = params["wlev"]                      # (4, 4*cc)
    blev = params["blev"].reshape(4, 1)
    w9 = jnp.concatenate([params["w3"][kh, kw] for kh in range(3)
                          for kw in range(3)], axis=1).astype(jnp.bfloat16)  # (C, 9C)
    s3 = params["s3"].reshape(C, 1)
    b3 = params["b3"].reshape(C, 1)

    # 3x3 zero-pad validity masks, one row per tap (host precompute, resident).
    lane = jnp.arange(HW, dtype=jnp.int32)
    hh, ww = lane // W, lane % W
    mask = jnp.stack(
        [((hh + dh >= 0) & (hh + dh < H) & (ww + dw >= 0) & (ww + dw < W))
         for dh in (-1, 0, 1) for dw in (-1, 0, 1)],
        axis=0).astype(jnp.float32)            # (9, HW)

    # ---- generation-aware VMEM budget & images-per-step choice -------------
    try:
        vmem_cap = int(pltpu.get_tpu_info().vmem_capacity_bytes)
    except Exception:                          # fall back to smallest (v7x) VMEM
        vmem_cap = 64 * 1024 * 1024
    vmem_budget = (vmem_cap * 3) // 4          # ~25% headroom for compiler scratch

    per_img = (4 * 2 + 2) * C * HW * 4         # double-buffered x inputs + output
    resident = (9 * C * HW * 2                 # bf16 patch scratch
                + 4 * cc * HW * 4              # zcat scratch
                + 4 * C * HW * 4               # live f32 temporaries (fused, taps)
                + (1 << 20))                   # constants + slack
    want_imgs = max(1, -(-1024 // HW))         # >= ~1024 lanes of work per step
    bt = 1
    for cand in range(1, B + 1):
        if (B % cand == 0 and cand <= want_imgs
                and B // cand >= min(B, 2)     # keep >=2 steps: pipeline + megacore
                and cand * per_img + resident <= vmem_budget):
            bt = cand

    # Free reshape (NCHW is contiguous): (B, C, H, W) -> (B, C, H*W).
    xs = [x.reshape(B, C, HW) for x in (input0, input1, input2, input3)]
    x_spec = pl.BlockSpec((bt, C, HW), lambda g: (g, 0, 0))

    out = pl.pallas_call(
        functools.partial(asff4_kernel, H=H, W=W, n_img=bt,
                          exact_softmax=exact_softmax),
        out_shape=jax.ShapeDtypeStruct((B, C, HW), jnp.float32),
        grid_spec=pltpu.PrefetchScalarGridSpec(
            num_scalar_prefetch=0,
            grid=(B // bt,),
            in_specs=[x_spec, x_spec, x_spec, x_spec,
                      _const_spec(wl.shape),
                      _const_spec(slc.shape),
                      _const_spec(blc.shape),
                      _const_spec(wlev.shape),
                      _const_spec(blev.shape),
                      _const_spec(w9.shape),
                      _const_spec(s3.shape),
                      _const_spec(b3.shape),
                      _const_spec(mask.shape)],
            out_specs=x_spec,
            scratch_shapes=[pltpu.VMEM((4 * cc, HW), jnp.float32),
                            pltpu.VMEM((9 * C, HW), jnp.bfloat16)]),
        compiler_params=pltpu.CompilerParams(
            dimension_semantics=("parallel",),
            vmem_limit_bytes=int(vmem_budget)),
    )(*xs, wl, slc, blc, wlev, blev, w9, s3, b3, mask)

    return out.reshape(B, C, H, W)             # already NCHW, no transpose


# ---------------------------------------------------------------------------
# Deterministic synthetic parameters (shapes follow ASFF_4.__init__)
# ---------------------------------------------------------------------------
def init_params(key, inter_dim, compress_c=8, eps=1e-5):
    C = inter_dim
    ks = jax.random.split(key, 12)
    # weight_level_{0..3}: Conv2d(C, 8, 1x1, no bias) + BN(8) + ReLU
    wl = jax.random.normal(ks[0], (4, compress_c, C), jnp.float32) * 0.1
    gamma_l = 1.0 + 0.1 * jax.random.normal(ks[1], (4, compress_c), jnp.float32)
    beta_l = 0.1 * jax.random.normal(ks[2], (4, compress_c), jnp.float32)
    mean_l = 0.1 * jax.random.normal(ks[3], (4, compress_c), jnp.float32)
    var_l = jax.random.uniform(ks[4], (4, compress_c), jnp.float32, 0.5, 1.5)
    sl = gamma_l / jnp.sqrt(var_l + eps)
    bl = beta_l - mean_l * sl
    # weight_levels: Conv2d(32, 4, 1x1) with bias
    wlev = jax.random.normal(ks[5], (4, 4 * compress_c), jnp.float32) * 0.1
    blev = jax.random.normal(ks[6], (4,), jnp.float32) * 0.1
    # conv: Conv2d(C, C, 3x3, pad=1, no bias) + BN(C) + ReLU; layout (kh, kw, out, in)
    w3 = jax.random.normal(ks[7], (3, 3, C, C), jnp.float32) * 0.05
    gamma3 = 1.0 + 0.1 * jax.random.normal(ks[8], (C,), jnp.float32)
    beta3 = 0.1 * jax.random.normal(ks[9], (C,), jnp.float32)
    mean3 = 0.1 * jax.random.normal(ks[10], (C,), jnp.float32)
    var3 = jax.random.uniform(ks[11], (C,), jnp.float32, 0.5, 1.5)
    s3 = gamma3 / jnp.sqrt(var3 + eps)
    b3 = beta3 - mean3 * s3
    return dict(wl=wl, sl=sl, bl=bl, wlev=wlev, blev=blev, w3=w3, s3=s3, b3=b3)


# ---------------------------------------------------------------------------
# Pure-JAX reference (follows the PyTorch module structure) for sanity check
# ---------------------------------------------------------------------------
def reference_forward(params, x0, x1, x2, x3):
    hi = jax.lax.Precision.HIGHEST
    B, C, H, W = x0.shape
    xs = [x0, x1, x2, x3]
    zs = []
    for i in range(4):
        z = jnp.einsum('oc,bchw->bohw', params["wl"][i], xs[i], precision=hi)
        z = z * params["sl"][i][None, :, None, None] + params["bl"][i][None, :, None, None]
        zs.append(jnp.maximum(z, 0.0))
    cat = jnp.concatenate(zs, axis=1)                                # (B, 32, H, W)
    logits = jnp.einsum('oc,bchw->bohw', params["wlev"], cat, precision=hi)
    logits = logits + params["blev"][None, :, None, None]
    wsm = jax.nn.softmax(logits, axis=1)                             # (B, 4, H, W)
    fused = sum(xs[i] * wsm[:, i:i + 1] for i in range(4))
    xp = jnp.pad(fused, ((0, 0), (0, 0), (1, 1), (1, 1)))
    acc = jnp.zeros((B, C, H, W), jnp.float32)
    for kh in range(3):
        for kw in range(3):
            acc = acc + jnp.einsum('oc,bchw->bohw', params["w3"][kh, kw],
                                   xp[:, :, kh:kh + H, kw:kw + W], precision=hi)
    out = acc * params["s3"][None, :, None, None] + params["b3"][None, :, None, None]
    return jnp.maximum(out, 0.0)


if __name__ == "__main__":
    B, C, H, W = 4, 32, 16, 16          # inter_dim=32 (small synthetic size)
    key = jax.random.PRNGKey(0)
    kp, k0, k1, k2, k3 = jax.random.split(key, 5)
    params = init_params(kp, inter_dim=C)
    x0 = jax.random.normal(k0, (B, C, H, W), jnp.float32)
    x1 = jax.random.normal(k1, (B, C, H, W), jnp.float32)
    x2 = jax.random.normal(k2, (B, C, H, W), jnp.float32)
    x3 = jax.random.normal(k3, (B, C, H, W), jnp.float32)

    out = asff4_forward(params, x0, x1, x2, x3)
    out = jax.block_until_ready(out)

    ref = reference_forward(params, x0, x1, x2, x3)
    assert out.shape == (B, C, H, W)
    # 3e-2 tolerance: the 3x3-conv matmul uses bf16 operands (f32 accumulation).
    assert jnp.allclose(out, ref, atol=3e-2, rtol=3e-2)
    print("KERNEL_OK")
</pallas_src>

<mosaic_0001>
module attributes {stable_mosaic.version = 11 : i64} {
  func.func @asff4_kernel(%arg0: i32, %arg1: memref<2x32x256xf32, #tpu.memory_space<vmem>>, %arg2: memref<2x32x256xf32, #tpu.memory_space<vmem>>, %arg3: memref<2x32x256xf32, #tpu.memory_space<vmem>>, %arg4: memref<2x32x256xf32, #tpu.memory_space<vmem>>, %arg5: memref<4x8x32xf32, #tpu.memory_space<vmem>>, %arg6: memref<4x8x1xf32, #tpu.memory_space<vmem>>, %arg7: memref<4x8x1xf32, #tpu.memory_space<vmem>>, %arg8: memref<4x32xf32, #tpu.memory_space<vmem>>, %arg9: memref<4x1xf32, #tpu.memory_space<vmem>>, %arg10: memref<32x288xbf16, #tpu.memory_space<vmem>>, %arg11: memref<32x1xf32, #tpu.memory_space<vmem>>, %arg12: memref<32x1xf32, #tpu.memory_space<vmem>>, %arg13: memref<9x256xf32, #tpu.memory_space<vmem>>, %arg14: memref<2x32x256xf32, #tpu.memory_space<vmem>>, %arg15: memref<32x256xf32, #tpu.memory_space<vmem>>, %arg16: memref<288x256xbf16, #tpu.memory_space<vmem>>) attributes {dimension_semantics = [#tpu.dimension_semantics<parallel>], iteration_bounds = array<i64: 2>, scalar_prefetch = 0 : i64, scratch_operands = 2 : i64, tpu.core_type = #tpu.core_type<tc>, window_params = [{transform_indices = @transform_0, window_bounds = array<i64: 2, 32, 256>}, {transform_indices = @transform_1, window_bounds = array<i64: 2, 32, 256>}, {transform_indices = @transform_2, window_bounds = array<i64: 2, 32, 256>}, {transform_indices = @transform_3, window_bounds = array<i64: 2, 32, 256>}, {pipeline_mode = #tpu.pipeline_mode<synchronous>, transform_indices = @transform_4, window_bounds = array<i64: 4, 8, 32>}, {pipeline_mode = #tpu.pipeline_mode<synchronous>, transform_indices = @transform_5, window_bounds = array<i64: 4, 8, 1>}, {pipeline_mode = #tpu.pipeline_mode<synchronous>, transform_indices = @transform_6, window_bounds = array<i64: 4, 8, 1>}, {pipeline_mode = #tpu.pipeline_mode<synchronous>, transform_indices = @transform_7, window_bounds = array<i64: 4, 32>}, {pipeline_mode = #tpu.pipeline_mode<synchronous>, transform_indices = @transform_8, window_bounds = array<i64: 4, 1>}, {pipeline_mode = #tpu.pipeline_mode<synchronous>, transform_indices = @transform_9, window_bounds = array<i64: 32, 288>}, {pipeline_mode = #tpu.pipeline_mode<synchronous>, transform_indices = @transform_10, window_bounds = array<i64: 32, 1>}, {pipeline_mode = #tpu.pipeline_mode<synchronous>, transform_indices = @transform_11, window_bounds = array<i64: 32, 1>}, {pipeline_mode = #tpu.pipeline_mode<synchronous>, transform_indices = @transform_12, window_bounds = array<i64: 9, 256>}, {transform_indices = @transform_13, window_bounds = array<i64: 2, 32, 256>}]} {
    %c0 = arith.constant 0 : index
    %c0_0 = arith.constant 0 : index
    %0 = vector.load %arg13[%c0, %c0_0] : memref<9x256xf32, #tpu.memory_space<vmem>>, vector<9x256xf32>
    %c0_1 = arith.constant 0 : index
    %c0_2 = arith.constant 0 : index
    %1 = vector.load %arg11[%c0_1, %c0_2] : memref<32x1xf32, #tpu.memory_space<vmem>>, vector<32x1xf32>
    %c0_3 = arith.constant 0 : index
    %c0_4 = arith.constant 0 : index
    %2 = vector.load %arg12[%c0_3, %c0_4] : memref<32x1xf32, #tpu.memory_space<vmem>>, vector<32x1xf32>
    %c0_5 = arith.constant 0 : index
    %c0_6 = arith.constant 0 : index
    %c0_7 = arith.constant 0 : index
    %3 = vector.load %arg1[%c0_5, %c0_6, %c0_7] : memref<2x32x256xf32, #tpu.memory_space<vmem>>, vector<1x32x256xf32>
    %4 = vector.shape_cast %3 : vector<1x32x256xf32> to vector<32x256xf32>
    %c0_8 = arith.constant 0 : index
    %c0_9 = arith.constant 0 : index
    %c0_10 = arith.constant 0 : index
    %5 = vector.load %arg2[%c0_8, %c0_9, %c0_10] : memref<2x32x256xf32, #tpu.memory_space<vmem>>, vector<1x32x256xf32>
    %6 = vector.shape_cast %5 : vector<1x32x256xf32> to vector<32x256xf32>
    %c0_11 = arith.constant 0 : index
    %c0_12 = arith.constant 0 : index
    %c0_13 = arith.constant 0 : index
    %7 = vector.load %arg3[%c0_11, %c0_12, %c0_13] : memref<2x32x256xf32, #tpu.memory_space<vmem>>, vector<1x32x256xf32>
    %8 = vector.shape_cast %7 : vector<1x32x256xf32> to vector<32x256xf32>
    %c0_14 = arith.constant 0 : index
    %c0_15 = arith.constant 0 : index
    %c0_16 = arith.constant 0 : index
    %9 = vector.load %arg4[%c0_14, %c0_15, %c0_16] : memref<2x32x256xf32, #tpu.memory_space<vmem>>, vector<1x32x256xf32>
    %10 = vector.shape_cast %9 : vector<1x32x256xf32> to vector<32x256xf32>
    %c0_17 = arith.constant 0 : index
    %c0_18 = arith.constant 0 : index
    %c0_19 = arith.constant 0 : index
    %11 = vector.load %arg5[%c0_17, %c0_18, %c0_19] : memref<4x8x32xf32, #tpu.memory_space<vmem>>, vector<1x8x32xf32>
    %12 = vector.shape_cast %11 : vector<1x8x32xf32> to vector<8x32xf32>
    %cst = arith.constant dense<0.000000e+00> : vector<8x256xf32>
    %13 = tpu.matmul %12, %4, %cst {dimension_numbers = #tpu.dot_dimension_numbers<[1], [0], [0], [1], [0, 0, 1, 1], [], []>} : vector<8x32xf32>, vector<32x256xf32>, vector<8x256xf32> -> vector<8x256xf32>
    %c0_20 = arith.constant 0 : index
    %c0_21 = arith.constant 0 : index
    %c0_22 = arith.constant 0 : index
    %14 = vector.load %arg6[%c0_20, %c0_21, %c0_22] : memref<4x8x1xf32, #tpu.memory_space<vmem>>, vector<1x8x1xf32>
    %15 = vector.shape_cast %14 : vector<1x8x1xf32> to vector<8x1xf32>
    %16 = vector.broadcast %15 : vector<8x1xf32> to vector<8x256xf32>
    %17 = arith.mulf %13, %16 : vector<8x256xf32>
    %c0_23 = arith.constant 0 : index
    %c0_24 = arith.constant 0 : index
    %c0_25 = arith.constant 0 : index
    %18 = vector.load %arg7[%c0_23, %c0_24, %c0_25] : memref<4x8x1xf32, #tpu.memory_space<vmem>>, vector<1x8x1xf32>
    %19 = vector.shape_cast %18 : vector<1x8x1xf32> to vector<8x1xf32>
    %20 = vector.broadcast %19 : vector<8x1xf32> to vector<8x256xf32>
    %21 = arith.addf %17, %20 : vector<8x256xf32>
    %cst_26 = arith.constant 0.000000e+00 : f32
    %22 = vector.broadcast %cst_26 : f32 to vector<8x256xf32>
    %23 = arith.maximumf %21, %22 : vector<8x256xf32>
    %c0_27 = arith.constant 0 : index
    %c0_28 = arith.constant 0 : index
    %24 = vector.load %arg15[%c0_27, %c0_28] : memref<32x256xf32, #tpu.memory_space<vmem>>, vector<8x256xf32>
    tpu.vector_store %arg15[%c0_27, %c0_28], %23 {strides = array<i32>} : memref<32x256xf32, #tpu.memory_space<vmem>>, vector<8x256xf32>,
    %c1 = arith.constant 1 : index
    %c0_29 = arith.constant 0 : index
    %c0_30 = arith.constant 0 : index
    %25 = vector.load %arg5[%c1, %c0_29, %c0_30] : memref<4x8x32xf32, #tpu.memory_space<vmem>>, vector<1x8x32xf32>
    %26 = vector.shape_cast %25 : vector<1x8x32xf32> to vector<8x32xf32>
    %cst_31 = arith.constant dense<0.000000e+00> : vector<8x256xf32>
    %27 = tpu.matmul %26, %6, %cst_31 {dimension_numbers = #tpu.dot_dimension_numbers<[1], [0], [0], [1], [0, 0, 1, 1], [], []>} : vector<8x32xf32>, vector<32x256xf32>, vector<8x256xf32> -> vector<8x256xf32>
    %c1_32 = arith.constant 1 : index
    %c0_33 = arith.constant 0 : index
    %c0_34 = arith.constant 0 : index
    %28 = vector.load %arg6[%c1_32, %c0_33, %c0_34] : memref<4x8x1xf32, #tpu.memory_space<vmem>>, vector<1x8x1xf32>
    %29 = vector.shape_cast %28 : vector<1x8x1xf32> to vector<8x1xf32>
    %30 = vector.broadcast %29 : vector<8x1xf32> to vector<8x256xf32>
    %31 = arith.mulf %27, %30 : vector<8x256xf32>
    %c1_35 = arith.constant 1 : index
    %c0_36 = arith.constant 0 : index
    %c0_37 = arith.constant 0 : index
    %32 = vector.load %arg7[%c1_35, %c0_36, %c0_37] : memref<4x8x1xf32, #tpu.memory_space<vmem>>, vector<1x8x1xf32>
    %33 = vector.shape_cast %32 : vector<1x8x1xf32> to vector<8x1xf32>
    %34 = vector.broadcast %33 : vector<8x1xf32> to vector<8x256xf32>
    %35 = arith.addf %31, %34 : vector<8x256xf32>
    %cst_38 = arith.constant 0.000000e+00 : f32
    %36 = vector.broadcast %cst_38 : f32 to vector<8x256xf32>
    %37 = arith.maximumf %35, %36 : vector<8x256xf32>
    %c8 = arith.constant 8 : index
    %c0_39 = arith.constant 0 : index
    %38 = vector.load %arg15[%c8, %c0_39] : memref<32x256xf32, #tpu.memory_space<vmem>>, vector<8x256xf32>
    tpu.vector_store %arg15[%c8, %c0_39], %37 {strides = array<i32>} : memref<32x256xf32, #tpu.memory_space<vmem>>, vector<8x256xf32>,
    %c2 = arith.constant 2 : index
    %c0_40 = arith.constant 0 : index
    %c0_41 = arith.constant 0 : index
    %39 = vector.load %arg5[%c2, %c0_40, %c0_41] : memref<4x8x32xf32, #tpu.memory_space<vmem>>, vector<1x8x32xf32>
    %40 = vector.shape_cast %39 : vector<1x8x32xf32> to vector<8x32xf32>
    %cst_42 = arith.constant dense<0.000000e+00> : vector<8x256xf32>
    %41 = tpu.matmul %40, %8, %cst_42 {dimension_numbers = #tpu.dot_dimension_numbers<[1], [0], [0], [1], [0, 0, 1, 1], [], []>} : vector<8x32xf32>, vector<32x256xf32>, vector<8x256xf32> -> vector<8x256xf32>
    %c2_43 = arith.constant 2 : index
    %c0_44 = arith.constant 0 : index
    %c0_45 = arith.constant 0 : index
    %42 = vector.load %arg6[%c2_43, %c0_44, %c0_45] : memref<4x8x1xf32, #tpu.memory_space<vmem>>, vector<1x8x1xf32>
    %43 = vector.shape_cast %42 : vector<1x8x1xf32> to vector<8x1xf32>
    %44 = vector.broadcast %43 : vector<8x1xf32> to vector<8x256xf32>
    %45 = arith.mulf %41, %44 : vector<8x256xf32>
    %c2_46 = arith.constant 2 : index
    %c0_47 = arith.constant 0 : index
    %c0_48 = arith.constant 0 : index
    %46 = vector.load %arg7[%c2_46, %c0_47, %c0_48] : memref<4x8x1xf32, #tpu.memory_space<vmem>>, vector<1x8x1xf32>
    %47 = vector.shape_cast %46 : vector<1x8x1xf32> to vector<8x1xf32>
    %48 = vector.broadcast %47 : vector<8x1xf32> to vector<8x256xf32>
    %49 = arith.addf %45, %48 : vector<8x256xf32>
    %cst_49 = arith.constant 0.000000e+00 : f32
    %50 = vector.broadcast %cst_49 : f32 to vector<8x256xf32>
    %51 = arith.maximumf %49, %50 : vector<8x256xf32>
    %c16 = arith.constant 16 : index
    %c0_50 = arith.constant 0 : index
    %52 = vector.load %arg15[%c16, %c0_50] : memref<32x256xf32, #tpu.memory_space<vmem>>, vector<8x256xf32>
    tpu.vector_store %arg15[%c16, %c0_50], %51 {strides = array<i32>} : memref<32x256xf32, #tpu.memory_space<vmem>>, vector<8x256xf32>,
    %c3 = arith.constant 3 : index
    %c0_51 = arith.constant 0 : index
    %c0_52 = arith.constant 0 : index
    %53 = vector.load %arg5[%c3, %c0_51, %c0_52] : memref<4x8x32xf32, #tpu.memory_space<vmem>>, vector<1x8x32xf32>
    %54 = vector.shape_cast %53 : vector<1x8x32xf32> to vector<8x32xf32>
    %cst_53 = arith.constant dense<0.000000e+00> : vector<8x256xf32>
    %55 = tpu.matmul %54, %10, %cst_53 {dimension_numbers = #tpu.dot_dimension_numbers<[1], [0], [0], [1], [0, 0, 1, 1], [], []>} : vector<8x32xf32>, vector<32x256xf32>, vector<8x256xf32> -> vector<8x256xf32>
    %c3_54 = arith.constant 3 : index
    %c0_55 = arith.constant 0 : index
    %c0_56 = arith.constant 0 : index
    %56 = vector.load %arg6[%c3_54, %c0_55, %c0_56] : memref<4x8x1xf32, #tpu.memory_space<vmem>>, vector<1x8x1xf32>
    %57 = vector.shape_cast %56 : vector<1x8x1xf32> to vector<8x1xf32>
    %58 = vector.broadcast %57 : vector<8x1xf32> to vector<8x256xf32>
    %59 = arith.mulf %55, %58 : vector<8x256xf32>
    %c3_57 = arith.constant 3 : index
    %c0_58 = arith.constant 0 : index
    %c0_59 = arith.constant 0 : index
    %60 = vector.load %arg7[%c3_57, %c0_58, %c0_59] : memref<4x8x1xf32, #tpu.memory_space<vmem>>, vector<1x8x1xf32>
    %61 = vector.shape_cast %60 : vector<1x8x1xf32> to vector<8x1xf32>
    %62 = vector.broadcast %61 : vector<8x1xf32> to vector<8x256xf32>
    %63 = arith.addf %59, %62 : vector<8x256xf32>
    %cst_60 = arith.constant 0.000000e+00 : f32
    %64 = vector.broadcast %cst_60 : f32 to vector<8x256xf32>
    %65 = arith.maximumf %63, %64 : vector<8x256xf32>
    %c24 = arith.constant 24 : index
    %c0_61 = arith.constant 0 : index
    %66 = vector.load %arg15[%c24, %c0_61] : memref<32x256xf32, #tpu.memory_space<vmem>>, vector<8x256xf32>
    tpu.vector_store %arg15[%c24, %c0_61], %65 {strides = array<i32>} : memref<32x256xf32, #tpu.memory_space<vmem>>, vector<8x256xf32>,
    %c0_62 = arith.constant 0 : index
    %c0_63 = arith.constant 0 : index
    %67 = vector.load %arg8[%c0_62, %c0_63] : memref<4x32xf32, #tpu.memory_space<vmem>>, vector<4x32xf32>
    %c0_64 = arith.constant 0 : index
    %c0_65 = arith.constant 0 : index
    %68 = vector.load %arg15[%c0_64, %c0_65] : memref<32x256xf32, #tpu.memory_space<vmem>>, vector<32x256xf32>
    %cst_66 = arith.constant dense<0.000000e+00> : vector<4x256xf32>
    %69 = tpu.matmul %67, %68, %cst_66 {dimension_numbers = #tpu.dot_dimension_numbers<[1], [0], [0], [1], [0, 0, 1, 1], [], []>} : vector<4x32xf32>, vector<32x256xf32>, vector<4x256xf32> -> vector<4x256xf32>
    %c0_67 = arith.constant 0 : index
    %c0_68 = arith.constant 0 : index
    %70 = vector.load %arg9[%c0_67, %c0_68] : memref<4x1xf32, #tpu.memory_space<vmem>>, vector<4x1xf32>
    %71 = vector.broadcast %70 : vector<4x1xf32> to vector<4x256xf32>
    %72 = arith.addf %69, %71 : vector<4x256xf32>
    %cst_69 = arith.constant dense<0xFF800000> : vector<256xf32>
    %73 = vector.multi_reduction <maximumf>, %72, %cst_69 [0] : vector<4x256xf32> to vector<256xf32>
    %74 = vector.shape_cast %73 : vector<256xf32> to vector<1x256xf32>
    %75 = vector.broadcast %74 : vector<1x256xf32> to vector<4x256xf32>
    %76 = arith.subf %72, %75 : vector<4x256xf32>
    %77 = math.exp %76 : vector<4x256xf32>
    %cst_70 = arith.constant dense<0.000000e+00> : vector<256xf32>
    %78 = vector.multi_reduction <add>, %77, %cst_70 [0] : vector<4x256xf32> to vector<256xf32>
    %79 = vector.shape_cast %78 : vector<256xf32> to vector<1x256xf32>
    %80 = tpu.reciprocal %79 {approx = true} : vector<1x256xf32> -> vector<1x256xf32>
    %81 = vector.broadcast %80 : vector<1x256xf32> to vector<4x256xf32>
    %82 = arith.mulf %77, %81 : vector<4x256xf32>
    %83 = vector.extract_strided_slice %82 {offsets = [0, 0], sizes = [1, 256], strides = [1, 1]} : vector<4x256xf32> to vector<1x256xf32>
    %84 = vector.broadcast %83 : vector<1x256xf32> to vector<32x256xf32>
    %85 = arith.mulf %4, %84 : vector<32x256xf32>
    %86 = vector.extract_strided_slice %82 {offsets = [1, 0], sizes = [1, 256], strides = [1, 1]} : vector<4x256xf32> to vector<1x256xf32>
    %87 = vector.broadcast %86 : vector<1x256xf32> to vector<32x256xf32>
    %88 = arith.mulf %6, %87 : vector<32x256xf32>
    %89 = arith.addf %85, %88 : vector<32x256xf32>
    %90 = vector.extract_strided_slice %82 {offsets = [2, 0], sizes = [1, 256], strides = [1, 1]} : vector<4x256xf32> to vector<1x256xf32>
    %91 = vector.broadcast %90 : vector<1x256xf32> to vector<32x256xf32>
    %92 = arith.mulf %8, %91 : vector<32x256xf32>
    %93 = arith.addf %89, %92 : vector<32x256xf32>
    %94 = vector.extract_strided_slice %82 {offsets = [3, 0], sizes = [1, 256], strides = [1, 1]} : vector<4x256xf32> to vector<1x256xf32>
    %95 = vector.broadcast %94 : vector<1x256xf32> to vector<32x256xf32>
    %96 = arith.mulf %10, %95 : vector<32x256xf32>
    %97 = arith.addf %93, %96 : vector<32x256xf32>
    %c17_i32 = arith.constant 17 : i32
    %98 = tpu.dynamic_rotate %97 by %c17_i32 dim 1 : vector<32x256xf32>, i32 -> vector<32x256xf32>
    %99 = vector.extract_strided_slice %0 {offsets = [0, 0], sizes = [1, 256], strides = [1, 1]} : vector<9x256xf32> to vector<1x256xf32>
    %100 = vector.broadcast %99 : vector<1x256xf32> to vector<32x256xf32>
    %101 = arith.mulf %98, %100 : vector<32x256xf32>
    %102 = arith.truncf %101 : vector<32x256xf32> to vector<32x256xbf16>
    %c0_71 = arith.constant 0 : index
    %c0_72 = arith.constant 0 : index
    %103 = vector.load %arg16[%c0_71, %c0_72] : memref<288x256xbf16, #tpu.memory_space<vmem>>, vector<32x256xbf16>
    tpu.vector_store %arg16[%c0_71, %c0_72], %102 {strides = array<i32>} : memref<288x256xbf16, #tpu.memory_space<vmem>>, vector<32x256xbf16>,
    %c16_i32 = arith.constant 16 : i32
    %104 = tpu.dynamic_rotate %97 by %c16_i32 dim 1 : vector<32x256xf32>, i32 -> vector<32x256xf32>
    %105 = vector.extract_strided_slice %0 {offsets = [1, 0], sizes = [1, 256], strides = [1, 1]} : vector<9x256xf32> to vector<1x256xf32>
    %106 = vector.broadcast %105 : vector<1x256xf32> to vector<32x256xf32>
    %107 = arith.mulf %104, %106 : vector<32x256xf32>
    %108 = arith.truncf %107 : vector<32x256xf32> to vector<32x256xbf16>
    %c32 = arith.constant 32 : index
    %c0_73 = arith.constant 0 : index
    %109 = vector.load %arg16[%c32, %c0_73] : memref<288x256xbf16, #tpu.memory_space<vmem>>, vector<32x256xbf16>
    tpu.vector_store %arg16[%c32, %c0_73], %108 {strides = array<i32>} : memref<288x256xbf16, #tpu.memory_space<vmem>>, vector<32x256xbf16>,
    %c15_i32 = arith.constant 15 : i32
    %110 = tpu.dynamic_rotate %97 by %c15_i32 dim 1 : vector<32x256xf32>, i32 -> vector<32x256xf32>
    %111 = vector.extract_strided_slice %0 {offsets = [2, 0], sizes = [1, 256], strides = [1, 1]} : vector<9x256xf32> to vector<1x256xf32>
    %112 = vector.broadcast %111 : vector<1x256xf32> to vector<32x256xf32>
    %113 = arith.mulf %110, %112 : vector<32x256xf32>
    %114 = arith.truncf %113 : vector<32x256xf32> to vector<32x256xbf16>
    %c64 = arith.constant 64 : index
    %c0_74 = arith.constant 0 : index
    %115 = vector.load %arg16[%c64, %c0_74] : memref<288x256xbf16, #tpu.memory_space<vmem>>, vector<32x256xbf16>
    tpu.vector_store %arg16[%c64, %c0_74], %114 {strides = array<i32>} : memref<288x256xbf16, #tpu.memory_space<vmem>>, vector<32x256xbf16>,
    %c1_i32 = arith.constant 1 : i32
    %116 = tpu.dynamic_rotate %97 by %c1_i32 dim 1 : vector<32x256xf32>, i32 -> vector<32x256xf32>
    %117 = vector.extract_strided_slice %0 {offsets = [3, 0], sizes = [1, 256], strides = [1, 1]} : vector<9x256xf32> to vector<1x256xf32>
    %118 = vector.broadcast %117 : vector<1x256xf32> to vector<32x256xf32>
    %119 = arith.mulf %116, %118 : vector<32x256xf32>
    %120 = arith.truncf %119 : vector<32x256xf32> to vector<32x256xbf16>
    %c96 = arith.constant 96 : index
    %c0_75 = arith.constant 0 : index
    %121 = vector.load %arg16[%c96, %c0_75] : memref<288x256xbf16, #tpu.memory_space<vmem>>, vector<32x256xbf16>
    tpu.vector_store %arg16[%c96, %c0_75], %120 {strides = array<i32>} : memref<288x256xbf16, #tpu.memory_space<vmem>>, vector<32x256xbf16>,
    %122 = arith.truncf %97 : vector<32x256xf32> to vector<32x256xbf16>
    %c128 = arith.constant 128 : index
    %c0_76 = arith.constant 0 : index
    %123 = vector.load %arg16[%c128, %c0_76] : memref<288x256xbf16, #tpu.memory_space<vmem>>, vector<32x256xbf16>
    tpu.vector_store %arg16[%c128, %c0_76], %122 {strides = array<i32>} : memref<288x256xbf16, #tpu.memory_space<vmem>>, vector<32x256xbf16>,
    %c255_i32 = arith.constant 255 : i32
    %124 = tpu.dynamic_rotate %97 by %c255_i32 dim 1 : vector<32x256xf32>, i32 -> vector<32x256xf32>
    %125 = vector.extract_strided_slice %0 {offsets = [5, 0], sizes = [1, 256], strides = [1, 1]} : vector<9x256xf32> to vector<1x256xf32>
    %126 = vector.broadcast %125 : vector<1x256xf32> to vector<32x256xf32>
    %127 = arith.mulf %124, %126 : vector<32x256xf32>
    %128 = arith.truncf %127 : vector<32x256xf32> to vector<32x256xbf16>
    %c160 = arith.constant 160 : index
    %c0_77 = arith.constant 0 : index
    %129 = vector.load %arg16[%c160, %c0_77] : memref<288x256xbf16, #tpu.memory_space<vmem>>, vector<32x256xbf16>
    tpu.vector_store %arg16[%c160, %c0_77], %128 {strides = array<i32>} : memref<288x256xbf16, #tpu.memory_space<vmem>>, vector<32x256xbf16>,
    %c241_i32 = arith.constant 241 : i32
    %130 = tpu.dynamic_rotate %97 by %c241_i32 dim 1 : vector<32x256xf32>, i32 -> vector<32x256xf32>
    %131 = vector.extract_strided_slice %0 {offsets = [6, 0], sizes = [1, 256], strides = [1, 1]} : vector<9x256xf32> to vector<1x256xf32>
    %132 = vector.broadcast %131 : vector<1x256xf32> to vector<32x256xf32>
    %133 = arith.mulf %130, %132 : vector<32x256xf32>
    %134 = arith.truncf %133 : vector<32x256xf32> to vector<32x256xbf16>
    %c192 = arith.constant 192 : index
    %c0_78 = arith.constant 0 : index
    %135 = vector.load %arg16[%c192, %c0_78] : memref<288x256xbf16, #tpu.memory_space<vmem>>, vector<32x256xbf16>
    tpu.vector_store %arg16[%c192, %c0_78], %134 {strides = array<i32>} : memref<288x256xbf16, #tpu.memory_space<vmem>>, vector<32x256xbf16>,
    %c240_i32 = arith.constant 240 : i32
    %136 = tpu.dynamic_rotate %97 by %c240_i32 dim 1 : vector<32x256xf32>, i32 -> vector<32x256xf32>
    %137 = vector.extract_strided_slice %0 {offsets = [7, 0], sizes = [1, 256], strides = [1, 1]} : vector<9x256xf32> to vector<1x256xf32>
    %138 = vector.broadcast %137 : vector<1x256xf32> to vector<32x256xf32>
    %139 = arith.mulf %136, %138 : vector<32x256xf32>
    %140 = arith.truncf %139 : vector<32x256xf32> to vector<32x256xbf16>
    %c224 = arith.constant 224 : index
    %c0_79 = arith.constant 0 : index
    %141 = vector.load %arg16[%c224, %c0_79] : memref<288x256xbf16, #tpu.memory_space<vmem>>, vector<32x256xbf16>
    tpu.vector_store %arg16[%c224, %c0_79], %140 {strides = array<i32>} : memref<288x256xbf16, #tpu.memory_space<vmem>>, vector<32x256xbf16>,
    %c239_i32 = arith.constant 239 : i32
    %142 = tpu.dynamic_rotate %97 by %c239_i32 dim 1 : vector<32x256xf32>, i32 -> vector<32x256xf32>
    %143 = vector.extract_strided_slice %0 {offsets = [8, 0], sizes = [1, 256], strides = [1, 1]} : vector<9x256xf32> to vector<1x256xf32>
    %144 = vector.broadcast %143 : vector<1x256xf32> to vector<32x256xf32>
    %145 = arith.mulf %142, %144 : vector<32x256xf32>
    %146 = arith.truncf %145 : vector<32x256xf32> to vector<32x256xbf16>
    %c256 = arith.constant 256 : index
    %c0_80 = arith.constant 0 : index
    %147 = vector.load %arg16[%c256, %c0_80] : memref<288x256xbf16, #tpu.memory_space<vmem>>, vector<32x256xbf16>
    tpu.vector_store %arg16[%c256, %c0_80], %146 {strides = array<i32>} : memref<288x256xbf16, #tpu.memory_space<vmem>>, vector<32x256xbf16>,
    %c0_81 = arith.constant 0 : index
    %c0_82 = arith.constant 0 : index
    %148 = vector.load %arg10[%c0_81, %c0_82] : memref<32x288xbf16, #tpu.memory_space<vmem>>, vector<32x288xbf16>
    %c0_83 = arith.constant 0 : index
    %c0_84 = arith.constant 0 : index
    %149 = vector.load %arg16[%c0_83, %c0_84] : memref<288x256xbf16, #tpu.memory_space<vmem>>, vector<288x256xbf16>
    %cst_85 = arith.constant dense<0.000000e+00> : vector<32x256xf32>
    %150 = tpu.matmul %148, %149, %cst_85 {dimension_numbers = #tpu.dot_dimension_numbers<[1], [0], [0], [1], [0, 0, 1, 1], [], []>} : vector<32x288xbf16>, vector<288x256xbf16>, vector<32x256xf32> -> vector<32x256xf32>
    %151 = vector.broadcast %1 : vector<32x1xf32> to vector<32x256xf32>
    %152 = arith.mulf %150, %151 : vector<32x256xf32>
    %153 = vector.broadcast %2 : vector<32x1xf32> to vector<32x256xf32>
    %154 = arith.addf %152, %153 : vector<32x256xf32>
    %cst_86 = arith.constant 0.000000e+00 : f32
    %155 = vector.broadcast %cst_86 : f32 to vector<32x256xf32>
    %156 = arith.maximumf %154, %155 : vector<32x256xf32>
    %c0_87 = arith.constant 0 : index
    %c0_88 = arith.constant 0 : index
    %c0_89 = arith.constant 0 : index
    %157 = vector.load %arg14[%c0_87, %c0_88, %c0_89] : memref<2x32x256xf32, #tpu.memory_space<vmem>>, vector<1x32x256xf32>
    %158 = vector.shape_cast %157 : vector<1x32x256xf32> to vector<32x256xf32>
    %159 = vector.shape_cast %156 : vector<32x256xf32> to vector<1x32x256xf32>
    tpu.vector_store %arg14[%c0_87, %c0_88, %c0_89], %159 {strides = array<i32>} : memref<2x32x256xf32, #tpu.memory_space<vmem>>, vector<1x32x256xf32>,
    %c1_90 = arith.constant 1 : index
    %c0_91 = arith.constant 0 : index
    %c0_92 = arith.constant 0 : index
    %160 = vector.load %arg1[%c1_90, %c0_91, %c0_92] : memref<2x32x256xf32, #tpu.memory_space<vmem>>, vector<1x32x256xf32>
    %161 = vector.shape_cast %160 : vector<1x32x256xf32> to vector<32x256xf32>
    %c1_93 = arith.constant 1 : index
    %c0_94 = arith.constant 0 : index
    %c0_95 = arith.constant 0 : index
    %162 = vector.load %arg2[%c1_93, %c0_94, %c0_95] : memref<2x32x256xf32, #tpu.memory_space<vmem>>, vector<1x32x256xf32>
    %163 = vector.shape_cast %162 : vector<1x32x256xf32> to vector<32x256xf32>
    %c1_96 = arith.constant 1 : index
    %c0_97 = arith.constant 0 : index
    %c0_98 = arith.constant 0 : index
    %164 = vector.load %arg3[%c1_96, %c0_97, %c0_98] : memref<2x32x256xf32, #tpu.memory_space<vmem>>, vector<1x32x256xf32>
    %165 = vector.shape_cast %164 : vector<1x32x256xf32> to vector<32x256xf32>
    %c1_99 = arith.constant 1 : index
    %c0_100 = arith.constant 0 : index
    %c0_101 = arith.constant 0 : index
    %166 = vector.load %arg4[%c1_99, %c0_100, %c0_101] : memref<2x32x256xf32, #tpu.memory_space<vmem>>, vector<1x32x256xf32>
    %167 = vector.shape_cast %166 : vector<1x32x256xf32> to vector<32x256xf32>
    %c0_102 = arith.constant 0 : index
    %c0_103 = arith.constant 0 : index
    %c0_104 = arith.constant 0 : index
    %168 = vector.load %arg5[%c0_102, %c0_103, %c0_104] : memref<4x8x32xf32, #tpu.memory_space<vmem>>, vector<1x8x32xf32>
    %169 = vector.shape_cast %168 : vector<1x8x32xf32> to vector<8x32xf32>
    %cst_105 = arith.constant dense<0.000000e+00> : vector<8x256xf32>
    %170 = tpu.matmul %169, %161, %cst_105 {dimension_numbers = #tpu.dot_dimension_numbers<[1], [0], [0], [1], [0, 0, 1, 1], [], []>} : vector<8x32xf32>, vector<32x256xf32>, vector<8x256xf32> -> vector<8x256xf32>
    %c0_106 = arith.constant 0 : index
    %c0_107 = arith.constant 0 : index
    %c0_108 = arith.constant 0 : index
    %171 = vector.load %arg6[%c0_106, %c0_107, %c0_108] : memref<4x8x1xf32, #tpu.memory_space<vmem>>, vector<1x8x1xf32>
    %172 = vector.shape_cast %171 : vector<1x8x1xf32> to vector<8x1xf32>
    %173 = vector.broadcast %172 : vector<8x1xf32> to vector<8x256xf32>
    %174 = arith.mulf %170, %173 : vector<8x256xf32>
    %c0_109 = arith.constant 0 : index
    %c0_110 = arith.constant 0 : index
    %c0_111 = arith.constant 0 : index
    %175 = vector.load %arg7[%c0_109, %c0_110, %c0_111] : memref<4x8x1xf32, #tpu.memory_space<vmem>>, vector<1x8x1xf32>
    %176 = vector.shape_cast %175 : vector<1x8x1xf32> to vector<8x1xf32>
    %177 = vector.broadcast %176 : vector<8x1xf32> to vector<8x256xf32>
    %178 = arith.addf %174, %177 : vector<8x256xf32>
    %cst_112 = arith.constant 0.000000e+00 : f32
    %179 = vector.broadcast %cst_112 : f32 to vector<8x256xf32>
    %180 = arith.maximumf %178, %179 : vector<8x256xf32>
    %c0_113 = arith.constant 0 : index
    %c0_114 = arith.constant 0 : index
    %181 = vector.load %arg15[%c0_113, %c0_114] : memref<32x256xf32, #tpu.memory_space<vmem>>, vector<8x256xf32>
    tpu.vector_store %arg15[%c0_113, %c0_114], %180 {strides = array<i32>} : memref<32x256xf32, #tpu.memory_space<vmem>>, vector<8x256xf32>,
    %c1_115 = arith.constant 1 : index
    %c0_116 = arith.constant 0 : index
    %c0_117 = arith.constant 0 : index
    %182 = vector.load %arg5[%c1_115, %c0_116, %c0_117] : memref<4x8x32xf32, #tpu.memory_space<vmem>>, vector<1x8x32xf32>
    %183 = vector.shape_cast %182 : vector<1x8x32xf32> to vector<8x32xf32>
    %cst_118 = arith.constant dense<0.000000e+00> : vector<8x256xf32>
    %184 = tpu.matmul %183, %163, %cst_118 {dimension_numbers = #tpu.dot_dimension_numbers<[1], [0], [0], [1], [0, 0, 1, 1], [], []>} : vector<8x32xf32>, vector<32x256xf32>, vector<8x256xf32> -> vector<8x256xf32>
    %c1_119 = arith.constant 1 : index
    %c0_120 = arith.constant 0 : index
    %c0_121 = arith.constant 0 : index
    %185 = vector.load %arg6[%c1_119, %c0_120, %c0_121] : memref<4x8x1xf32, #tpu.memory_space<vmem>>, vector<1x8x1xf32>
    %186 = vector.shape_cast %185 : vector<1x8x1xf32> to vector<8x1xf32>
    %187 = vector.broadcast %186 : vector<8x1xf32> to vector<8x256xf32>
    %188 = arith.mulf %184, %187 : vector<8x256xf32>
    %c1_122 = arith.constant 1 : index
    %c0_123 = arith.constant 0 : index
    %c0_124 = arith.constant 0 : index
    %189 = vector.load %arg7[%c1_122, %c0_123, %c0_124] : memref<4x8x1xf32, #tpu.memory_space<vmem>>, vector<1x8x1xf32>
    %190 = vector.shape_cast %189 : vector<1x8x1xf32> to vector<8x1xf32>
    %191 = vector.broadcast %190 : vector<8x1xf32> to vector<8x256xf32>
    %192 = arith.addf %188, %191 : vector<8x256xf32>
    %cst_125 = arith.constant 0.000000e+00 : f32
    %193 = vector.broadcast %cst_125 : f32 to vector<8x256xf32>
    %194 = arith.maximumf %192, %193 : vector<8x256xf32>
    %c8_126 = arith.constant 8 : index
    %c0_127 = arith.constant 0 : index
    %195 = vector.load %arg15[%c8_126, %c0_127] : memref<32x256xf32, #tpu.memory_space<vmem>>, vector<8x256xf32>
    tpu.vector_store %arg15[%c8_126, %c0_127], %194 {strides = array<i32>} : memref<32x256xf32, #tpu.memory_space<vmem>>, vector<8x256xf32>,
    %c2_128 = arith.constant 2 : index
    %c0_129 = arith.constant 0 : index
    %c0_130 = arith.constant 0 : index
    %196 = vector.load %arg5[%c2_128, %c0_129, %c0_130] : memref<4x8x32xf32, #tpu.memory_space<vmem>>, vector<1x8x32xf32>
    %197 = vector.shape_cast %196 : vector<1x8x32xf32> to vector<8x32xf32>
    %cst_131 = arith.constant dense<0.000000e+00> : vector<8x256xf32>
    %198 = tpu.matmul %197, %165, %cst_131 {dimension_numbers = #tpu.dot_dimension_numbers<[1], [0], [0], [1], [0, 0, 1, 1], [], []>} : vector<8x32xf32>, vector<32x256xf32>, vector<8x256xf32> -> vector<8x256xf32>
    %c2_132 = arith.constant 2 : index
    %c0_133 = arith.constant 0 : index
    %c0_134 = arith.constant 0 : index
    %199 = vector.load %arg6[%c2_132, %c0_133, %c0_134] : memref<4x8x1xf32, #tpu.memory_space<vmem>>, vector<1x8x1xf32>
    %200 = vector.shape_cast %199 : vector<1x8x1xf32> to vector<8x1xf32>
    %201 = vector.broadcast %200 : vector<8x1xf32> to vector<8x256xf32>
    %202 = arith.mulf %198, %201 : vector<8x256xf32>
    %c2_135 = arith.constant 2 : index
    %c0_136 = arith.constant 0 : index
    %c0_137 = arith.constant 0 : index
    %203 = vector.load %arg7[%c2_135, %c0_136, %c0_137] : memref<4x8x1xf32, #tpu.memory_space<vmem>>, vector<1x8x1xf32>
    %204 = vector.shape_cast %203 : vector<1x8x1xf32> to vector<8x1xf32>
    %205 = vector.broadcast %204 : vector<8x1xf32> to vector<8x256xf32>
    %206 = arith.addf %202, %205 : vector<8x256xf32>
    %cst_138 = arith.constant 0.000000e+00 : f32
    %207 = vector.broadcast %cst_138 : f32 to vector<8x256xf32>
    %208 = arith.maximumf %206, %207 : vector<8x256xf32>
    %c16_139 = arith.constant 16 : index
    %c0_140 = arith.constant 0 : index
    %209 = vector.load %arg15[%c16_139, %c0_140] : memref<32x256xf32, #tpu.memory_space<vmem>>, vector<8x256xf32>
    tpu.vector_store %arg15[%c16_139, %c0_140], %208 {strides = array<i32>} : memref<32x256xf32, #tpu.memory_space<vmem>>, vector<8x256xf32>,
    %c3_141 = arith.constant 3 : index
    %c0_142 = arith.constant 0 : index
    %c0_143 = arith.constant 0 : index
    %210 = vector.load %arg5[%c3_141, %c0_142, %c0_143] : memref<4x8x32xf32, #tpu.memory_space<vmem>>, vector<1x8x32xf32>
    %211 = vector.shape_cast %210 : vector<1x8x32xf32> to vector<8x32xf32>
    %cst_144 = arith.constant dense<0.000000e+00> : vector<8x256xf32>
    %212 = tpu.matmul %211, %167, %cst_144 {dimension_numbers = #tpu.dot_dimension_numbers<[1], [0], [0], [1], [0, 0, 1, 1], [], []>} : vector<8x32xf32>, vector<32x256xf32>, vector<8x256xf32> -> vector<8x256xf32>
    %c3_145 = arith.constant 3 : index
    %c0_146 = arith.constant 0 : index
    %c0_147 = arith.constant 0 : index
    %213 = vector.load %arg6[%c3_145, %c0_146, %c0_147] : memref<4x8x1xf32, #tpu.memory_space<vmem>>, vector<1x8x1xf32>
    %214 = vector.shape_cast %213 : vector<1x8x1xf32> to vector<8x1xf32>
    %215 = vector.broadcast %214 : vector<8x1xf32> to vector<8x256xf32>
    %216 = arith.mulf %212, %215 : vector<8x256xf32>
    %c3_148 = arith.constant 3 : index
    %c0_149 = arith.constant 0 : index
    %c0_150 = arith.constant 0 : index
    %217 = vector.load %arg7[%c3_148, %c0_149, %c0_150] : memref<4x8x1xf32, #tpu.memory_space<vmem>>, vector<1x8x1xf32>
    %218 = vector.shape_cast %217 : vector<1x8x1xf32> to vector<8x1xf32>
    %219 = vector.broadcast %218 : vector<8x1xf32> to vector<8x256xf32>
    %220 = arith.addf %216, %219 : vector<8x256xf32>
    %cst_151 = arith.constant 0.000000e+00 : f32
    %221 = vector.broadcast %cst_151 : f32 to vector<8x256xf32>
    %222 = arith.maximumf %220, %221 : vector<8x256xf32>
    %c24_152 = arith.constant 24 : index
    %c0_153 = arith.constant 0 : index
    %223 = vector.load %arg15[%c24_152, %c0_153] : memref<32x256xf32, #tpu.memory_space<vmem>>, vector<8x256xf32>
    tpu.vector_store %arg15[%c24_152, %c0_153], %222 {strides = array<i32>} : memref<32x256xf32, #tpu.memory_space<vmem>>, vector<8x256xf32>,
    %c0_154 = arith.constant 0 : index
    %c0_155 = arith.constant 0 : index
    %224 = vector.load %arg8[%c0_154, %c0_155] : memref<4x32xf32, #tpu.memory_space<vmem>>, vector<4x32xf32>
    %c0_156 = arith.constant 0 : index
    %c0_157 = arith.constant 0 : index
    %225 = vector.load %arg15[%c0_156, %c0_157] : memref<32x256xf32, #tpu.memory_space<vmem>>, vector<32x256xf32>
    %cst_158 = arith.constant dense<0.000000e+00> : vector<4x256xf32>
    %226 = tpu.matmul %224, %225, %cst_158 {dimension_numbers = #tpu.dot_dimension_numbers<[1], [0], [0], [1], [0, 0, 1, 1], [], []>} : vector<4x32xf32>, vector<32x256xf32>, vector<4x256xf32> -> vector<4x256xf32>
    %c0_159 = arith.constant 0 : index
    %c0_160 = arith.constant 0 : index
    %227 = vector.load %arg9[%c0_159, %c0_160] : memref<4x1xf32, #tpu.memory_space<vmem>>, vector<4x1xf32>
    %228 = vector.broadcast %227 : vector<4x1xf32> to vector<4x256xf32>
    %229 = arith.addf %226, %228 : vector<4x256xf32>
    %cst_161 = arith.constant dense<0xFF800000> : vector<256xf32>
    %230 = vector.multi_reduction <maximumf>, %229, %cst_161 [0] : vector<4x256xf32> to vector<256xf32>
    %231 = vector.shape_cast %230 : vector<256xf32> to vector<1x256xf32>
    %232 = vector.broadcast %231 : vector<1x256xf32> to vector<4x256xf32>
    %233 = arith.subf %229, %232 : vector<4x256xf32>
    %234 = math.exp %233 : vector<4x256xf32>
    %cst_162 = arith.constant dense<0.000000e+00> : vector<256xf32>
    %235 = vector.multi_reduction <add>, %234, %cst_162 [0] : vector<4x256xf32> to vector<256xf32>
    %236 = vector.shape_cast %235 : vector<256xf32> to vector<1x256xf32>
    %237 = tpu.reciprocal %236 {approx = true} : vector<1x256xf32> -> vector<1x256xf32>
    %238 = vector.broadcast %237 : vector<1x256xf32> to vector<4x256xf32>
    %239 = arith.mulf %234, %238 : vector<4x256xf32>
    %240 = vector.extract_strided_slice %239 {offsets = [0, 0], sizes = [1, 256], strides = [1, 1]} : vector<4x256xf32> to vector<1x256xf32>
    %241 = vector.broadcast %240 : vector<1x256xf32> to vector<32x256xf32>
    %242 = arith.mulf %161, %241 : vector<32x256xf32>
    %243 = vector.extract_strided_slice %239 {offsets = [1, 0], sizes = [1, 256], strides = [1, 1]} : vector<4x256xf32> to vector<1x256xf32>
    %244 = vector.broadcast %243 : vector<1x256xf32> to vector<32x256xf32>
    %245 = arith.mulf %163, %244 : vector<32x256xf32>
    %246 = arith.addf %242, %245 : vector<32x256xf32>
    %247 = vector.extract_strided_slice %239 {offsets = [2, 0], sizes = [1, 256], strides = [1, 1]} : vector<4x256xf32> to vector<1x256xf32>
    %248 = vector.broadcast %247 : vector<1x256xf32> to vector<32x256xf32>
    %249 = arith.mulf %165, %248 : vector<32x256xf32>
    %250 = arith.addf %246, %249 : vector<32x256xf32>
    %251 = vector.extract_strided_slice %239 {offsets = [3, 0], sizes = [1, 256], strides = [1, 1]} : vector<4x256xf32> to vector<1x256xf32>
    %252 = vector.broadcast %251 : vector<1x256xf32> to vector<32x256xf32>
    %253 = arith.mulf %167, %252 : vector<32x256xf32>
    %254 = arith.addf %250, %253 : vector<32x256xf32>
    %c17_i32_163 = arith.constant 17 : i32
    %255 = tpu.dynamic_rotate %254 by %c17_i32_163 dim 1 : vector<32x256xf32>, i32 -> vector<32x256xf32>
    %256 = vector.extract_strided_slice %0 {offsets = [0, 0], sizes = [1, 256], strides = [1, 1]} : vector<9x256xf32> to vector<1x256xf32>
    %257 = vector.broadcast %256 : vector<1x256xf32> to vector<32x256xf32>
    %258 = arith.mulf %255, %257 : vector<32x256xf32>
    %259 = arith.truncf %258 : vector<32x256xf32> to vector<32x256xbf16>
    %c0_164 = arith.constant 0 : index
    %c0_165 = arith.constant 0 : index
    %260 = vector.load %arg16[%c0_164, %c0_165] : memref<288x256xbf16, #tpu.memory_space<vmem>>, vector<32x256xbf16>
    tpu.vector_store %arg16[%c0_164, %c0_165], %259 {strides = array<i32>} : memref<288x256xbf16, #tpu.memory_space<vmem>>, vector<32x256xbf16>,
    %c16_i32_166 = arith.constant 16 : i32
    %261 = tpu.dynamic_rotate %254 by %c16_i32_166 dim 1 : vector<32x256xf32>, i32 -> vector<32x256xf32>
    %262 = vector.extract_strided_slice %0 {offsets = [1, 0], sizes = [1, 256], strides = [1, 1]} : vector<9x256xf32> to vector<1x256xf32>
    %263 = vector.broadcast %262 : vector<1x256xf32> to vector<32x256xf32>
    %264 = arith.mulf %261, %263 : vector<32x256xf32>
    %265 = arith.truncf %264 : vector<32x256xf32> to vector<32x256xbf16>
    %c32_167 = arith.constant 32 : index
    %c0_168 = arith.constant 0 : index
    %266 = vector.load %arg16[%c32_167, %c0_168] : memref<288x256xbf16, #tpu.memory_space<vmem>>, vector<32x256xbf16>
    tpu.vector_store %arg16[%c32_167, %c0_168], %265 {strides = array<i32>} : memref<288x256xbf16, #tpu.memory_space<vmem>>, vector<32x256xbf16>,
    %c15_i32_169 = arith.constant 15 : i32
    %267 = tpu.dynamic_rotate %254 by %c15_i32_169 dim 1 : vector<32x256xf32>, i32 -> vector<32x256xf32>
    %268 = vector.extract_strided_slice %0 {offsets = [2, 0], sizes = [1, 256], strides = [1, 1]} : vector<9x256xf32> to vector<1x256xf32>
    %269 = vector.broadcast %268 : vector<1x256xf32> to vector<32x256xf32>
    %270 = arith.mulf %267, %269 : vector<32x256xf32>
    %271 = arith.truncf %270 : vector<32x256xf32> to vector<32x256xbf16>
    %c64_170 = arith.constant 64 : index
    %c0_171 = arith.constant 0 : index
    %272 = vector.load %arg16[%c64_170, %c0_171] : memref<288x256xbf16, #tpu.memory_space<vmem>>, vector<32x256xbf16>
    tpu.vector_store %arg16[%c64_170, %c0_171], %271 {strides = array<i32>} : memref<288x256xbf16, #tpu.memory_space<vmem>>, vector<32x256xbf16>,
    %c1_i32_172 = arith.constant 1 : i32
    %273 = tpu.dynamic_rotate %254 by %c1_i32_172 dim 1 : vector<32x256xf32>, i32 -> vector<32x256xf32>
    %274 = vector.extract_strided_slice %0 {offsets = [3, 0], sizes = [1, 256], strides = [1, 1]} : vector<9x256xf32> to vector<1x256xf32>
    %275 = vector.broadcast %274 : vector<1x256xf32> to vector<32x256xf32>
    %276 = arith.mulf %273, %275 : vector<32x256xf32>
    %277 = arith.truncf %276 : vector<32x256xf32> to vector<32x256xbf16>
    %c96_173 = arith.constant 96 : index
    %c0_174 = arith.constant 0 : index
    %278 = vector.load %arg16[%c96_173, %c0_174] : memref<288x256xbf16, #tpu.memory_space<vmem>>, vector<32x256xbf16>
    tpu.vector_store %arg16[%c96_173, %c0_174], %277 {strides = array<i32>} : memref<288x256xbf16, #tpu.memory_space<vmem>>, vector<32x256xbf16>,
    %279 = arith.truncf %254 : vector<32x256xf32> to vector<32x256xbf16>
    %c128_175 = arith.constant 128 : index
    %c0_176 = arith.constant 0 : index
    %280 = vector.load %arg16[%c128_175, %c0_176] : memref<288x256xbf16, #tpu.memory_space<vmem>>, vector<32x256xbf16>
    tpu.vector_store %arg16[%c128_175, %c0_176], %279 {strides = array<i32>} : memref<288x256xbf16, #tpu.memory_space<vmem>>, vector<32x256xbf16>,
    %c255_i32_177 = arith.constant 255 : i32
    %281 = tpu.dynamic_rotate %254 by %c255_i32_177 dim 1 : vector<32x256xf32>, i32 -> vector<32x256xf32>
    %282 = vector.extract_strided_slice %0 {offsets = [5, 0], sizes = [1, 256], strides = [1, 1]} : vector<9x256xf32> to vector<1x256xf32>
    %283 = vector.broadcast %282 : vector<1x256xf32> to vector<32x256xf32>
    %284 = arith.mulf %281, %283 : vector<32x256xf32>
    %285 = arith.truncf %284 : vector<32x256xf32> to vector<32x256xbf16>
    %c160_178 = arith.constant 160 : index
    %c0_179 = arith.constant 0 : index
    %286 = vector.load %arg16[%c160_178, %c0_179] : memref<288x256xbf16, #tpu.memory_space<vmem>>, vector<32x256xbf16>
    tpu.vector_store %arg16[%c160_178, %c0_179], %285 {strides = array<i32>} : memref<288x256xbf16, #tpu.memory_space<vmem>>, vector<32x256xbf16>,
    %c241_i32_180 = arith.constant 241 : i32
    %287 = tpu.dynamic_rotate %254 by %c241_i32_180 dim 1 : vector<32x256xf32>, i32 -> vector<32x256xf32>
    %288 = vector.extract_strided_slice %0 {offsets = [6, 0], sizes = [1, 256], strides = [1, 1]} : vector<9x256xf32> to vector<1x256xf32>
    %289 = vector.broadcast %288 : vector<1x256xf32> to vector<32x256xf32>
    %290 = arith.mulf %287, %289 : vector<32x256xf32>
    %291 = arith.truncf %290 : vector<32x256xf32> to vector<32x256xbf16>
    %c192_181 = arith.constant 192 : index
    %c0_182 = arith.constant 0 : index
    %292 = vector.load %arg16[%c192_181, %c0_182] : memref<288x256xbf16, #tpu.memory_space<vmem>>, vector<32x256xbf16>
    tpu.vector_store %arg16[%c192_181, %c0_182], %291 {strides = array<i32>} : memref<288x256xbf16, #tpu.memory_space<vmem>>, vector<32x256xbf16>,
    %c240_i32_183 = arith.constant 240 : i32
    %293 = tpu.dynamic_rotate %254 by %c240_i32_183 dim 1 : vector<32x256xf32>, i32 -> vector<32x256xf32>
    %294 = vector.extract_strided_slice %0 {offsets = [7, 0], sizes = [1, 256], strides = [1, 1]} : vector<9x256xf32> to vector<1x256xf32>
    %295 = vector.broadcast %294 : vector<1x256xf32> to vector<32x256xf32>
    %296 = arith.mulf %293, %295 : vector<32x256xf32>
    %297 = arith.truncf %296 : vector<32x256xf32> to vector<32x256xbf16>
    %c224_184 = arith.constant 224 : index
    %c0_185 = arith.constant 0 : index
    %298 = vector.load %arg16[%c224_184, %c0_185] : memref<288x256xbf16, #tpu.memory_space<vmem>>, vector<32x256xbf16>
    tpu.vector_store %arg16[%c224_184, %c0_185], %297 {strides = array<i32>} : memref<288x256xbf16, #tpu.memory_space<vmem>>, vector<32x256xbf16>,
    %c239_i32_186 = arith.constant 239 : i32
    %299 = tpu.dynamic_rotate %254 by %c239_i32_186 dim 1 : vector<32x256xf32>, i32 -> vector<32x256xf32>
    %300 = vector.extract_strided_slice %0 {offsets = [8, 0], sizes = [1, 256], strides = [1, 1]} : vector<9x256xf32> to vector<1x256xf32>
    %301 = vector.broadcast %300 : vector<1x256xf32> to vector<32x256xf32>
    %302 = arith.mulf %299, %301 : vector<32x256xf32>
    %303 = arith.truncf %302 : vector<32x256xf32> to vector<32x256xbf16>
    %c256_187 = arith.constant 256 : index
    %c0_188 = arith.constant 0 : index
    %304 = vector.load %arg16[%c256_187, %c0_188] : memref<288x256xbf16, #tpu.memory_space<vmem>>, vector<32x256xbf16>
    tpu.vector_store %arg16[%c256_187, %c0_188], %303 {strides = array<i32>} : memref<288x256xbf16, #tpu.memory_space<vmem>>, vector<32x256xbf16>,
    %c0_189 = arith.constant 0 : index
    %c0_190 = arith.constant 0 : index
    %305 = vector.load %arg10[%c0_189, %c0_190] : memref<32x288xbf16, #tpu.memory_space<vmem>>, vector<32x288xbf16>
    %c0_191 = arith.constant 0 : index
    %c0_192 = arith.constant 0 : index
    %306 = vector.load %arg16[%c0_191, %c0_192] : memref<288x256xbf16, #tpu.memory_space<vmem>>, vector<288x256xbf16>
    %cst_193 = arith.constant dense<0.000000e+00> : vector<32x256xf32>
    %307 = tpu.matmul %305, %306, %cst_193 {dimension_numbers = #tpu.dot_dimension_numbers<[1], [0], [0], [1], [0, 0, 1, 1], [], []>} : vector<32x288xbf16>, vector<288x256xbf16>, vector<32x256xf32> -> vector<32x256xf32>
    %308 = vector.broadcast %1 : vector<32x1xf32> to vector<32x256xf32>
    %309 = arith.mulf %307, %308 : vector<32x256xf32>
    %310 = vector.broadcast %2 : vector<32x1xf32> to vector<32x256xf32>
    %311 = arith.addf %309, %310 : vector<32x256xf32>
    %cst_194 = arith.constant 0.000000e+00 : f32
    %312 = vector.broadcast %cst_194 : f32 to vector<32x256xf32>
    %313 = arith.maximumf %311, %312 : vector<32x256xf32>
    %c1_195 = arith.constant 1 : index
    %c0_196 = arith.constant 0 : index
    %c0_197 = arith.constant 0 : index
    %314 = vector.load %arg14[%c1_195, %c0_196, %c0_197] : memref<2x32x256xf32, #tpu.memory_space<vmem>>, vector<1x32x256xf32>
    %315 = vector.shape_cast %314 : vector<1x32x256xf32> to vector<32x256xf32>
    %316 = vector.shape_cast %313 : vector<32x256xf32> to vector<1x32x256xf32>
    tpu.vector_store %arg14[%c1_195, %c0_196, %c0_197], %316 {strides = array<i32>} : memref<2x32x256xf32, #tpu.memory_space<vmem>>, vector<1x32x256xf32>,
    return
  }
  func.func @transform_0(%arg0: i32) -> (i32, i32, i32) {
    %c0_i32 = arith.constant 0 : i32
    %c0_i32_0 = arith.constant 0 : i32
    %c0_i32_1 = arith.constant 0 : i32
    return %arg0, %c0_i32, %c0_i32_0 : i32, i32, i32
  }
  func.func @transform_1(%arg0: i32) -> (i32, i32, i32) {
    %c0_i32 = arith.constant 0 : i32
    %c0_i32_0 = arith.constant 0 : i32
    %c0_i32_1 = arith.constant 0 : i32
    return %arg0, %c0_i32, %c0_i32_0 : i32, i32, i32
  }
  func.func @transform_2(%arg0: i32) -> (i32, i32, i32) {
    %c0_i32 = arith.constant 0 : i32
    %c0_i32_0 = arith.constant 0 : i32
    %c0_i32_1 = arith.constant 0 : i32
    return %arg0, %c0_i32, %c0_i32_0 : i32, i32, i32
  }
  func.func @transform_3(%arg0: i32) -> (i32, i32, i32) {
    %c0_i32 = arith.constant 0 : i32
    %c0_i32_0 = arith.constant 0 : i32
    %c0_i32_1 = arith.constant 0 : i32
    return %arg0, %c0_i32, %c0_i32_0 : i32, i32, i32
  }
  func.func @transform_4(%arg0: i32) -> (i32, i32, i32) {
    %c0_i32 = arith.constant 0 : i32
    %c0_i32_0 = arith.constant 0 : i32
    %c0_i32_1 = arith.constant 0 : i32
    %c0_i32_2 = arith.constant 0 : i32
    return %c0_i32, %c0_i32_0, %c0_i32_1 : i32, i32, i32
  }
  func.func @transform_5(%arg0: i32) -> (i32, i32, i32) {
    %c0_i32 = arith.constant 0 : i32
    %c0_i32_0 = arith.constant 0 : i32
    %c0_i32_1 = arith.constant 0 : i32
    %c0_i32_2 = arith.constant 0 : i32
    return %c0_i32, %c0_i32_0, %c0_i32_1 : i32, i32, i32
  }
  func.func @transform_6(%arg0: i32) -> (i32, i32, i32) {
    %c0_i32 = arith.constant 0 : i32
    %c0_i32_0 = arith.constant 0 : i32
    %c0_i32_1 = arith.constant 0 : i32
    %c0_i32_2 = arith.constant 0 : i32
    return %c0_i32, %c0_i32_0, %c0_i32_1 : i32, i32, i32
  }
  func.func @transform_7(%arg0: i32) -> (i32, i32) {
    %c0_i32 = arith.constant 0 : i32
    %c0_i32_0 = arith.constant 0 : i32
    %c0_i32_1 = arith.constant 0 : i32
    return %c0_i32, %c0_i32_0 : i32, i32
  }
  func.func @transform_8(%arg0: i32) -> (i32, i32) {
    %c0_i32 = arith.constant 0 : i32
    %c0_i32_0 = arith.constant 0 : i32
    %c0_i32_1 = arith.constant 0 : i32
    return %c0_i32, %c0_i32_0 : i32, i32
  }
  func.func @transform_9(%arg0: i32) -> (i32, i32) {
    %c0_i32 = arith.constant 0 : i32
    %c0_i32_0 = arith.constant 0 : i32
    %c0_i32_1 = arith.constant 0 : i32
    return %c0_i32, %c0_i32_0 : i32, i32
  }
  func.func @transform_10(%arg0: i32) -> (i32, i32) {
    %c0_i32 = arith.constant 0 : i32
    %c0_i32_0 = arith.constant 0 : i32
    %c0_i32_1 = arith.constant 0 : i32
    return %c0_i32, %c0_i32_0 : i32, i32
  }
  func.func @transform_11(%arg0: i32) -> (i32, i32) {
    %c0_i32 = arith.constant 0 : i32
    %c0_i32_0 = arith.constant 0 : i32
    %c0_i32_1 = arith.constant 0 : i32
    return %c0_i32, %c0_i32_0 : i32, i32
  }
  func.func @transform_12(%arg0: i32) -> (i32, i32) {
    %c0_i32 = arith.constant 0 : i32
    %c0_i32_0 = arith.constant 0 : i32
    %c0_i32_1 = arith.constant 0 : i32
    return %c0_i32, %c0_i32_0 : i32, i32
  }
  func.func @transform_13(%arg0: i32) -> (i32, i32, i32) {
    %c0_i32 = arith.constant 0 : i32
    %c0_i32_0 = arith.constant 0 : i32
    %c0_i32_1 = arith.constant 0 : i32
    return %arg0, %c0_i32, %c0_i32_0 : i32, i32, i32
  }
}

</mosaic_0001>

<bundles_post_ra>
// kernel: tpu_custom_call.1
= control target key start
LH: loop header
LB: loop body
LE: loop exit
PB: predicated region body
PF: predicated region fallthrough
CT: control target
= control target key end

     0   :  { %s5908_s0 = inlined_call_operand.hbm [shape: f32[4,32,256], index: 0, kind: input, shape index: {}]   ;;  %s5909_s1 = inlined_call_operand.hbm [shape: f32[4,32,256], index: 1, kind: input, shape index: {}]   ;;  %s5910_s2 = inlined_call_operand.hbm [shape: f32[4,32,256], index: 2, kind: input, shape index: {}]   ;;  %s5911_s3 = inlined_call_operand.hbm [shape: f32[4,32,256], index: 3, kind: input, shape index: {}]   ;;  %s5912_s4 = inlined_call_operand.vmem [shape: f32[4,8,32], index: 4, kind: input, shape index: {}]   ;;  %s5913_s5 = inlined_call_operand.vmem [shape: f32[4,8,1], index: 5, kind: input, shape index: {}]   ;;  %s5914_s6 = inlined_call_operand.vmem [shape: f32[4,8,1], index: 6, kind: input, shape index: {}]   ;;  %s5915_s7 = inlined_call_operand.vmem [shape: f32[4,32], index: 7, kind: input, shape index: {}]   ;;  %s5916_s8 = inlined_call_operand.vmem [shape: f32[4,1], index: 8, kind: input, shape index: {}]   ;;  %s5917_s9 = inlined_call_operand.vmem [shape: bf16[32,288], index: 9, kind: input, shape index: {}]   ;;  %s5918_s10 = inlined_call_operand.vmem [shape: f32[32,1], index: 10, kind: input, shape index: {}]   ;;  %s5919_s11 = inlined_call_operand.vmem [shape: f32[32,1], index: 11, kind: input, shape index: {}]   ;;  %s5920_s12 = inlined_call_operand.vmem [shape: f32[9,256], index: 12, kind: input, shape index: {}]   ;;  %s5921_s13 = inlined_call_operand.hbm [shape: f32[4,32,256], index: 13, kind: output, shape index: {}]  }
   0x1   :  { %5965 = sst [smem:[#allocation48_spill]] %s5908_s0 }
   0x2   :  { %5966 = sst [smem:[#allocation49_spill]] %s5909_s1 }
   0x3   :  { %5967 = sst [smem:[#allocation50_spill]] %s5917_s9 }
   0x4   :  { %5968 = sst [smem:[#allocation51_spill]] %s5918_s10 }
   0x5   :  { %5969 = sst [smem:[#allocation52_spill]] %s5919_s11 }
   0x6   :  { %5970 = sst [smem:[#allocation53_spill]] %s5920_s12 }
   0x7   :  { %5971 = sst [smem:[#allocation54_spill]] %s5921_s13 }
   0x8   :  { %18 = vsyncpa [#allocation5], 0 }
   0x9   :  { %20 = vsyncpa [#allocation5 + $0x1], 0 }
   0xa   :  { %21 = vsyncpa [#allocation8], 0 }
   0xb   :  { %23 = vsyncpa [#allocation8 + $0x1], 0 }
   0xc   :  { %24 = vsyncpa [#allocation11], 0 }
   0xd   :  { %26 = vsyncpa [#allocation11 + $0x1], 0 }
   0xe   :  { %27 = vsyncpa [#allocation6], 0 }
   0xf   :  { %29 = vsyncpa [#allocation6 + $0x1], 0  ;;  %s4129_s25 = smov 0   ;;  %s4131_s26 = smov 0  }
  0x10   :  { %s4133_s27 = smov 0   ;;  %s4135_s28 = smov 0  }
  0x11 LB: > { %5972 = sst [smem:[#allocation17_spill]] %s4033_s25  ;;  %s4150_s29 = sadd.s32 4294967295, %s4045_s28   ;;  %s4045_s28 = sphi %s4135_s28, %s6061_s28   ;;  %s4041_s27 = sphi %s4133_s27, %s6063_s27   ;;  %s4037_s26 = sphi %s4131_s26, %s6065_s26   ;;  %s4033_s25 = sphi %s4129_s25, %s6064_s25  }
  0x12   : > { %5973 = sst [smem:[#allocation18_spill]] %s4041_s27  ;;  %s3208_s30 = sadd.s32 4294967294, %s4045_s28  }
  0x13   : > { %5974 = sst [smem:[#allocation19_spill]] %s4045_s28  ;;  %s4154_s14 = sadd.s32 1, %s4045_s28  }
  0x14   : > { %5975 = sst [smem:[#allocation20_spill]] %s4154_s14  ;;  %s42_s15 = sadd.s32 1, %s4041_s27 }
  0x15   : > { %s39_s16 = ssub.s32 %s4045_s28, %s4154_s14  ;;  %p49_p0 = scmp.ne.s32.totalorder %s4041_s27, %s4037_s26 }
  0x16   : > { %p40_p1 = scmp.eq.s32.totalorder %s39_s16, 0  ;;  %p50_p2 = scmp.eq.s32.totalorder %s4045_s28, 0 }
  0x17   : > { %p55_p3 = scmp.ne.s32.totalorder %s4037_s26, %s4033_s25  ;;  %p56_p4 = scmp.eq.s32.totalorder %s4150_s29, 0 }
  0x18   : > { %s4166_s17 = scalar_select %p40_p1, %s4041_s27, %s42_s15  }
  0x19   : > { %p51_p5 = por %p50_p2, %p49_p0  ;;  %p4168_p6 = por %p56_p4, %p55_p3 }
  0x1a   : > { %5976 = sst [smem:[#allocation21_spill]] %s4166_s17  ;;  %p346_p7 = scmp.eq.s32.totalorder %s4150_s29, 1 }
  0x1b   : > { %p352_p8 = scmp.eq.s32.totalorder %s3208_s30, 1  ;;  %p3210_p9 = scmp.ge.s32.totalorder %s4045_s28, 2 }
  0x1c   : > { %p3782_p10 = scmp.lt.s32.totalorder %s4045_s28, 2  ;;  %p4175_p11 = por %p346_p7, %p49_p0 }
  0x1d   : > { %p4179_p12 = por %p352_p8, %p55_p3  ;;  %s4184_s21 = sand.u32 1, %s4041_s27  }
  0x1e   : > { %s5978_s19 = scalar_select %p4175_p11, 1, 0 }
  0x1f   : > { %s5980_s20 = scalar_select %p4179_p12, 1, 0 }
  0x20   : > { %5979 = sst [smem:[#allocation22_spill]] %s5978_s19  ;;  %s4187_s22 = sshll.u32 %s4045_s28, 7 }
  0x21   : > { %5981 = sst [smem:[#allocation23_spill]] %s5980_s20  ;;  %s4190_s23 = sshll.u32 %s4184_s21, 7 }
  0x22   : > { %p4192_p13 = pnand %p3782_p10, %p51_p5  ;;  %s422_s30 = sand.u32 1, %s4045_s28  }
  0x23   : > { %s5983_s1 = sld [smem:[#allocation49_spill]]  ;;  %s426_s27 = scalar_lea.vmem [#allocation7], %s4190_s23 }
  0x24   : > { %s435_s14 = sshll.u32 %s426_s27, 4  ;;  %p3227_p0 = scmp.ge.s32.totalorder %s4045_s28, 1  ;;  %s436_s14 = int_to_ptr.vmem [resolvable:$true] %s435_s14 }
  0x25   : > { %s4203_s25 = scalar_lea.sflag [#allocation8], %s422_s30  ;;  %p3855_p2 = pneg %p4192_p13 }
  0x29   : > { %s432_s17 = scalar_lea.hbm %s5983_s1, %s4187_s22  ;;  %s3858_s27 = scalar_lea.hbm %s5983_s1, 256 }
  0x2a   : > { %s433_s20 = sshll.u32 %s432_s17, 4  ;;  %s434_s20 = int_to_ptr.hbm [resolvable:$true] %s433_s20 }
  0x2b   : > { %s3851_s19 = sshra.s32 %s434_s20, 4  ;;  %s3852_s19 = int_to_ptr.hbm [resolvable:$true] %s3851_s19 }
  0x2c   : > { %s3853_s13 = scalar_lea.hbm %s3852_s19, 128  ;;  %p3859_p5 = scmp.lt.s32.totalorder %s3852_s19, %s5983_s1 }
  0x2d   : > { %p3854_p1 = scmp.ne.s32.totalorder %s3852_s19, %s3853_s13  ;;  %p3860_p7 = scmp.lt.s32.totalorder %s3858_s27, %s3853_s13 }
  0x2f   : > { %p3856_p3 = pnand %p3855_p2, %p3854_p1  ;;  %p3861_p8 = por %p3860_p7, %p3859_p5 }
  0x31   : > { %p3857_p4 = pneg %p3856_p3 }
  0x33   : > { %p3862_p10 = pnand %p3861_p8, %p3857_p4 }
  0x35   : > { %3865 = shalt.err (!%p3862_p10)
}
  0x36   : > { %s5934_s30 = smov 256   ;;  %s4048_s10 = smov 16  }
  0x37   : > { %3771 = dma.hbm_to_vmem [thread:$0]  (!%p4192_p13), %s434_s20, 2048, %s436_s14, %s4203_s25, %s5934_s30, %s5934_s30, %s4048_s10  }
  0x38   : > { %p489_p1 = scmp.lt.s32.totalorder %s4045_s28, 3  ;;  %s5984_s0 = sld [smem:[#allocation48_spill]] }
  0x39   : > { %s403_s27 = scalar_lea.vmem [#allocation4], %s4190_s23  ;;  %s400_s1 = scalar_lea.sflag [#allocation5], %s4184_s21 }
  0x3a   : > { %p4229_p3 = pnand %p3227_p0, %p489_p1  ;;  %s412_s17 = sshll.u32 %s403_s27, 4  ;;  %s413_s17 = int_to_ptr.vmem [resolvable:$true] %s412_s17 }
  0x3e   : > { %s409_s19 = scalar_lea.hbm %s5984_s0, %s4187_s22  ;;  %s3888_s11 = scalar_lea.hbm %s5984_s0, 256 }
  0x3f   : > { %s410_s16 = sshll.u32 %s409_s19, 4  ;;  %s411_s16 = int_to_ptr.hbm [resolvable:$true] %s410_s16 }
  0x40   : > { %s3881_s9 = sshra.s32 %s411_s16, 4  ;;  %s3882_s9 = int_to_ptr.hbm [resolvable:$true] %s3881_s9 }
  0x41   : > { %s3883_s12 = scalar_lea.hbm %s3882_s9, 128  ;;  %p3889_p0 = scmp.lt.s32.totalorder %s3882_s9, %s5984_s0 }
  0x42   : > { %p3884_p4 = scmp.ne.s32.totalorder %s3882_s9, %s3883_s12  ;;  %p3890_p8 = scmp.lt.s32.totalorder %s3888_s11, %s3883_s12 }
  0x44   : > { %p3886_p5 = pnand %p3884_p4, %p3855_p2  ;;  %p3891_p10 = por %p3890_p8, %p3889_p0 }
  0x46   : > { %p3887_p7 = pneg %p3886_p5 }
  0x48   : > { %p3892_p1 = pnand %p3891_p10, %p3887_p7 }
  0x4a   : > { %3895 = shalt.err (!%p3892_p1)
}
  0x4b   : > { %s5986_s19 = smov 256   ;;  %s455_s20 = scalar_lea.hbm %s5910_s2, %s4187_s22 }
  0x4c   : > { %3768 = dma.hbm_to_vmem [thread:$0]  (!%p4192_p13), %s411_s16, 2048, %s413_s17, %s400_s1, %s5986_s19, %s5986_s19, %s4048_s10  }
  0x4d   : > { %s449_s28 = scalar_lea.vmem [#allocation9], %s4190_s23  ;;  %s456_s9 = sshll.u32 %s455_s20, 4  ;;  %s457_s9 = int_to_ptr.hbm [resolvable:$true] %s456_s9 }
  0x4e   : > { %s458_s30 = sshll.u32 %s449_s28, 4  ;;  %s3911_s12 = sshra.s32 %s457_s9, 4  ;;  %s459_s30 = int_to_ptr.vmem [resolvable:$true] %s458_s30  ;;  %s3912_s12 = int_to_ptr.hbm [resolvable:$true] %s3911_s12 }
  0x4f   : > { %s3913_s11 = scalar_lea.hbm %s3912_s12, 128  ;;  %s3918_s1 = scalar_lea.hbm %s5910_s2, 256 }
  0x50   : > { %p3914_p4 = scmp.ne.s32.totalorder %s3912_s12, %s3913_s11  ;;  %p3919_p0 = scmp.lt.s32.totalorder %s3912_s12, %s5910_s2 }
  0x51   : > { %p3920_p8 = scmp.lt.s32.totalorder %s3918_s1, %s3913_s11 }
  0x52   : > { %p3916_p5 = pnand %p3914_p4, %p3855_p2 }
  0x53   : > { %p3921_p10 = por %p3920_p8, %p3919_p0 }
  0x54   : > { %p3917_p7 = pneg %p3916_p5 }
  0x56   : > { %p3922_p1 = pnand %p3921_p10, %p3917_p7 }
  0x58   : > { %3925 = shalt.err (!%p3922_p1)
}
  0x59   : > { %3774 = dma.hbm_to_vmem [thread:$0]  (!%p4192_p13), %s457_s9, 2048, %s459_s30, %s4203_s25, %s5986_s19, %s5986_s19, %s4048_s10  }
  0x5a   : > { %s478_s27 = scalar_lea.hbm %s5911_s3, %s4187_s22  ;;  %s472_s20 = scalar_lea.vmem [#allocation10], %s4190_s23 }
  0x5b   : > { %s479_s14 = sshll.u32 %s478_s27, 4  ;;  %s481_s12 = sshll.u32 %s472_s20, 4  ;;  %s480_s14 = int_to_ptr.hbm [resolvable:$true] %s479_s14  ;;  %s482_s12 = int_to_ptr.vmem [resolvable:$true] %s481_s12 }
  0x5c   : > { %s469_s11 = scalar_lea.sflag [#allocation11], %s4184_s21  ;;  %s3941_s13 = sshra.s32 %s480_s14, 4  ;;  %s3942_s13 = int_to_ptr.hbm [resolvable:$true] %s3941_s13 }
  0x5d   : > { %s3943_s1 = scalar_lea.hbm %s3942_s13, 128  ;;  %s3948_s30 = scalar_lea.hbm %s5911_s3, 256 }
  0x5e   : > { %p3944_p4 = scmp.ne.s32.totalorder %s3942_s13, %s3943_s1  ;;  %p3949_p0 = scmp.lt.s32.totalorder %s3942_s13, %s5911_s3 }
  0x5f   : > { %p3950_p8 = scmp.lt.s32.totalorder %s3948_s30, %s3943_s1 }
  0x60   : > { %p3946_p5 = pnand %p3944_p4, %p3855_p2 }
  0x61   : > { %p3951_p10 = por %p3950_p8, %p3949_p0 }
  0x62   : > { %p3947_p7 = pneg %p3946_p5 }
  0x64   : > { %p3952_p1 = pnand %p3951_p10, %p3947_p7 }
  0x66   : > { %3955 = shalt.err (!%p3952_p1)
}
  0x67   : > { %3777 = dma.hbm_to_vmem [thread:$0]  (!%p4192_p13), %s480_s14, 2048, %s482_s12, %s469_s11, %s5986_s19, %s5986_s19, %s4048_s10  }
  0x68   : > { %493 = sbr.rel (%p4229_p3) target bundleno = 1629 (0x65d), region = 72 }
  0x6d   : > { %s4292_s21 = sand.u32 1, %s4037_s26  }
  0x6e   : > { %s4295_s23 = sshll.u32 %s4292_s21, 7  ;;  %s496_s17 = scalar_lea.sflag [#allocation5], %s4292_s21 }
  0x6f   : > { %s4299_s0 = scalar_lea.vmem [#allocation4], %s4295_s23 }
  0x70   : > { %4016 = dma.done.wait (%p4168_p6), %s496_s17, 2048  }
  0x71   : > { %4018 = vsyncadd (%p4168_p6), %s496_s17, 4294965248  ;;  %s505_s10 = sand.u32 1, %s4150_s29   ;;  %s4307_s15 = scalar_lea.vmem [#allocation7], %s4295_s23 }
  0x72   : > { %s506_s24 = scalar_lea.sflag [#allocation8], %s505_s10 }
  0x73   : > { %4020 = dma.done.wait (%p4168_p6), %s506_s24, 4096  }
  0x74   : > { %4022 = vsyncadd (%p4168_p6), %s506_s24, 4294963200  ;;  %s4314_s19 = scalar_lea.vmem [#allocation9], %s4295_s23  ;;  %s526_s28 = scalar_lea.sflag [#allocation11], %s4292_s21 }
  0x75   : > { %s4318_s27 = scalar_lea.vmem [#allocation10], %s4295_s23 }
  0x76   : > { %4024 = dma.done.wait (%p4168_p6), %s526_s28, 2048  }
  0x77   : > { %4026 = vsyncadd (%p4168_p6), %s526_s28, 4294965248  ;;  %v4049_v0 = vmov 0   ;;  %v4325_v1 = vld [vmem:[%s4299_s0 + $0x30] sm:$0xff]  ;;  %v4328_v2 = vld [vmem:[%s4299_s0 + $0x38] sm:$0xff]  ;;  %vm639_vm0 = vcmask 261120   ;;  %vm962_vm1 = vcmask 1043456  }
  0x78   : > { %3828 = vset.pattern.permute.xlu0 %v4049_v0  ;;  %3829 = vset.pattern.permute.xlu1 %v4049_v0  ;;  %v4331_v3 = vld [vmem:[%s4307_s15 + $0x30] sm:$0xff]  ;;  %v4336_v4 = vld [vmem:[%s4307_s15 + $0x38] sm:$0xff]  ;;  %v4339_v5 = vld [vmem:[%s4299_s0 + $0x20] sm:$0xff]  ;;  %s4050_s17 = smov 111   ;;  %s4051_s10 = smov 112  }
  0x79   : > { %3830 = vset.pattern.permute.xlu2 %v4049_v0  ;;  %655 = vmatpush.msra.mxu0 %v4325_v1  ;;  %v4342_v6 = vld [vmem:[%s4299_s0 + $0x28] sm:$0xff]  ;;  %v4347_v7 = vld [vmem:[%s4307_s15 + $0x20] sm:$0xff]  ;;  %v4353_v9 = vld [vmem:[%s4299_s0 + $0x10] sm:$0xff]  ;;  %s4052_s24 = smov 1   ;;  %s4053_s28 = smov 113  }
  0x7a   : > { %675 = vmatpush.msra.mxu1 %v4328_v2  ;;  %720 = vmatpush.msra.mxu2 %v4331_v3  ;;  %v4350_v8 = vld [vmem:[%s4307_s15 + $0x28] sm:$0xff]  ;;  %v4358_v10 = vld [vmem:[%s4299_s0 + $0x18] sm:$0xff]  ;;  %v4361_v11 = vld [vmem:[%s4307_s15 + $0x10] sm:$0xff]  ;;  %s4054_s18 = smov 15   ;;  %s4055_s14 = smov 127  }
  0x7b   : > { %740 = vmatpush.msra.mxu3 %v4336_v4  ;;  %656 = vmatpush.msra.mxu0 %v4339_v5  ;;  %v4364_v12 = vld [vmem:[%s4307_s15 + $0x18] sm:$0xff]  ;;  %v4374_v14 = vld [vmem:[%s4299_s0] sm:$0xff]  ;;  %v4379_v15 = vld [vmem:[%s4299_s0 + $0x8] sm:$0xff]  ;;  %s5995_s11 = sld [smem:[#allocation53_spill]]  ;;  %s4056_s16 = smov 16  }
  0x7c   : > { %676 = vmatpush.msra.mxu1 %v4342_v6  ;;  %721 = vmatpush.msra.mxu2 %v4347_v7  ;;  %v4371_v13 = vld [vmem:[%s5913_s5 + $0x18] sm:$0xff]  ;;  %v4382_v16 = vld [vmem:[%s4307_s15] sm:$0xff]  ;;  %v4387_v17 = vld [vmem:[%s4307_s15 + $0x8] sm:$0xff]  ;;  %s4057_s20 = smov 17   ;;  %s6008_s30 = sld [smem:[#allocation50_spill]] }
  0x7d   : > { %741 = vmatpush.msra.mxu3 %v4350_v8  ;;  %5987 = vst [vmem:[#allocation24_spill] sm:$0xff] %v4371_v13  ;;  %657 = vmatpush.msra.mxu0 %v4353_v9  ;;  %v638_v18 = vld [vmem:[%s5912_s4] sm:$0xff]  ;;  %v3235_v19 = vld [vmem:[%s5912_s4 + $0x8] sm:$0xff]  ;;  %v4402_v20 = vld [vmem:[%s5914_s6 + $0x18] sm:$0xff]  ;;  %s3754_s12 = sshll.u32 %s4150_s29, 7  ;;  %s3053_s13 = scalar_lea.sflag [#allocation6], %s4292_s21 }
  0x7e   : > { %677 = vmatpush.msra.mxu1 %v4358_v10  ;;  %722 = vmatpush.msra.mxu2 %v4361_v11  ;;  %5988 = vst [vmem:[#allocation25_spill] sm:$0xff] %v4402_v20  ;;  %v4407_v21 = vld [vmem:[%s4314_s19 + $0x30] sm:$0xff]  ;;  %v4410_v22 = vld [vmem:[%s4314_s19 + $0x38] sm:$0xff]  ;;  %v4423_v25 = vld [vmem:[%s4314_s19 + $0x20] sm:$0xff] }
  0x7f   : > { %742 = vmatpush.msra.mxu3 %v4364_v12  ;;  %886 = vperm.xlu0 %3828, %v4371_v13   ;;  %v4415_v23 = vld [vmem:[%s4318_s27 + $0x30] sm:$0xff]  ;;  %v4418_v24 = vld [vmem:[%s4318_s27 + $0x38] sm:$0xff]  ;;  %v4426_v26 = vld [vmem:[%s4314_s19 + $0x28] sm:$0xff] }
  0x80   : > { %658 = vmatpush.msra.mxu0 %v4374_v14  ;;  %678 = vmatpush.msra.mxu1 %v4379_v15  ;;  %v4431_v27 = vld [vmem:[%s4318_s27 + $0x20] sm:$0xff]  ;;  %v4434_v28 = vld [vmem:[%s4318_s27 + $0x28] sm:$0xff]  ;;  %v4439_v29 = vld [vmem:[%s4314_s19 + $0x10] sm:$0xff] }
  0x81   : > { %723 = vmatpush.msra.mxu2 %v4382_v16  ;;  %743 = vmatpush.msra.mxu3 %v4387_v17  ;;  %v4442_v30 = vld [vmem:[%s4314_s19 + $0x18] sm:$0xff]  ;;  %v4447_v31 = vld [vmem:[%s4318_s27 + $0x10] sm:$0xff]  ;;  %v4460_v34 = vld [vmem:[%s4314_s19] sm:$0xff] }
  0x82   : > { %3233 = vmatmul.msk.f32.vlgmr.msra.gmra.mxu0 %vm639_vm0, %v638_v18  ;;  %3234 = vmatmul.msk.f32.vlgmr.msra.gmra.mxu1 %vm639_vm0, %v638_v18  ;;  %v4450_v32 = vld [vmem:[%s4318_s27 + $0x18] sm:$0xff]  ;;  %v4455_v33 = vld [vmem:[%s5913_s5 + $0x10] sm:$0xff]  ;;  %v4465_v35 = vld [vmem:[%s4314_s19 + $0x8] sm:$0xff] }
  0x83   : > { %3236 = vmatmul.msk.f32.vlgmr.msra.gmra.mxu2 %vm639_vm0, %v3235_v19  ;;  %3237 = vmatmul.msk.f32.vlgmr.msra.gmra.mxu3 %vm639_vm0, %v3235_v19  ;;  %5989 = vst [vmem:[#allocation26_spill] sm:$0xff] %v4455_v33  ;;  %v4468_v36 = vld [vmem:[%s4318_s27] sm:$0xff]  ;;  %v4473_v37 = vld [vmem:[%s4318_s27 + $0x8] sm:$0xff]  ;;  %v3240_v38 = vld [vmem:[%s5912_s4 + $0x10] sm:$0xff] }
  0x84   : > { %895 = vperm.xlu1 %3829, %v4402_v20   ;;  %787 = vmatpush.msrb.mxu0 %v4407_v21  ;;  %v3245_v39 = vld [vmem:[%s5912_s4 + $0x18] sm:$0xff]  ;;  %v4488_v40 = vld [vmem:[%s5913_s5 + $0x8] sm:$0xff]  ;;  %v4495_v41 = vld [vmem:[%s5914_s6 + $0x10] sm:$0xff] }
  0x85   : > { %807 = vmatpush.msrb.mxu1 %v4410_v22  ;;  %854 = vmatpush.msrb.mxu2 %v4415_v23  ;;  %5990 = vst [vmem:[#allocation27_spill] sm:$0xff] %v4488_v40  ;;  %v4504_v42 = vld [vmem:[%s5914_s6 + $0x8] sm:$0xff]  ;;  %v4511_v43 = vld [vmem:[%s5914_s6] sm:$0xff] }
  0x86   : > { %874 = vmatpush.msrb.mxu3 %v4418_v24  ;;  %788 = vmatpush.msrb.mxu0 %v4423_v25  ;;  %5991 = vst [vmem:[#allocation28_spill] sm:$0xff] %v4495_v41  ;;  %v4516_v44 = vld [vmem:[%s5913_s5] sm:$0xff] }
  0x87   : > { %808 = vmatpush.msrb.mxu1 %v4426_v26  ;;  %855 = vmatpush.msrb.mxu2 %v4431_v27  ;;  %5992 = vst [vmem:[#allocation29_spill] sm:$0xff] %v4504_v42  ;;  %v913_v45 = vld [vmem:[%s5916_s8] sm:$0xf] }
  0x88   : > { %875 = vmatpush.msrb.mxu3 %v4434_v28  ;;  %789 = vmatpush.msrb.mxu0 %v4439_v29  ;;  %5993 = vst [vmem:[#allocation30_spill] sm:$0xff] %v4511_v43 }
  0x89   : > { %809 = vmatpush.msrb.mxu1 %v4442_v30  ;;  %856 = vmatpush.msrb.mxu2 %v4447_v31  ;;  %5994 = vst [vmem:[#allocation31_spill] sm:$0xff] %v4516_v44 }
  0x8a   : > { %876 = vmatpush.msrb.mxu3 %v4450_v32  ;;  %819 = vperm.xlu0 %3828, %v4455_v33  }
  0x8b   : > { %790 = vmatpush.msrb.mxu0 %v4460_v34  ;;  %810 = vmatpush.msrb.mxu1 %v4465_v35 }
  0x8c   : > { %857 = vmatpush.msrb.mxu2 %v4468_v36  ;;  %877 = vmatpush.msrb.mxu3 %v4473_v37 }
  0x8d   : > { %3241 = vmatmul.msk.f32.vlgmr.msrb.gmra.mxu0 %vm639_vm0, %v3240_v38  ;;  %3242 = vmatmul.msk.f32.vlgmr.msrb.gmra.mxu1 %vm639_vm0, %v3240_v38 }
  0x8e   : > { %3246 = vmatmul.msk.f32.vlgmr.msrb.gmra.mxu2 %vm639_vm0, %v3245_v39  ;;  %3247 = vmatmul.msk.f32.vlgmr.msrb.gmra.mxu3 %vm639_vm0, %v3245_v39 }
  0x8f   : > { %752 = vperm.xlu1 %3829, %v4488_v40   ;;  %828 = vperm.xlu2 %3830, %v4495_v41  }
  0x92   : > { %761 = vperm.xlu0 %3828, %v4504_v42  }
  0x97   : > { %694 = vperm.xlu1 %3829, %v4511_v43   ;;  %686 = vperm.xlu2 %3830, %v4516_v44  }
  0x9f   : > { %916 = vperm.xlu2 %3830, %v913_v45  }
  0xe9   : > { %v829_v50 = vpop.permute.xlu2 %828 }
  0xf1   : > { %v887_v46 = vpop.permute.xlu0 %886  ;;  %v687_v58 = vpop.permute.xlu2 %686 }
  0xf6   : > { %v896_v47 = vpop.permute.xlu1 %895 }
  0xfc   : > { %v820_v53 = vpop.permute.xlu0 %819 }
  0xff   : > { %v660_v48 = vpop.f32.mrf.mxu0  ;;  %v680_v49 = vpop.f32.mrf.mxu1 }
 0x100   : > { %v689_v19 = vmul.f32 %v687_v58, %v660_v48  ;;  %v690_v43 = vmul.f32 %v687_v58, %v680_v49 }
 0x101   : > { %v753_v54 = vpop.permute.xlu1 %752 }
 0x104   : > { %v762_v45 = vpop.permute.xlu0 %761 }
 0x106   : > { %v725_v51 = vpop.f32.mrf.mxu2  ;;  %v745_v52 = vpop.f32.mrf.mxu3 }
 0x107   : > { %v755_v61 = vmul.f32 %v753_v54, %v725_v51  ;;  %v756_v0 = vmul.f32 %v753_v54, %v745_v52 }
 0x109   : > { %v695_v44 = vpop.permute.xlu1 %694  ;;  %v764_v20 = vadd.f32 %v762_v45, %v755_v61  ;;  %v765_v33 = vadd.f32 %v762_v45, %v756_v0 }
 0x10a   : > { %v792_v55 = vpop.f32.mrf.mxu0  ;;  %v812_v56 = vpop.f32.mrf.mxu1  ;;  %v697_v13 = vadd.f32 %v695_v44, %v689_v19  ;;  %v698_v51 = vadd.f32 %v695_v44, %v690_v43 }
 0x10b   : > { %v822_v57 = vmul.f32 %v820_v53, %v792_v55  ;;  %v823_v59 = vmul.f32 %v820_v53, %v812_v56  ;;  %v766_v52 = vmax.f32 %v764_v20, 0.0 }
 0x10c   : > { %v699_v48 = vmax.f32 %v697_v13, 0.0  ;;  %v700_v49 = vmax.f32 %v698_v51, 0.0 }
 0x10d   : > { %v831_v38 = vadd.f32 %v829_v50, %v822_v57  ;;  %v832_v42 = vadd.f32 %v829_v50, %v823_v59 }
 0x10f   : > { %v833_v53 = vmax.f32 %v831_v38, 0.0  ;;  %v834_v56 = vmax.f32 %v832_v42, 0.0 }
 0x111   : > { %v859_v60 = vpop.f32.mrf.mxu2  ;;  %v879_v63 = vpop.f32.mrf.mxu3 }
 0x112   : > { %v889_v62 = vmul.f32 %v887_v46, %v859_v60  ;;  %v890_v18 = vmul.f32 %v887_v46, %v879_v63  ;;  %v767_v46 = vmax.f32 %v765_v33, 0.0 }
 0x114   : > { %v898_v39 = vadd.f32 %v896_v47, %v889_v62  ;;  %v899_v41 = vadd.f32 %v896_v47, %v890_v18  ;;  %v904_v47 = vld [vmem:[%s5915_s7] sm:$0xf] }
 0x116   : > { %v900_v40 = vmax.f32 %v898_v39, 0.0  ;;  %v901_v55 = vmax.f32 %v899_v41, 0.0 }
 0x118   : > { %934 = vmatpush.msra.mxu0 %v900_v40  ;;  %954 = vmatpush.msra.mxu1 %v901_v55  ;;  %v917_v40 = vpop.permute.xlu2 %916 }
 0x11a   : > { %935 = vmatpush.msra.mxu0 %v833_v53  ;;  %955 = vmatpush.msra.mxu1 %v834_v56 }
 0x11c   : > { %936 = vmatpush.msra.mxu0 %v766_v52  ;;  %956 = vmatpush.msra.mxu1 %v767_v46 }
 0x11e   : > { %937 = vmatpush.msra.mxu0 %v699_v48  ;;  %957 = vmatpush.msra.mxu1 %v700_v49 }
 0x11f   : > { %3250 = vmatmul.msk.f32.vlgmr.msra.gmra.mxu0 %vm639_vm0, %v904_v47  ;;  %3251 = vmatmul.msk.f32.vlgmr.msra.gmra.mxu1 %vm639_vm0, %v904_v47 }
 0x19c   : > { %v939_v41 = vpop.f32.mrf.mxu0  ;;  %v959_v33 = vpop.f32.mrf.mxu1 }
 0x19d   : > { %v940_v20 = vadd.f32 %v939_v41, %v917_v40  ;;  %v960_v42 = vadd.f32 %v959_v33, %v917_v40 }
 0x19f   : > { %v963_v13 = vsel %vm962_vm1, %v940_v20, -inf  ;;  %v970_v44 = vsel %vm962_vm1, %v960_v42, -inf }
 0x1a0   : > { %v964_v43 = vrot.slane %v963_v13, 4  ;;  %v971_v50 = vrot.slane %v970_v44, 4 }
 0x1a2   : > { %v965_v54 = vmax.f32 %v963_v13, %v964_v43  ;;  %v972_v57 = vmax.f32 %v970_v44, %v971_v50 }
 0x1a4   : > { %v966_v58 = vrot.slane %v965_v54, 2  ;;  %v973_v59 = vrot.slane %v972_v57, 2 }
 0x1a6   : > { %v967_v60 = vmax.f32 %v965_v54, %v966_v58  ;;  %v974_v61 = vmax.f32 %v972_v57, %v973_v59 }
 0x1a8   : > { %v968_v62 = vrot.slane %v967_v60, 1  ;;  %v975_v63 = vrot.slane %v974_v61, 1 }
 0x1aa   : > { %v969_v0 = vmax.f32 %v967_v60, %v968_v62  ;;  %v976_v18 = vmax.f32 %v974_v61, %v975_v63 }
 0x1ac   : > { %v977_v19 = vsub.f32 %v940_v20, %v969_v0  ;;  %v978_v38 = vsub.f32 %v960_v42, %v976_v18 }
 0x1ae   : > { %v979_v39 = vmul.f32 1.442695, %v977_v19  ;;  %v981_v45 = vmul.f32 1.442695, %v978_v38 }
 0x1b0   : > { %3833 = vpow2.f32 %v979_v39 }
 0x1b1   : > { %3835 = vpow2.f32 %v981_v45 }
 0x1b6   : > { %v3834_v55 = vpop.eup %3833 }
 0x1b7   : > { %v3836_v53 = vpop.eup %3835  ;;  %v983_v51 = vsel %vm962_vm1, %v3834_v55, 0.0 }
 0x1b8   : > { %v984_v56 = vrot.slane %v983_v51, 4  ;;  %v990_v52 = vsel %vm962_vm1, %v3836_v53, 0.0 }
 0x1b9   : > { %v991_v46 = vrot.slane %v990_v52, 4 }
 0x1ba   : > { %v985_v48 = vadd.f32 %v984_v56, %v983_v51 }
 0x1bb   : > { %v992_v47 = vadd.f32 %v991_v46, %v990_v52 }
 0x1bc   : > { %v986_v49 = vrot.slane %v985_v48, 2 }
 0x1bd   : > { %v993_v40 = vrot.slane %v992_v47, 2 }
 0x1be   : > { %v987_v41 = vadd.f32 %v986_v49, %v985_v48 }
 0x1bf   : > { %v994_v33 = vadd.f32 %v993_v40, %v992_v47 }
 0x1c0   : > { %v988_v20 = vrot.slane %v987_v41, 1 }
 0x1c1   : > { %v995_v42 = vrot.slane %v994_v33, 1 }
 0x1c2   : > { %v989_v13 = vadd.f32 %v988_v20, %v987_v41 }
 0x1c3   : > { %v996_v43 = vadd.f32 %v995_v42, %v994_v33 }
 0x1c4   : > { %3837 = vrcp.f32 %v989_v13 }
 0x1c5   : > { %3839 = vrcp.f32 %v996_v43 }
 0x1ca   : > { %v3838_v44 = vpop.eup %3837 }
 0x1cb   : > { %v3840_v50 = vpop.eup %3839  ;;  %v999_v54 = vmul.f32 %v3838_v44, %v3834_v55 }
 0x1cc   : > { %v1000_v57 = vmul.f32 %v3840_v50, %v3836_v53 }
 0x1cd   : > { %v1001_v58 = vperm.slane %v999_v54, 0  ;;  %v1011_v59 = vperm.slane %v999_v54, 1  ;;  %v1029_v60 = vperm.slane %v999_v54, 2  ;;  %v1047_v61 = vperm.slane %v999_v54, 3 }
 0x1ce   : > { %v1002_v62 = vperm.slane %v1000_v57, 0  ;;  %v1012_v63 = vperm.slane %v1000_v57, 1  ;;  %v1030_v0 = vperm.slane %v1000_v57, 2  ;;  %v1048_v46 = vperm.slane %v1000_v57, 3 }
 0x1cf   : > { %v1003_v18 = vmul.f32 %v1001_v58, %v4374_v14  ;;  %v1005_v19 = vmul.f32 %v1001_v58, %v4353_v9  ;;  %v1007_v38 = vmul.f32 %v1001_v58, %v4339_v5  ;;  %v1009_v39 = vmul.f32 %v1001_v58, %v4325_v1 }
 0x1d0   : > { %v1013_v45 = vmul.f32 %v1011_v59, %v4382_v16  ;;  %v1015_v55 = vmul.f32 %v1011_v59, %v4361_v11  ;;  %v1017_v53 = vmul.f32 %v1011_v59, %v4347_v7  ;;  %v1019_v51 = vmul.f32 %v1011_v59, %v4331_v3 }
 0x1d1   : > { %v1031_v56 = vmul.f32 %v1029_v60, %v4460_v34  ;;  %v1035_v52 = vmul.f32 %v1029_v60, %v4423_v25  ;;  %v1037_v14 = vmul.f32 %v1029_v60, %v4407_v21  ;;  %v1033_v1 = vmul.f32 %v1029_v60, %v4439_v29 }
 0x1d2   : > { %v1021_v9 = vadd.f32 %v1013_v45, %v1003_v18  ;;  %v1023_v48 = vadd.f32 %v1015_v55, %v1005_v19  ;;  %v1025_v5 = vadd.f32 %v1017_v53, %v1007_v38  ;;  %v1027_v47 = vadd.f32 %v1019_v51, %v1009_v39  ;;  %v4682_v38 = vld [vmem:[%s5995_s11 + $0x10] ss:$0 sm:$0xff]  ;;  %v3832_v39 = vld [vmem:[%s5995_s11 + $0x18] ss:$0 sm:$0xff] }
 0x1d3   : > { %v1049_v16 = vmul.f32 %v1047_v61, %v4468_v36  ;;  %v1051_v11 = vmul.f32 %v1047_v61, %v4447_v31  ;;  %v1053_v7 = vmul.f32 %v1047_v61, %v4431_v27  ;;  %v1055_v25 = vmul.f32 %v1047_v61, %v4415_v23 }
 0x1d4   : > { %v1039_v3 = vadd.f32 %v1031_v56, %v1021_v9  ;;  %v1043_v49 = vadd.f32 %v1035_v52, %v1025_v5  ;;  %v1045_v34 = vadd.f32 %v1037_v14, %v1027_v47  ;;  %v1004_v21 = vmul.f32 %v1002_v62, %v4379_v15 }
 0x1d5   : > { %v1006_v40 = vmul.f32 %v1002_v62, %v4358_v10  ;;  %v1008_v41 = vmul.f32 %v1002_v62, %v4342_v6  ;;  %v1010_v33 = vmul.f32 %v1002_v62, %v4328_v2  ;;  %v1041_v29 = vadd.f32 %v1033_v1, %v1023_v48 }
 0x1d6   : > { %v4552_v20 = vadd.f32 %v1049_v16, %v1039_v3  ;;  %v4554_v36 = vadd.f32 %v1053_v7, %v1043_v49  ;;  %v4556_v31 = vadd.f32 %v1055_v25, %v1045_v34  ;;  %v1014_v27 = vmul.f32 %v1012_v63, %v4387_v17  ;;  %v4711_v7 = vld [vmem:[%s5995_s11 + $0x8] sm:$0xff] }
 0x1d7   : > { %v1016_v42 = vmul.f32 %v1012_v63, %v4364_v12  ;;  %v1018_v23 = vmul.f32 %v1012_v63, %v4350_v8  ;;  %v1020_v15 = vmul.f32 %v1012_v63, %v4336_v4  ;;  %v1032_v10 = vmul.f32 %v1030_v0, %v4465_v35 }
 0x1d8   : > { %v1034_v6 = vmul.f32 %v1030_v0, %v4442_v30  ;;  %v1036_v2 = vmul.f32 %v1030_v0, %v4426_v26  ;;  %v1038_v13 = vmul.f32 %v1030_v0, %v4410_v22  ;;  %1382 = vrot.lane.b32.xlu1 %v4556_v31, %s4050_s17  ;;  %v1022_v43 = vadd.f32 %v1014_v27, %v1004_v21 }
 0x1d9   : > { %v1024_v17 = vadd.f32 %v1016_v42, %v1006_v40  ;;  %v1026_v44 = vadd.f32 %v1018_v23, %v1008_v41  ;;  %v1028_v12 = vadd.f32 %v1020_v15, %v1010_v33  ;;  %1380 = vrot.lane.b32.xlu0 %v4554_v36, %s4050_s17  ;;  %v1050_v4 = vmul.f32 %v1048_v46, %v4473_v37 }
 0x1da   : > { %v1052_v8 = vmul.f32 %v1048_v46, %v4450_v32  ;;  %v1054_v30 = vmul.f32 %v1048_v46, %v4434_v28  ;;  %v1056_v26 = vmul.f32 %v1048_v46, %v4418_v24  ;;  %v1040_v22 = vadd.f32 %v1032_v10, %v1022_v43 }
 0x1db   : > { %v1042_v35 = vadd.f32 %v1034_v6, %v1024_v17  ;;  %v1044_v50 = vadd.f32 %v1036_v2, %v1026_v44  ;;  %v1046_v54 = vadd.f32 %v1038_v13, %v1028_v12  ;;  %v4574_v57 = vadd.f32 %v1051_v11, %v1041_v29  ;;  %v4706_v11 = vld [vmem:[%s5995_s11] sm:$0xff] }
 0x1dc   : > { %v4576_v58 = vadd.f32 %v1050_v4, %v1040_v22  ;;  %v1081_v0 = vlaneseq  ;;  %v4719_v49 = vperm.slane %v4706_v11, 7  ;;  %v4722_v34 = vperm.slane %v4711_v7, 7 }
 0x1dd   : > { %v4578_v59 = vadd.f32 %v1052_v8, %v1042_v35  ;;  %v4580_v60 = vadd.f32 %v1054_v30, %v1044_v50  ;;  %v4582_v61 = vadd.f32 %v1056_v26, %v1046_v54 }
 0x1de   : > { %v1239_v32 = vpack.c.bf16 %v4576_v58, %v4552_v20  ;;  %v4670_v18 = vand.u32 127, %v1081_v0  ;;  %5996 = vst [vmem:[#allocation32_spill] sm:$0xff] %v4719_v49  ;;  %v4766_v0 = vperm.slane %v4706_v11, 3 }
 0x1df   : > { %1388 = vrot.lane.b32.xlu2 %v4580_v60, %s4050_s17  ;;  %v1241_v24 = vpack.c.bf16 %v4580_v60, %v4554_v36  ;;  %v1242_v28 = vpack.c.bf16 %v4582_v61, %v4556_v31  ;;  %v1240_v37 = vpack.c.bf16 %v4578_v59, %v4574_v57  ;;  %5997 = vst [vmem:[#allocation33_spill] sm:$0xff] %v4722_v34 }
 0x1e0   : > { %1337 = vrot.lane.b32.xlu1 %v4554_v36, %s4051_s10  ;;  %1243 = vst [vmem:[#allocation3 + $0x80] sm:$0xff] %v1239_v32  ;;  %vm1392_vm2 = vcmp.lt.s32.totalorder %v4670_v18, 111  ;;  %vm1349_vm3 = vcmp.lt.s32.totalorder %v4670_v18, 112  ;;  %vm1212_vm4 = vcmp.lt.s32.totalorder %v4670_v18, 1  ;;  %vm1306_vm5 = vcmp.lt.s32.totalorder %v4670_v18, 113 }
 0x1e1   : > { %1390 = vrot.lane.b32.xlu0 %v4582_v61, %s4050_s17  ;;  %1245 = vst [vmem:[#allocation3 + $0x90] sm:$0xff] %v1241_v24  ;;  %vm1169_vm6 = vcmp.lt.s32.totalorder %v4670_v18, 15  ;;  %vm1263_vm7 = vcmp.lt.s32.totalorder %v4670_v18, 127  ;;  %vm1126_vm8 = vcmp.lt.s32.totalorder %v4670_v18, 16  ;;  %vm1083_vm9 = vcmp.lt.s32.totalorder %v4670_v18, 17 }
 0x1e2   : > { %1246 = vst [vmem:[#allocation3 + $0x98] sm:$0xff] %v1242_v28 }
 0x1e3   : > { %1244 = vst [vmem:[#allocation3 + $0x88] sm:$0xff] %v1240_v37 }
 0x1e7   : > { %1339 = vrot.lane.b32.xlu2 %v4556_v31, %s4051_s10 }
 0x1e8   : > { %1347 = vrot.lane.b32.xlu1 %v4582_v61, %s4051_s10 }
 0x1e9   : > { %1345 = vrot.lane.b32.xlu0 %v4580_v60, %s4051_s10 }
 0x1ef   : > { %1376 = vrot.lane.b32.xlu2 %v4552_v20, %s4050_s17 }
 0x1f0   : > { %1384 = vrot.lane.b32.xlu1 %v4576_v58, %s4050_s17 }
 0x1f1   : > { %1378 = vrot.lane.b32.xlu0 %v4574_v57, %s4050_s17 }
 0x1f7   : > { %1386 = vrot.lane.b32.xlu2 %v4578_v59, %s4050_s17 }
 0x1f8   : > { %1202 = vrot.lane.b32.xlu1 %v4556_v31, %s4052_s24 }
 0x1f9   : > { %1200 = vrot.lane.b32.xlu0 %v4554_v36, %s4052_s24 }
 0x1ff   : > { %1208 = vrot.lane.b32.xlu2 %v4580_v60, %s4052_s24 }
 0x200   : > { %1333 = vrot.lane.b32.xlu1 %v4552_v20, %s4051_s10 }
 0x201   : > { %1210 = vrot.lane.b32.xlu0 %v4582_v61, %s4052_s24 }
 0x207   : > { %1335 = vrot.lane.b32.xlu2 %v4574_v57, %s4051_s10 }
 0x208   : > { %1343 = vrot.lane.b32.xlu1 %v4578_v59, %s4051_s10 }
 0x209   : > { %1341 = vrot.lane.b32.xlu0 %v4576_v58, %s4051_s10 }
 0x20f   : > { %1196 = vrot.lane.b32.xlu2 %v4552_v20, %s4052_s24 }
 0x210   : > { %1204 = vrot.lane.b32.xlu1 %v4576_v58, %s4052_s24 }
 0x211   : > { %1198 = vrot.lane.b32.xlu0 %v4574_v57, %s4052_s24 }
 0x217   : > { %1206 = vrot.lane.b32.xlu2 %v4578_v59, %s4052_s24 }
 0x218   : > { %1296 = vrot.lane.b32.xlu1 %v4556_v31, %s4053_s28 }
 0x219   : > { %1294 = vrot.lane.b32.xlu0 %v4554_v36, %s4053_s28 }
 0x21f   : > { %1302 = vrot.lane.b32.xlu2 %v4580_v60, %s4053_s28 }
 0x220   : > { %1157 = vrot.lane.b32.xlu1 %v4554_v36, %s4054_s18 }
 0x221   : > { %1304 = vrot.lane.b32.xlu0 %v4582_v61, %s4053_s28 }
 0x227   : > { %1159 = vrot.lane.b32.xlu2 %v4556_v31, %s4054_s18 }
 0x228   : > { %1167 = vrot.lane.b32.xlu1 %v4582_v61, %s4054_s18 }
 0x229   : > { %1165 = vrot.lane.b32.xlu0 %v4580_v60, %s4054_s18 }
 0x22f   : > { %1290 = vrot.lane.b32.xlu2 %v4552_v20, %s4053_s28 }
 0x230   : > { %1298 = vrot.lane.b32.xlu1 %v4576_v58, %s4053_s28 }
 0x231   : > { %1292 = vrot.lane.b32.xlu0 %v4574_v57, %s4053_s28 }
 0x237   : > { %1300 = vrot.lane.b32.xlu2 %v4578_v59, %s4053_s28 }
 0x238   : > { %1155 = vrot.lane.b32.xlu1 %v4574_v57, %s4054_s18 }
 0x239   : > { %v1389_v62 = vpop.permute.xlu2 %1388  ;;  %1153 = vrot.lane.b32.xlu0 %v4552_v20, %s4054_s18 }
 0x23f   : > { %1161 = vrot.lane.b32.xlu2 %v4576_v58, %s4054_s18 }
 0x240   : > { %1251 = vrot.lane.b32.xlu1 %v4554_v36, %s4055_s14 }
 0x241   : > { %v1340_v63 = vpop.permute.xlu2 %1339  ;;  %1163 = vrot.lane.b32.xlu0 %v4578_v59, %s4054_s18 }
 0x247   : > { %1253 = vrot.lane.b32.xlu2 %v4556_v31, %s4055_s14 }
 0x248   : > { %1261 = vrot.lane.b32.xlu1 %v4582_v61, %s4055_s14 }
 0x249   : > { %v1377_v19 = vpop.permute.xlu2 %1376  ;;  %1259 = vrot.lane.b32.xlu0 %v4580_v60, %s4055_s14 }
 0x24a   : > { %v1383_v45 = vpop.permute.xlu1 %1382 }
 0x24b   : > { %v1381_v55 = vpop.permute.xlu0 %1380 }
 0x24c   : > { %v1395_v53 = vsel %vm1392_vm2, %v1381_v55, %v1389_v62  ;;  %v1399_v51 = vsel %vm1392_vm2, %v1389_v62, %v1381_v55 }
 0x24d   : > { %v1407_v56 = vmul.f32 %v4682_v38, %v1395_v53  ;;  %v1408_v52 = vmul.f32 %v3832_v39, %v1399_v51 }
 0x24f   : > { %1114 = vrot.lane.b32.xlu2 %v4554_v36, %s4056_s16  ;;  %v1413_v14 = vpack.c.bf16 %v1408_v52, %v1407_v56 }
 0x250   : > { %1122 = vrot.lane.b32.xlu1 %v4580_v60, %s4056_s16 }
 0x251   : > { %1417 = vst [vmem:[#allocation3 + $0x110] sm:$0xff] %v1413_v14  ;;  %v1387_v46 = vpop.permute.xlu2 %1386  ;;  %1116 = vrot.lane.b32.xlu0 %v4556_v31, %s4056_s16 }
 0x252   : > { %v1338_v9 = vpop.permute.xlu1 %1337 }
 0x253   : > { %v1391_v48 = vpop.permute.xlu0 %1390 }
 0x254   : > { %v1396_v5 = vsel %vm1392_vm2, %v1383_v45, %v1391_v48  ;;  %v1400_v47 = vsel %vm1392_vm2, %v1391_v48, %v1383_v45 }
 0x255   : > { %v1409_v1 = vmul.f32 %v4682_v38, %v1396_v5  ;;  %v1410_v16 = vmul.f32 %v3832_v39, %v1400_v47 }
 0x257   : > { %1124 = vrot.lane.b32.xlu2 %v4582_v61, %s4056_s16  ;;  %v1414_v3 = vpack.c.bf16 %v1410_v16, %v1409_v1 }
 0x258   : > { %1249 = vrot.lane.b32.xlu1 %v4574_v57, %s4055_s14  ;;  %v3414_v13 = vld [vmem:[#allocation3 + $0x110] sm:$0xf] }
 0x259   : > { %1418 = vst [vmem:[#allocation3 + $0x118] sm:$0xff] %v1414_v3  ;;  %v1209_v25 = vpop.permute.xlu2 %1208  ;;  %1247 = vrot.lane.b32.xlu0 %v4552_v20, %s4055_s14 }
 0x25a   : > { %v1348_v21 = vpop.permute.xlu1 %1347 }
 0x25b   : > { %v1353_v40 = vsel %vm1349_vm3, %v1340_v63, %v1348_v21  ;;  %v1357_v41 = vsel %vm1349_vm3, %v1348_v21, %v1340_v63  ;;  %v1346_v33 = vpop.permute.xlu0 %1345 }
 0x25c   : > { %v1366_v29 = vmul.f32 %v4719_v49, %v1353_v40  ;;  %v1367_v27 = vmul.f32 %v4722_v34, %v1357_v41  ;;  %v1352_v42 = vsel %vm1349_vm3, %v1338_v9, %v1346_v33  ;;  %v1356_v23 = vsel %vm1349_vm3, %v1346_v33, %v1338_v9 }
 0x25d   : > { %v1364_v15 = vmul.f32 %v4719_v49, %v1352_v42  ;;  %v1365_v10 = vmul.f32 %v4722_v34, %v1356_v23 }
 0x25e   : > { %v1371_v6 = vpack.c.bf16 %v1367_v27, %v1366_v29 }
 0x25f   : > { %1255 = vrot.lane.b32.xlu2 %v4576_v58, %s4055_s14  ;;  %v1370_v2 = vpack.c.bf16 %v1365_v10, %v1364_v15 }
 0x260   : > { %1375 = vst [vmem:[#allocation3 + $0xf8] sm:$0xff] %v1371_v6  ;;  %1110 = vrot.lane.b32.xlu1 %v4552_v20, %s4056_s16  ;;  %v3710_v43 = vld [vmem:[#allocation3 + $0x114] sm:$0xf0] }
 0x261   : > { %1374 = vst [vmem:[#allocation3 + $0xf0] sm:$0xff] %v1370_v2  ;;  %v4742_v17 = vpop.permute.xlu2 %1335  ;;  %1257 = vrot.lane.b32.xlu0 %v4578_v59, %s4055_s14  ;;  %v3415_v44 = vor.u32 %v3710_v43, %v3414_v13  ;;  %v5998_v43 = vld [vmem:[#allocation24_spill] sm:$0xff] }
 0x262   : > { %v1385_v12 = vpop.permute.xlu1 %1384 }
 0x263   : > { %v1393_v4 = vsel %vm1392_vm2, %v1377_v19, %v1385_v12  ;;  %v1397_v8 = vsel %vm1392_vm2, %v1385_v12, %v1377_v19  ;;  %v1379_v30 = vpop.permute.xlu0 %1378  ;;  %1723 = vmatpush.bf16.msrb.mxu0 %v3415_v44  ;;  %v4769_v19 = vperm.slane %v4711_v7, 3 }
 0x264   : > { %v1403_v26 = vmul.f32 %v4682_v38, %v1393_v4  ;;  %v1404_v22 = vmul.f32 %v3832_v39, %v1397_v8  ;;  %v1394_v35 = vsel %vm1392_vm2, %v1379_v30, %v1387_v46  ;;  %v1398_v50 = vsel %vm1392_vm2, %v1387_v46, %v1379_v30 }
 0x265   : > { %v1405_v54 = vmul.f32 %v4682_v38, %v1394_v35  ;;  %v1406_v24 = vmul.f32 %v3832_v39, %v1398_v50 }
 0x266   : > { %v1411_v28 = vpack.c.bf16 %v1404_v22, %v1403_v26 }
 0x267   : > { %1112 = vrot.lane.b32.xlu2 %v4574_v57, %s4056_s16  ;;  %v1412_v32 = vpack.c.bf16 %v1406_v24, %v1405_v54  ;;  %v3706_v37 = vld [vmem:[#allocation3 + $0xf4] sm:$0xf0]  ;;  %v3400_v9 = vld [vmem:[#allocation3 + $0xf8] sm:$0xf0] }
 0x268   : > { %1415 = vst [vmem:[#allocation3 + $0x100] sm:$0xff] %v1411_v28  ;;  %1120 = vrot.lane.b32.xlu1 %v4578_v59, %s4056_s16  ;;  %v3398_v62 = vld [vmem:[#allocation3 + $0xf0] sm:$0xf]  ;;  %v3705_v46 = vld [vmem:[#allocation3 + $0xf4] sm:$0xf] }
 0x269   : > { %1416 = vst [vmem:[#allocation3 + $0x108] sm:$0xff] %v1412_v32  ;;  %v4760_v63 = vpop.permute.xlu2 %1196  ;;  %1118 = vrot.lane.b32.xlu0 %v4576_v58, %s4056_s16  ;;  %v3399_v38 = vor.u32 %v3706_v37, %v3398_v62  ;;  %v3403_v16 = vor.u32 %v3705_v46, %v3400_v9  ;;  %v5999_v37 = vld [vmem:[#allocation26_spill] sm:$0xff] }
 0x26a   : > { %v1203_v39 = vpop.permute.xlu1 %1202 }
 0x26b   : > { %v1201_v45 = vpop.permute.xlu0 %1200  ;;  %1698 = vmatpush.bf16.msra.mxu3 %v3399_v38 }
 0x26c   : > { %v1215_v55 = vsel %vm1212_vm4, %v1201_v45, %v1209_v25  ;;  %v1219_v53 = vsel %vm1212_vm4, %v1209_v25, %v1201_v45 }
 0x26d   : > { %v1227_v51 = vmul.f32 %v4766_v0, %v1219_v53  ;;  %v1228_v56 = vmul.f32 %v4769_v19, %v1215_v55 }
 0x26f   : > { %1069 = vrot.lane.b32.xlu2 %v4554_v36, %s4057_s20  ;;  %v1233_v52 = vpack.c.bf16 %v1228_v56, %v1227_v51  ;;  %v3406_v14 = vld [vmem:[#allocation3 + $0x100] sm:$0xf]  ;;  %v6001_v51 = vld [vmem:[#allocation25_spill] sm:$0xff]  ;;  %v4837_v56 = vperm.slane %v4706_v11, 6 }
 0x270   : > { %1077 = vrot.lane.b32.xlu1 %v4580_v60, %s4057_s20  ;;  %v3708_v48 = vld [vmem:[#allocation3 + $0x104] sm:$0xf0] }
 0x271   : > { %1237 = vst [vmem:[#allocation3 + $0x70] sm:$0xff] %v1233_v52  ;;  %v1207_v5 = vpop.permute.xlu2 %1206  ;;  %1071 = vrot.lane.b32.xlu0 %v4556_v31, %s4057_s20  ;;  %v3407_v47 = vor.u32 %v3708_v48, %v3406_v14  ;;  %v4840_v52 = vperm.slane %v4711_v7, 6 }
 0x272   : > { %v1334_v1 = vpop.permute.xlu1 %1333  ;;  %6002 = vst [vmem:[#allocation24_spill] sm:$0xff] %v4837_v56 }
 0x273   : > { %v1211_v3 = vpop.permute.xlu0 %1210  ;;  %1724 = vmatpush.bf16.msrb.mxu0 %v3407_v47  ;;  %6003 = vst [vmem:[#allocation26_spill] sm:$0xff] %v4840_v52 }
 0x274   : > { %v1216_v36 = vsel %vm1212_vm4, %v1203_v39, %v1211_v3  ;;  %v1220_v25 = vsel %vm1212_vm4, %v1211_v3, %v1203_v39  ;;  %v6000_v39 = vld [vmem:[#allocation27_spill] sm:$0xff]  ;;  %v6004_v3 = vld [vmem:[#allocation28_spill] sm:$0xff] }
 0x275   : > { %v1229_v60 = vmul.f32 %v4766_v0, %v1220_v25  ;;  %v1230_v21 = vmul.f32 %v4769_v19, %v1216_v36 }
 0x277   : > { %1755 = vmatpush.bf16.msra.mxu0 %v3403_v16  ;;  %1079 = vrot.lane.b32.xlu2 %v4582_v61, %s4057_s20  ;;  %v1234_v31 = vpack.c.bf16 %v1230_v21, %v1229_v60  ;;  %v6005_v21 = vld [vmem:[#allocation29_spill] sm:$0xff] }
 0x278   : > { %1067 = vrot.lane.b32.xlu1 %v4574_v57, %s4057_s20  ;;  %v3334_v2 = vld [vmem:[#allocation3 + $0x70] sm:$0xf]  ;;  %v3689_v13 = vld [vmem:[#allocation3 + $0x74] sm:$0xf] }
 0x279   : > { %1238 = vst [vmem:[#allocation3 + $0x78] sm:$0xff] %v1234_v31  ;;  %v1303_v40 = vpop.permute.xlu2 %1302  ;;  %1065 = vrot.lane.b32.xlu0 %v4552_v20, %s4057_s20 }
 0x27a   : > { %v1344_v41 = vpop.permute.xlu1 %1343 }
 0x27b   : > { %v1342_v33 = vpop.permute.xlu0 %1341  ;;  %v1351_v29 = vsel %vm1349_vm3, %v4742_v17, %v1344_v41  ;;  %v1355_v27 = vsel %vm1349_vm3, %v1344_v41, %v4742_v17 }
 0x27c   : > { %v1350_v61 = vsel %vm1349_vm3, %v1334_v1, %v1342_v33  ;;  %v1354_v57 = vsel %vm1349_vm3, %v1342_v33, %v1334_v1  ;;  %v1362_v42 = vmul.f32 %v4719_v49, %v1351_v29  ;;  %v1363_v20 = vmul.f32 %v4722_v34, %v1355_v27  ;;  %v6006_v29 = vld [vmem:[#allocation31_spill] sm:$0xff] }
 0x27d   : > { %v1360_v23 = vmul.f32 %v4719_v49, %v1350_v61  ;;  %v1361_v15 = vmul.f32 %v4722_v34, %v1354_v57 }
 0x27e   : > { %v1369_v10 = vpack.c.bf16 %v1363_v20, %v1362_v42 }
 0x27f   : > { %1073 = vrot.lane.b32.xlu2 %v4576_v58, %s4057_s20  ;;  %v1368_v6 = vpack.c.bf16 %v1361_v15, %v1360_v23 }
 0x280   : > { %1373 = vst [vmem:[#allocation3 + $0xe8] sm:$0xff] %v1369_v10  ;;  %2140 = vperm.xlu1 %3829, %v5998_v43   ;;  %v3690_v17 = vld [vmem:[#allocation3 + $0x74] sm:$0xf0]  ;;  %v3336_v44 = vld [vmem:[#allocation3 + $0x78] sm:$0xf0]  ;;  %v4866_v43 = vperm.slane %v4711_v7, 2 }
 0x281   : > { %1372 = vst [vmem:[#allocation3 + $0xe0] sm:$0xff] %v1368_v6  ;;  %v4812_v12 = vpop.permute.xlu2 %1159  ;;  %1075 = vrot.lane.b32.xlu0 %v4578_v59, %s4057_s20  ;;  %v3335_v4 = vor.u32 %v3690_v17, %v3334_v2  ;;  %v3339_v8 = vor.u32 %v3689_v13, %v3336_v44  ;;  %v2166_v10 = vld [vmem:[%s5916_s8] sm:$0xf]  ;;  %v6007_v6 = vld [vmem:[#allocation30_spill] sm:$0xff]  ;;  %v4863_v13 = vperm.slane %v4706_v11, 2 }
 0x282   : > { %v1205_v30 = vpop.permute.xlu1 %1204 }
 0x283   : > { %v1199_v26 = vpop.permute.xlu0 %1198  ;;  %v1213_v58 = vsel %vm1212_vm4, %v4760_v63, %v1205_v30  ;;  %v1217_v22 = vsel %vm1212_vm4, %v1205_v30, %v4760_v63  ;;  %1679 = vmatpush.bf16.msra.mxu2 %v3335_v4  ;;  %1736 = vmatpush.bf16.msrb.mxu1 %v3339_v8 }
 0x284   : > { %v1214_v35 = vsel %vm1212_vm4, %v1199_v26, %v1207_v5  ;;  %v1218_v59 = vsel %vm1212_vm4, %v1207_v5, %v1199_v26  ;;  %v1223_v50 = vmul.f32 %v4766_v0, %v1217_v22  ;;  %v1224_v54 = vmul.f32 %v4769_v19, %v1213_v58 }
 0x285   : > { %v1225_v24 = vmul.f32 %v4766_v0, %v1218_v59  ;;  %v1226_v28 = vmul.f32 %v4769_v19, %v1214_v35 }
 0x286   : > { %v1231_v32 = vpack.c.bf16 %v1224_v54, %v1223_v50 }
 0x287   : > { %2076 = vperm.xlu2 %3830, %v5999_v37   ;;  %v1232_v62 = vpack.c.bf16 %v1226_v28, %v1225_v24  ;;  %v3704_v63 = vld [vmem:[#allocation3 + $0xe4] sm:$0xf0]  ;;  %v3392_v38 = vld [vmem:[#allocation3 + $0xe8] sm:$0xf0] }
 0x288   : > { %1235 = vst [vmem:[#allocation3 + $0x60] sm:$0xff] %v1231_v32  ;;  %2012 = vperm.xlu1 %3829, %v6000_v39   ;;  %v3390_v45 = vld [vmem:[#allocation3 + $0xe0] sm:$0xf]  ;;  %v3703_v55 = vld [vmem:[#allocation3 + $0xe4] sm:$0xf] }
 0x289   : > { %1236 = vst [vmem:[#allocation3 + $0x68] sm:$0xff] %v1232_v62  ;;  %v4833_v53 = vpop.permute.xlu2 %1290  ;;  %2148 = vperm.xlu0 %3828, %v6001_v51   ;;  %v3391_v14 = vor.u32 %v3704_v63, %v3390_v45  ;;  %v3395_v46 = vor.u32 %v3703_v55, %v3392_v38 }
 0x28a   : > { %v1297_v9 = vpop.permute.xlu1 %1296 }
 0x28b   : > { %v1295_v48 = vpop.permute.xlu0 %1294  ;;  %1699 = vmatpush.bf16.msra.mxu3 %v3391_v14  ;;  %1756 = vmatpush.bf16.msra.mxu0 %v3395_v46 }
 0x28c   : > { %v1309_v5 = vsel %vm1306_vm5, %v1295_v48, %v1303_v40  ;;  %v1313_v47 = vsel %vm1306_vm5, %v1303_v40, %v1295_v48 }
 0x28d   : > { %v1321_v1 = vmul.f32 %v4837_v56, %v1309_v5  ;;  %v1322_v16 = vmul.f32 %v4840_v52, %v1313_v47 }
 0x28f   : > { %2084 = vperm.xlu2 %3830, %v6004_v3   ;;  %v1327_v36 = vpack.c.bf16 %v1322_v16, %v1321_v1  ;;  %v3326_v25 = vld [vmem:[#allocation3 + $0x60] sm:$0xf]  ;;  %v3687_v60 = vld [vmem:[#allocation3 + $0x64] sm:$0xf] }
 0x290   : > { %2020 = vperm.xlu1 %3829, %v6005_v21   ;;  %v3688_v31 = vld [vmem:[#allocation3 + $0x64] sm:$0xf0]  ;;  %v3328_v41 = vld [vmem:[#allocation3 + $0x68] sm:$0xf0] }
 0x291   : > { %1331 = vst [vmem:[#allocation3 + $0xd0] sm:$0xff] %v1327_v36  ;;  %v1301_v33 = vpop.permute.xlu2 %1300  ;;  %1948 = vperm.xlu0 %3828, %v6006_v29   ;;  %v3327_v27 = vor.u32 %v3688_v31, %v3326_v25  ;;  %v3331_v61 = vor.u32 %v3687_v60, %v3328_v41 }
 0x292   : > { %v1158_v40 = vpop.permute.xlu1 %1157 }
 0x293   : > { %v1305_v57 = vpop.permute.xlu0 %1304  ;;  %1680 = vmatpush.bf16.msra.mxu2 %v3327_v27  ;;  %1737 = vmatpush.bf16.msrb.mxu1 %v3331_v61 }
 0x294   : > { %v1310_v42 = vsel %vm1306_vm5, %v1297_v9, %v1305_v57  ;;  %v1314_v20 = vsel %vm1306_vm5, %v1305_v57, %v1297_v9 }
 0x295   : > { %v1323_v23 = vmul.f32 %v4837_v56, %v1310_v42  ;;  %v1324_v15 = vmul.f32 %v4840_v52, %v1314_v20 }
 0x297   : > { %1956 = vperm.xlu2 %3830, %v6007_v6   ;;  %v1328_v2 = vpack.c.bf16 %v1324_v15, %v1323_v23 }
 0x298   : > { %v3382_v28 = vld [vmem:[#allocation3 + $0xd0] sm:$0xf]  ;;  %v3701_v32 = vld [vmem:[#allocation3 + $0xd4] sm:$0xf] }
 0x299   : > { %1332 = vst [vmem:[#allocation3 + $0xd8] sm:$0xff] %v1328_v2  ;;  %2169 = vperm.xlu0 %3828, %v2166_v10   ;;  %v1162_v44 = vpop.permute.xlu2 %1161  ;;  %v3262_v2 = vld [vmem:[%s6008_s30 + $0x8] sm:$0xf] }
 0x29a   : > { %v1168_v17 = vpop.permute.xlu1 %1167 }
 0x29b   : > { %v1166_v4 = vpop.permute.xlu0 %1165  ;;  %v1173_v8 = vsel %vm1169_vm6, %v4812_v12, %v1168_v17  ;;  %v1177_v30 = vsel %vm1169_vm6, %v1168_v17, %v4812_v12  ;;  %v3671_v17 = vld [vmem:[%s6008_s30 + $0x10] sm:$0xf0] }
 0x29c   : > { %v1172_v26 = vsel %vm1169_vm6, %v1158_v40, %v1166_v4  ;;  %v1176_v58 = vsel %vm1169_vm6, %v1166_v4, %v1158_v40  ;;  %v1186_v22 = vmul.f32 %v4863_v13, %v1177_v30  ;;  %v1187_v35 = vmul.f32 %v4866_v43, %v1173_v8 }
 0x29d   : > { %v1184_v59 = vmul.f32 %v4863_v13, %v1176_v58  ;;  %v1185_v50 = vmul.f32 %v4866_v43, %v1172_v26  ;;  %v4908_v4 = vor.u32 %v3671_v17, %v3262_v2 }
 0x29e   : > { %v1191_v54 = vpack.c.bf16 %v1187_v35, %v1186_v22 }
 0x29f   : > { %v1190_v24 = vpack.c.bf16 %v1185_v50, %v1184_v59  ;;  %3420 = vmatmul.msk.bf16.vlgmr.msrb.gmra.mxu0 %vm639_vm0, %v4908_v4  ;;  %v4920_v59 = vperm.slane %v4706_v11, 5  ;;  %v4923_v50 = vperm.slane %v4711_v7, 5 }
 0x2a0   : > { %1195 = vst [vmem:[#allocation3 + $0x58] sm:$0xff] %v1191_v54  ;;  %v3702_v12 = vld [vmem:[#allocation3 + $0xd4] sm:$0xf0]  ;;  %v3384_v37 = vld [vmem:[#allocation3 + $0xd8] sm:$0xf0] }
 0x2a1   : > { %1194 = vst [vmem:[#allocation3 + $0x50] sm:$0xff] %v1190_v24  ;;  %v3383_v62 = vor.u32 %v3702_v12, %v3382_v28  ;;  %v3387_v63 = vor.u32 %v3701_v32, %v3384_v37  ;;  %v1254_v48 = vpop.permute.xlu2 %1253 }
 0x2a2   : > { %v1299_v38 = vpop.permute.xlu1 %1298  ;;  %6009 = vst [vmem:[#allocation27_spill] sm:$0xff] %v4920_v59 }
 0x2a3   : > { %v1293_v39 = vpop.permute.xlu0 %1292  ;;  %v1307_v45 = vsel %vm1306_vm5, %v4833_v53, %v1299_v38  ;;  %v1311_v55 = vsel %vm1306_vm5, %v1299_v38, %v4833_v53  ;;  %1700 = vmatpush.bf16.msra.mxu3 %v3383_v62  ;;  %1757 = vmatpush.bf16.msra.mxu0 %v3387_v63  ;;  %6010 = vst [vmem:[#allocation25_spill] sm:$0xff] %v4923_v50 }
 0x2a4   : > { %v1308_v51 = vsel %vm1306_vm5, %v1293_v39, %v1301_v33  ;;  %v1312_v14 = vsel %vm1306_vm5, %v1301_v33, %v1293_v39  ;;  %v1317_v46 = vmul.f32 %v4837_v56, %v1307_v45  ;;  %v1318_v9 = vmul.f32 %v4840_v52, %v1311_v55 }
 0x2a5   : > { %v1319_v5 = vmul.f32 %v4837_v56, %v1308_v51  ;;  %v1320_v47 = vmul.f32 %v4840_v52, %v1312_v14  ;;  %v4939_v14 = vperm.slane %v4706_v11, 1 }
 0x2a6   : > { %v1325_v1 = vpack.c.bf16 %v1318_v9, %v1317_v46 }
 0x2a7   : > { %v1326_v16 = vpack.c.bf16 %v1320_v47, %v1319_v5  ;;  %v3686_v53 = vld [vmem:[#allocation3 + $0x54] sm:$0xf0]  ;;  %v3320_v3 = vld [vmem:[#allocation3 + $0x58] sm:$0xf0]  ;;  %6011 = vst [vmem:[#allocation28_spill] sm:$0xff] %v4939_v14 }
 0x2a8   : > { %1329 = vst [vmem:[#allocation3 + $0xc0] sm:$0xff] %v1325_v1  ;;  %v3318_v36 = vld [vmem:[#allocation3 + $0x50] sm:$0xf]  ;;  %v3685_v25 = vld [vmem:[#allocation3 + $0x54] sm:$0xf] }
 0x2a9   : > { %1330 = vst [vmem:[#allocation3 + $0xc8] sm:$0xff] %v1326_v16  ;;  %v3319_v60 = vor.u32 %v3686_v53, %v3318_v36  ;;  %v3323_v21 = vor.u32 %v3685_v25, %v3320_v3  ;;  %v1115_v40 = vpop.permute.xlu2 %1114  ;;  %v3274_v53 = vld [vmem:[%s6008_s30 + $0x20] sm:$0xf]  ;;  %v3674_v3 = vld [vmem:[%s6008_s30 + $0x28] sm:$0xf0] }
 0x2aa   : > { %v1156_v31 = vpop.permute.xlu1 %1155  ;;  %v4950_v25 = vor.u32 %v3674_v3, %v3274_v53 }
 0x2ab   : > { %v1154_v41 = vpop.permute.xlu0 %1153  ;;  %1681 = vmatpush.bf16.msra.mxu2 %v3319_v60  ;;  %1738 = vmatpush.bf16.msrb.mxu1 %v3323_v21 }
 0x2ac   : > { %v1170_v33 = vsel %vm1169_vm6, %v1154_v41, %v1162_v44  ;;  %v1174_v29 = vsel %vm1169_vm6, %v1162_v44, %v1154_v41 }
 0x2ad   : > { %v1180_v27 = vmul.f32 %v4863_v13, %v1174_v29  ;;  %v1181_v61 = vmul.f32 %v4866_v43, %v1170_v33 }
 0x2af   : > { %v1188_v57 = vpack.c.bf16 %v1181_v61, %v1180_v27  ;;  %v3374_v42 = vld [vmem:[#allocation3 + $0xc0] sm:$0xf]  ;;  %v3699_v20 = vld [vmem:[#allocation3 + $0xc4] sm:$0xf]  ;;  %3421 = vmatmul.msk.bf16.gmra.mxu0 %vm639_vm0, %v4950_v25 }
 0x2b0   : > { %v3700_v23 = vld [vmem:[#allocation3 + $0xc4] sm:$0xf0]  ;;  %v3376_v15 = vld [vmem:[#allocation3 + $0xc8] sm:$0xf0] }
 0x2b1   : > { %1192 = vst [vmem:[#allocation3 + $0x40] sm:$0xff] %v1188_v57  ;;  %v3375_v10 = vor.u32 %v3700_v23, %v3374_v42  ;;  %v3379_v6 = vor.u32 %v3699_v20, %v3376_v15  ;;  %v1125_v54 = vpop.permute.xlu2 %1124 }
 0x2b2   : > { %v1252_v44 = vpop.permute.xlu1 %1251 }
 0x2b3   : > { %v1164_v8 = vpop.permute.xlu0 %1163  ;;  %1701 = vmatpush.bf16.msra.mxu3 %v3375_v10  ;;  %1758 = vmatpush.bf16.msra.mxu0 %v3379_v6 }
 0x2b4   : > { %v1171_v30 = vsel %vm1169_vm6, %v1156_v31, %v1164_v8  ;;  %v1175_v26 = vsel %vm1169_vm6, %v1164_v8, %v1156_v31 }
 0x2b5   : > { %v1182_v58 = vmul.f32 %v4863_v13, %v1175_v26  ;;  %v1183_v22 = vmul.f32 %v4866_v43, %v1171_v30 }
 0x2b7   : > { %v1189_v35 = vpack.c.bf16 %v1183_v22, %v1182_v58 }
 0x2b8   : > { %v3310_v46 = vld [vmem:[#allocation3 + $0x40] sm:$0xf]  ;;  %v3683_v9 = vld [vmem:[#allocation3 + $0x44] sm:$0xf] }
 0x2b9   : > { %1193 = vst [vmem:[#allocation3 + $0x48] sm:$0xff] %v1189_v35  ;;  %v1256_v60 = vpop.permute.xlu2 %1255 }
 0x2ba   : > { %v1262_v24 = vpop.permute.xlu1 %1261 }
 0x2bb   : > { %v1260_v28 = vpop.permute.xlu0 %1259  ;;  %v1267_v32 = vsel %vm1263_vm7, %v1254_v48, %v1262_v24  ;;  %v1271_v12 = vsel %vm1263_vm7, %v1262_v24, %v1254_v48  ;;  %v4942_v48 = vperm.slane %v4711_v7, 1 }
 0x2bc   : > { %v1266_v37 = vsel %vm1263_vm7, %v1252_v44, %v1260_v28  ;;  %v1270_v62 = vsel %vm1263_vm7, %v1260_v28, %v1252_v44  ;;  %v1280_v63 = vmul.f32 %v4920_v59, %v1267_v32  ;;  %v1281_v38 = vmul.f32 %v4923_v50, %v1271_v12 }
 0x2bd   : > { %v1278_v39 = vmul.f32 %v4920_v59, %v1266_v37  ;;  %v1279_v45 = vmul.f32 %v4923_v50, %v1270_v62  ;;  %6012 = vst [vmem:[#allocation29_spill] sm:$0xff] %v4942_v48 }
 0x2be   : > { %v1285_v55 = vpack.c.bf16 %v1281_v38, %v1280_v63 }
 0x2bf   : > { %v1284_v51 = vpack.c.bf16 %v1279_v45, %v1278_v39 }
 0x2c0   : > { %1289 = vst [vmem:[#allocation3 + $0xb8] sm:$0xff] %v1285_v55  ;;  %v3684_v5 = vld [vmem:[#allocation3 + $0x44] sm:$0xf0]  ;;  %v3312_v47 = vld [vmem:[#allocation3 + $0x48] sm:$0xf0] }
 0x2c1   : > { %1288 = vst [vmem:[#allocation3 + $0xb0] sm:$0xff] %v1284_v51  ;;  %v3311_v1 = vor.u32 %v3684_v5, %v3310_v46  ;;  %v3315_v16 = vor.u32 %v3683_v9, %v3312_v47  ;;  %v1113_v58 = vpop.permute.xlu2 %1112 }
 0x2c2   : > { %v1123_v36 = vpop.permute.xlu1 %1122 }
 0x2c3   : > { %v1117_v21 = vpop.permute.xlu0 %1116  ;;  %v1129_v31 = vsel %vm1126_vm8, %v1115_v40, %v1123_v36  ;;  %v1133_v41 = vsel %vm1126_vm8, %v1123_v36, %v1115_v40  ;;  %1682 = vmatpush.bf16.msra.mxu2 %v3311_v1  ;;  %1739 = vmatpush.bf16.msrb.mxu1 %v3315_v16 }
 0x2c4   : > { %v1130_v33 = vsel %vm1126_vm8, %v1117_v21, %v1125_v54  ;;  %v1134_v29 = vsel %vm1126_vm8, %v1125_v54, %v1117_v21  ;;  %v1141_v27 = vmul.f32 %v4939_v14, %v1133_v41  ;;  %v1142_v61 = vmul.f32 %v4942_v48, %v1129_v31 }
 0x2c5   : > { %v1143_v57 = vmul.f32 %v4939_v14, %v1134_v29  ;;  %v1144_v42 = vmul.f32 %v4942_v48, %v1130_v33  ;;  %v4992_v29 = vperm.slane %v4706_v11, 0 }
 0x2c6   : > { %v1147_v40 = vpack.c.bf16 %v1142_v61, %v1141_v27 }
 0x2c7   : > { %v1148_v20 = vpack.c.bf16 %v1144_v42, %v1143_v57  ;;  %v3698_v23 = vld [vmem:[#allocation3 + $0xb4] sm:$0xf0]  ;;  %v3368_v15 = vld [vmem:[#allocation3 + $0xb8] sm:$0xf0]  ;;  %6013 = vst [vmem:[#allocation31_spill] sm:$0xff] %v4992_v29  ;;  %v4995_v57 = vperm.slane %v4711_v7, 0 }
 0x2c8   : > { %1151 = vst [vmem:[#allocation3 + $0x30] sm:$0xff] %v1147_v40  ;;  %v3366_v10 = vld [vmem:[#allocation3 + $0xb0] sm:$0xf]  ;;  %v3697_v6 = vld [vmem:[#allocation3 + $0xb4] sm:$0xf] }
 0x2c9   : > { %1152 = vst [vmem:[#allocation3 + $0x38] sm:$0xff] %v1148_v20  ;;  %v3367_v2 = vor.u32 %v3698_v23, %v3366_v10  ;;  %v3371_v17 = vor.u32 %v3697_v6, %v3368_v15  ;;  %v1070_v46 = vpop.permute.xlu2 %1069  ;;  %v3350_v10 = vld [vmem:[#allocation3 + $0x90] sm:$0xf] }
 0x2ca   : > { %v1250_v44 = vpop.permute.xlu1 %1249  ;;  %6014 = vst [vmem:[#allocation30_spill] sm:$0xff] %v4995_v57 }
 0x2cb   : > { %v1248_v8 = vpop.permute.xlu0 %1247  ;;  %1702 = vmatpush.bf16.msra.mxu3 %v3367_v2  ;;  %1759 = vmatpush.bf16.msra.mxu0 %v3371_v17  ;;  %v3694_v2 = vld [vmem:[#allocation3 + $0x94] sm:$0xf0]  ;;  %v3693_v17 = vld [vmem:[#allocation3 + $0x94] sm:$0xf] }
 0x2cc   : > { %v1264_v30 = vsel %vm1263_vm7, %v1248_v8, %v1256_v60  ;;  %v1268_v26 = vsel %vm1263_vm7, %v1256_v60, %v1248_v8 }
 0x2cd   : > { %v1274_v22 = vmul.f32 %v4920_v59, %v1264_v30  ;;  %v1275_v35 = vmul.f32 %v4923_v50, %v1268_v26 }
 0x2cf   : > { %v1282_v54 = vpack.c.bf16 %v1275_v35, %v1274_v22  ;;  %v3302_v24 = vld [vmem:[#allocation3 + $0x30] sm:$0xf]  ;;  %v3681_v28 = vld [vmem:[#allocation3 + $0x34] sm:$0xf] }
 0x2d0   : > { %v3682_v32 = vld [vmem:[#allocation3 + $0x34] sm:$0xf0]  ;;  %v3304_v12 = vld [vmem:[#allocation3 + $0x38] sm:$0xf0] }
 0x2d1   : > { %1286 = vst [vmem:[#allocation3 + $0xa0] sm:$0xff] %v1282_v54  ;;  %v3303_v37 = vor.u32 %v3682_v32, %v3302_v24  ;;  %v3307_v62 = vor.u32 %v3681_v28, %v3304_v12  ;;  %v1080_v20 = vpop.permute.xlu2 %1079  ;;  %v3351_v24 = vor.u32 %v3694_v2, %v3350_v10  ;;  %v3342_v32 = vld [vmem:[#allocation3 + $0x80] sm:$0xf]  ;;  %v3691_v12 = vld [vmem:[#allocation3 + $0x84] sm:$0xf]  ;;  %v5040_v10 = vld [vmem:[%s4307_s15 + $0x58] sm:$0xff] }
 0x2d2   : > { %v1111_v63 = vpop.permute.xlu1 %1110 }
 0x2d3   : > { %v1258_v38 = vpop.permute.xlu0 %1257  ;;  %1683 = vmatpush.bf16.msra.mxu2 %v3303_v37  ;;  %1740 = vmatpush.bf16.msrb.mxu1 %v3307_v62  ;;  %v3692_v62 = vld [vmem:[#allocation3 + $0x84] sm:$0xf0] }
 0x2d4   : > { %v1265_v39 = vsel %vm1263_vm7, %v1250_v44, %v1258_v38  ;;  %v1269_v45 = vsel %vm1263_vm7, %v1258_v38, %v1250_v44  ;;  %v3352_v44 = vld [vmem:[#allocation3 + $0x98] sm:$0xf0]  ;;  %v3669_v38 = vld [vmem:[%s6008_s30 + $0x4] sm:$0xf] }
 0x2d5   : > { %v1276_v55 = vmul.f32 %v4920_v59, %v1265_v39  ;;  %v1277_v51 = vmul.f32 %v4923_v50, %v1269_v45  ;;  %v3355_v28 = vor.u32 %v3693_v17, %v3352_v44 }
 0x2d7   : > { %v1283_v9 = vpack.c.bf16 %v1277_v51, %v1276_v55  ;;  %v3256_v51 = vld [vmem:[%s6008_s30 + $0xc] sm:$0xf0] }
 0x2d8   : > { %v3358_v27 = vld [vmem:[#allocation3 + $0xa0] sm:$0xf]  ;;  %v3695_v61 = vld [vmem:[#allocation3 + $0xa4] sm:$0xf] }
 0x2d9   : > { %1287 = vst [vmem:[#allocation3 + $0xa8] sm:$0xff] %v1283_v9 }
 0x2da   : > { %v1121_v5 = vpop.permute.xlu1 %1120 }
 0x2db   : > { %v1119_v47 = vpop.permute.xlu0 %1118  ;;  %v1128_v1 = vsel %vm1126_vm8, %v1113_v58, %v1121_v5  ;;  %v1132_v16 = vsel %vm1126_vm8, %v1121_v5, %v1113_v58 }
 0x2dc   : > { %v1127_v53 = vsel %vm1126_vm8, %v1111_v63, %v1119_v47  ;;  %v1131_v3 = vsel %vm1126_vm8, %v1119_v47, %v1111_v63  ;;  %v1139_v36 = vmul.f32 %v4939_v14, %v1132_v16  ;;  %v1140_v60 = vmul.f32 %v4942_v48, %v1128_v1  ;;  %v3344_v63 = vld [vmem:[#allocation3 + $0x88] sm:$0xf0] }
 0x2dd   : > { %v1137_v21 = vmul.f32 %v4939_v14, %v1131_v3  ;;  %v1138_v31 = vmul.f32 %v4942_v48, %v1127_v53  ;;  %v3343_v47 = vor.u32 %v3692_v62, %v3342_v32  ;;  %v3347_v16 = vor.u32 %v3691_v12, %v3344_v63  ;;  %v5016_v3 = vld [vmem:[%s4299_s0 + $0x70] sm:$0xff]  ;;  %v3672_v63 = vld [vmem:[%s6008_s30 + $0x1c] sm:$0xf] }
 0x2de   : > { %v1146_v41 = vpack.c.bf16 %v1140_v60, %v1139_v36  ;;  %v3259_v53 = vor.u32 %v3669_v38, %v3256_v51  ;;  %v5019_v36 = vld [vmem:[%s4307_s15 + $0x78] sm:$0xff]  ;;  %v1074_v60 = vpop.permute.xlu2 %1073  ;;  %v5074_v12 = vld [vmem:[%s4307_s15 + $0x50] sm:$0xff]  ;;  %v3268_v38 = vld [vmem:[%s6008_s30 + $0x24] sm:$0xf0] }
 0x2df   : > { %v1145_v33 = vpack.c.bf16 %v1138_v31, %v1137_v21  ;;  %v3416_v51 = vld [vmem:[#allocation3 + $0x118] sm:$0xf0] }
 0x2e0   : > { %1150 = vst [vmem:[#allocation3 + $0x28] sm:$0xff] %v1146_v41  ;;  %v3696_v42 = vld [vmem:[#allocation3 + $0xa4] sm:$0xf0]  ;;  %v3360_v40 = vld [vmem:[#allocation3 + $0xa8] sm:$0xf0] }
 0x2e1   : > { %1149 = vst [vmem:[#allocation3 + $0x20] sm:$0xff] %v1145_v33  ;;  %v3359_v23 = vor.u32 %v3696_v42, %v3358_v27  ;;  %v3363_v15 = vor.u32 %v3695_v61, %v3360_v40  ;;  %v5026_v33 = vld [vmem:[%s4299_s0 + $0x60] sm:$0xff]  ;;  %v5033_v42 = vld [vmem:[%s4307_s15 + $0x68] sm:$0xff]  ;;  %v5036_v40 = vld [vmem:[%s4299_s0 + $0x50] sm:$0xff] }
 0x2e2   : > { %v1078_v6 = vpop.permute.xlu1 %1077 }
 0x2e3   : > { %v1072_v8 = vpop.permute.xlu0 %1071  ;;  %v1086_v11 = vsel %vm1083_vm9, %v1070_v46, %v1078_v6  ;;  %v1090_v30 = vsel %vm1083_vm9, %v1078_v6, %v1070_v46  ;;  %1703 = vmatpush.bf16.msra.mxu3 %v3359_v23  ;;  %1760 = vmatpush.bf16.msra.mxu0 %v3363_v15 }
 0x2e4   : > { %v1087_v7 = vsel %vm1083_vm9, %v1072_v8, %v1080_v20  ;;  %v1091_v26 = vsel %vm1083_vm9, %v1080_v20, %v1072_v8  ;;  %v1098_v58 = vmul.f32 %v4992_v29, %v1090_v30  ;;  %v1099_v22 = vmul.f32 %v4995_v57, %v1086_v11  ;;  %v5045_v8 = vld [vmem:[%s4299_s0 + $0x40] sm:$0xff]  ;;  %v5048_v11 = vld [vmem:[%s4307_s15 + $0x48] sm:$0xff]  ;;  %v5052_v30 = vld [vmem:[%s4307_s15 + $0x70] sm:$0xff] }
 0x2e5   : > { %v1100_v35 = vmul.f32 %v4992_v29, %v1091_v26  ;;  %v1101_v54 = vmul.f32 %v4995_v57, %v1087_v7  ;;  %v5055_v7 = vld [vmem:[%s4318_s27 + $0x70] sm:$0xff] }
 0x2e6   : > { %v1104_v37 = vpack.c.bf16 %v1099_v22, %v1098_v58 }
 0x2e7   : > { %v1105_v39 = vpack.c.bf16 %v1101_v54, %v1100_v35  ;;  %1704 = vmatpush.bf16.msra.mxu3 %v3351_v24  ;;  %1761 = vmatpush.bf16.msra.mxu0 %v3355_v28  ;;  %v3680_v45 = vld [vmem:[#allocation3 + $0x24] sm:$0xf0]  ;;  %v3296_v55 = vld [vmem:[#allocation3 + $0x28] sm:$0xf0]  ;;  %v5064_v54 = vld [vmem:[%s4307_s15 + $0x60] sm:$0xff] }
 0x2e8   : > { %1108 = vst [vmem:[#allocation3 + $0x10] sm:$0xff] %v1104_v37  ;;  %v3294_v46 = vld [vmem:[#allocation3 + $0x20] sm:$0xf]  ;;  %v3679_v9 = vld [vmem:[#allocation3 + $0x24] sm:$0xf]  ;;  %v5077_v37 = vld [vmem:[%s4318_s27 + $0x50] sm:$0xff] }
 0x2e9   : > { %1109 = vst [vmem:[#allocation3 + $0x18] sm:$0xff] %v1105_v39  ;;  %v3295_v5 = vor.u32 %v3680_v45, %v3294_v46  ;;  %v3299_v1 = vor.u32 %v3679_v9, %v3296_v55  ;;  %v5067_v24 = vld [vmem:[%s4318_s27 + $0x60] sm:$0xff]  ;;  %v3271_v55 = vor.u32 %v3672_v63, %v3268_v38  ;;  %v5155_v38 = vld [vmem:[%s4314_s19 + $0x58] sm:$0xff] }
 0x2ea   : > { %v1068_v26 = vpop.permute.xlu1 %1067  ;;  %v5088_v39 = vld [vmem:[%s4307_s15 + $0x40] sm:$0xff]  ;;  %s6030_s15 = sld [smem:[#allocation52_spill]] }
 0x2eb   : > { %v1066_v21 = vpop.permute.xlu0 %1065  ;;  %1684 = vmatpush.bf16.msra.mxu2 %v3295_v5  ;;  %1705 = vmatpush.bf16.msra.mxu3 %v3343_v47  ;;  %v5091_v45 = vld [vmem:[%s4318_s27 + $0x40] sm:$0xff]  ;;  %v3670_v5 = vld [vmem:[%s6008_s30 + $0x8] sm:$0xf0] }
 0x2ec   : > { %v1084_v31 = vsel %vm1083_vm9, %v1066_v21, %v1074_v60  ;;  %v1088_v41 = vsel %vm1083_vm9, %v1074_v60, %v1066_v21  ;;  %1741 = vmatpush.bf16.msrb.mxu1 %v3299_v1  ;;  %1762 = vmatpush.bf16.msra.mxu0 %v3347_v16  ;;  %v3254_v9 = vld [vmem:[%s6008_s30] sm:$0xf]  ;;  %v3709_v21 = vld [vmem:[#allocation3 + $0x114] sm:$0xf] }
 0x2ed   : > { %v1094_v27 = vmul.f32 %v4992_v29, %v1088_v41  ;;  %v1095_v61 = vmul.f32 %v4995_v57, %v1084_v31  ;;  %v5104_v31 = vld [vmem:[%s4299_s0 + $0x78] sm:$0xff]  ;;  %v3419_v41 = vor.u32 %v3709_v21, %v3416_v51  ;;  %v5152_v63 = vld [vmem:[%s4314_s19 + $0x40] sm:$0xff]  ;;  %v5160_v51 = vld [vmem:[%s4314_s19 + $0x48] sm:$0xff] }
 0x2ee   : > { %1706 = vmatmul.bf16.vlgmr.msra.gmra.mxu3 %v3259_v53 }
 0x2ef   : > { %1917 = vmatpush.msrb.mxu3 %v5016_v3  ;;  %v1102_v20 = vpack.c.bf16 %v1095_v61, %v1094_v27  ;;  %1763 = vmatmul.bf16.vlgmr.msra.gmra.mxu0 %v3259_v53  ;;  %v3286_v23 = vld [vmem:[#allocation3 + $0x10] sm:$0xf]  ;;  %v3677_v15 = vld [vmem:[#allocation3 + $0x14] sm:$0xf]  ;;  %v3255_v27 = vor.u32 %v3670_v5, %v3254_v9  ;;  %v3707_v61 = vld [vmem:[#allocation3 + $0x104] sm:$0xf] }
 0x2f0   : > { %2001 = vmatpush.msrb.mxu0 %v5019_v36  ;;  %v3678_v6 = vld [vmem:[#allocation3 + $0x14] sm:$0xf0]  ;;  %v3288_v2 = vld [vmem:[#allocation3 + $0x18] sm:$0xf0]  ;;  %v3463_v9 = vld [vmem:[%s5912_s4 + $0x10] sm:$0xff] }
 0x2f1   : > { %1918 = vmatpush.msrb.mxu3 %v5026_v33  ;;  %1106 = vst [vmem:[#allocation3] sm:$0xff] %v1102_v20  ;;  %v3287_v17 = vor.u32 %v3678_v6, %v3286_v23  ;;  %v3291_v44 = vor.u32 %v3677_v15, %v3288_v2  ;;  %v3408_v20 = vld [vmem:[#allocation3 + $0x108] sm:$0xf0]  ;;  %v5111_v6 = vld [vmem:[%s4299_s0 + $0x58] sm:$0xff] }
 0x2f2   : > { %2002 = vmatpush.msrb.mxu0 %v5033_v42  ;;  %v5108_v23 = vld [vmem:[%s4299_s0 + $0x68] sm:$0xff]  ;;  %v3411_v15 = vor.u32 %v3707_v61, %v3408_v20  ;;  %v5175_v5 = vld [vmem:[%s4318_s27 + $0x78] sm:$0xff] }
 0x2f3   : > { %1919 = vmatpush.msrb.mxu3 %v5036_v40  ;;  %v1076_v58 = vpop.permute.xlu0 %1075  ;;  %1685 = vmatpush.bf16.msra.mxu2 %v3287_v17  ;;  %v5115_v2 = vld [vmem:[%s4299_s0 + $0x48] sm:$0xff]  ;;  %v5119_v17 = vld [vmem:[%s4314_s19 + $0x70] sm:$0xff] }
 0x2f4   : > { %2003 = vmatpush.msrb.mxu0 %v5040_v10  ;;  %1742 = vmatpush.bf16.msrb.mxu1 %v3291_v44  ;;  %v1085_v22 = vsel %vm1083_vm9, %v1068_v26, %v1076_v58  ;;  %v1089_v35 = vsel %vm1083_vm9, %v1076_v58, %v1068_v26  ;;  %v1901_v44 = vld [vmem:[%s5912_s4] sm:$0xff]  ;;  %v3458_v58 = vld [vmem:[%s5912_s4 + $0x8] sm:$0xff] }
 0x2f5   : > { %1920 = vmatpush.msrb.mxu3 %v5045_v8  ;;  %v1096_v28 = vmul.f32 %v4992_v29, %v1089_v35  ;;  %v1097_v32 = vmul.f32 %v4995_v57, %v1085_v22  ;;  %v5126_v26 = vld [vmem:[%s4314_s19 + $0x60] sm:$0xff]  ;;  %v5132_v22 = vld [vmem:[%s4314_s19 + $0x78] sm:$0xff]  ;;  %v5136_v35 = vld [vmem:[%s4314_s19 + $0x50] sm:$0xff] }
 0x2f6   : > { %2004 = vmatpush.msrb.mxu0 %v5048_v11 }
 0x2f7   : > { %1981 = vmatpush.msra.mxu3 %v5052_v30  ;;  %v1103_v62 = vpack.c.bf16 %v1097_v32, %v1096_v28  ;;  %v5140_v28 = vld [vmem:[%s4314_s19 + $0x68] sm:$0xff]  ;;  %v3266_v32 = vld [vmem:[%s6008_s30 + $0x18] sm:$0xf] }
 0x2f8   : > { %2109 = vmatpush.msra.mxu0 %v5055_v7  ;;  %v3278_v46 = vld [vmem:[#allocation3] sm:$0xf]  ;;  %v3675_v1 = vld [vmem:[#allocation3 + $0x4] sm:$0xf] }
 0x2f9   : > { %1982 = vmatpush.msra.mxu3 %v5064_v54  ;;  %1107 = vst [vmem:[#allocation3 + $0x8] sm:$0xff] %v1103_v62  ;;  %v3673_v62 = vld [vmem:[%s6008_s30 + $0x20] sm:$0xf0] }
 0x2fa   : > { %2110 = vmatpush.msra.mxu0 %v5067_v24 }
 0x2fb   : > { %1983 = vmatpush.msra.mxu3 %v5074_v12 }
 0x2fc   : > { %2111 = vmatpush.msra.mxu0 %v5077_v37 }
 0x2fd   : > { %1984 = vmatpush.msra.mxu3 %v5088_v39 }
 0x2fe   : > { %2112 = vmatpush.msra.mxu0 %v5091_v45  ;;  %1711 = vmatmul.bf16.gmra.mxu3 %v3271_v55 }
 0x2ff   : > { %1768 = vmatmul.bf16.gmra.mxu0 %v3271_v55  ;;  %v3267_v55 = vor.u32 %v3673_v62, %v3266_v32 }
 0x300   : > { %v3676_v47 = vld [vmem:[#allocation3 + $0x4] sm:$0xf0]  ;;  %v3280_v16 = vld [vmem:[#allocation3 + $0x8] sm:$0xf0] }
 0x301   : > { %v3279_v53 = vor.u32 %v3676_v47, %v3278_v46  ;;  %v3283_v60 = vor.u32 %v3675_v1, %v3280_v16  ;;  %v3468_v46 = vld [vmem:[%s5912_s4 + $0x18] sm:$0xff]  ;;  %v5181_v47 = vld [vmem:[%s4318_s27 + $0x68] sm:$0xff] }
 0x302   : > { %v5185_v1 = vld [vmem:[%s4318_s27 + $0x58] sm:$0xff]  ;;  %v5189_v16 = vld [vmem:[%s4318_s27 + $0x48] sm:$0xff] }
 0x303   : > { %1686 = vmatpush.bf16.msra.mxu2 %v3279_v53  ;;  %1743 = vmatpush.bf16.msrb.mxu1 %v3283_v60 }
 0x306   : > { %1687 = vmatmul.bf16.vlgmr.msra.gmra.mxu2 %v3255_v27  ;;  %1744 = vmatmul.bf16.vlgmr.msrb.gmra.mxu1 %v3255_v27 }
 0x307   : > { %1780 = vmatpush.bf16.msrb.mxu2 %v3419_v41  ;;  %1937 = vmatpush.msra.mxu1 %v5104_v31 }
 0x309   : > { %1938 = vmatpush.msra.mxu1 %v5108_v23 }
 0x30b   : > { %1781 = vmatpush.bf16.msrb.mxu2 %v3411_v15  ;;  %1939 = vmatpush.msra.mxu1 %v5111_v6 }
 0x30d   : > { %1940 = vmatpush.msra.mxu1 %v5115_v2 }
 0x30e   : > { %3456 = vmatmul.msk.f32.vlgmr.msrb.gmra.mxu3 %vm639_vm0, %v1901_v44 }
 0x30f   : > { %2045 = vmatpush.msrb.mxu1 %v5119_v17  ;;  %3460 = vmatmul.msk.f32.vlgmr.msrb.gmra.mxu0 %vm639_vm0, %v3458_v58 }
 0x310   : > { %2065 = vmatpush.msrb.mxu3 %v5132_v22 }
 0x311   : > { %2046 = vmatpush.msrb.mxu1 %v5126_v26 }
 0x312   : > { %2066 = vmatpush.msrb.mxu3 %v5140_v28 }
 0x313   : > { %2047 = vmatpush.msrb.mxu1 %v5136_v35 }
 0x314   : > { %2067 = vmatpush.msrb.mxu3 %v5155_v38 }
 0x315   : > { %2048 = vmatpush.msrb.mxu1 %v5152_v63 }
 0x316   : > { %2068 = vmatpush.msrb.mxu3 %v5160_v51  ;;  %1692 = vmatmul.bf16.gmra.mxu2 %v3267_v55 }
 0x317   : > { %1749 = vmatmul.bf16.gmra.mxu1 %v3267_v55  ;;  %3459 = vmatmul.msk.f32.vlgmr.msra.gmra.mxu3 %vm639_vm0, %v3458_v58 }
 0x318   : > { %3469 = vmatmul.msk.f32.vlgmr.msra.gmra.mxu0 %vm639_vm0, %v3468_v46 }
 0x31f   : > { %3465 = vmatmul.msk.f32.vlgmr.msrb.gmra.mxu3 %vm639_vm0, %v3463_v9 }
 0x326   : > { %3422 = vmatmul.msk.bf16.vlgmr.msrb.gmra.mxu2 %vm639_vm0, %v4908_v4  ;;  %v5197_v4 = vpop.f32.mrf.mxu0 }
 0x327   : > { %3457 = vmatmul.msk.f32.vlgmr.msra.gmra.mxu1 %vm639_vm0, %v1901_v44  ;;  %6015 = vst [vmem:[#allocation34_spill] sm:$0xff] %v5197_v4 }
 0x328   : > { %2129 = vmatpush.msra.mxu1 %v5175_v5 }
 0x32a   : > { %2130 = vmatpush.msra.mxu1 %v5181_v47 }
 0x32c   : > { %2131 = vmatpush.msra.mxu1 %v5185_v1 }
 0x32e   : > { %2132 = vmatpush.msra.mxu1 %v5189_v16  ;;  %v5199_v53 = vpop.f32.mrf.mxu0 }
 0x32f   : > { %3464 = vmatmul.msk.f32.vlgmr.msrb.gmra.mxu1 %vm639_vm0, %v3463_v9  ;;  %6016 = vst [vmem:[#allocation35_spill] sm:$0xff] %v5199_v53 }
 0x336   : > { %3423 = vmatmul.msk.bf16.gmra.mxu2 %vm639_vm0, %v4950_v25  ;;  %v5201_v60 = vpop.f32.mrf.mxu0 }
 0x337   : > { %3470 = vmatmul.msk.f32.vlgmr.msra.gmra.mxu1 %vm639_vm0, %v3468_v46  ;;  %6017 = vst [vmem:[#allocation36_spill] sm:$0xff] %v5201_v60 }
 0x33e   : > { %v1733_v21 = vpop.f32.mrf.mxu0 }
 0x36c   : > { %v1764_v41 = vpop.f32.mrf.mxu0 }
 0x371   : > { %v5203_v27 = vpop.f32.mrf.mxu3 }
 0x372   : > { %6018 = vst [vmem:[#allocation37_spill] sm:$0xff] %v5203_v27  ;;  %v2141_v27 = vpop.permute.xlu1 %2140 }
 0x374   : > { %v1766_v61 = vpop.f32.mrf.mxu0 }
 0x379   : > { %v5205_v15 = vpop.f32.mrf.mxu3 }
 0x37a   : > { %6019 = vst [vmem:[#allocation38_spill] sm:$0xff] %v5205_v15 }
 0x37c   : > { %v1769_v20 = vpop.f32.mrf.mxu0 }
 0x381   : > { %v5209_v32 = vpop.f32.mrf.mxu3 }
 0x382   : > { %6021 = vst [vmem:[#allocation40_spill] sm:$0xff] %v5209_v32  ;;  %v2077_v32 = vpop.permute.xlu2 %2076 }
 0x383   : > { %v1745_v44 = vpop.f32.mrf.mxu1 }
 0x384   : > { %v5207_v58 = vadd.f32 %v1764_v41, %v1745_v44  ;;  %v1771_v25 = vpop.f32.mrf.mxu0  ;;  %v2149_v41 = vpop.permute.xlu0 %2148 }
 0x386   : > { %6020 = vst [vmem:[#allocation39_spill] sm:$0xff] %v5207_v58 }
 0x389   : > { %v5211_v62 = vpop.f32.mrf.mxu2  ;;  %v1714_v53 = vpop.f32.mrf.mxu3 }
 0x38a   : > { %6022 = vst [vmem:[#allocation41_spill] sm:$0xff] %v5211_v62 }
 0x38b   : > { %v1747_v55 = vpop.f32.mrf.mxu1 }
 0x38c   : > { %v5213_v46 = vadd.f32 %v1766_v61, %v1747_v55  ;;  %v2006_v9 = vpop.f32.mrf.mxu0 }
 0x38e   : > { %6023 = vst [vmem:[#allocation42_spill] sm:$0xff] %v5213_v46 }
 0x391   : > { %v5215_v60 = vpop.f32.mrf.mxu2  ;;  %v1922_v62 = vpop.f32.mrf.mxu3 }
 0x392   : > { %6024 = vst [vmem:[#allocation43_spill] sm:$0xff] %v5215_v60  ;;  %v2013_v60 = vpop.permute.xlu1 %2012 }
 0x394   : > { %v1750_v4 = vpop.f32.mrf.mxu1 }
 0x395   : > { %v5217_v50 = vadd.f32 %v1769_v20, %v1750_v4  ;;  %v2114_v15 = vpop.f32.mrf.mxu0  ;;  %v2085_v4 = vpop.permute.xlu2 %2084 }
 0x396   : > { %v2143_v59 = vmul.f32 %v2141_v27, %v2114_v15 }
 0x397   : > { %6025 = vst [vmem:[#allocation44_spill] sm:$0xff] %v5217_v50  ;;  %v1949_v50 = vpop.permute.xlu0 %1948 }
 0x398   : > { %v2151_v44 = vadd.f32 %v2149_v41, %v2143_v59 }
 0x399   : > { %v5219_v52 = vpop.f32.mrf.mxu2 }
 0x39a   : > { %v2153_v58 = vmax.f32 %v2151_v44, 0.0  ;;  %6026 = vst [vmem:[#allocation45_spill] sm:$0xff] %v5219_v52  ;;  %v1986_v20 = vpop.f32.mrf.mxu3  ;;  %v1951_v44 = vmul.f32 %v1949_v50, %v1922_v62  ;;  %v2021_v52 = vpop.permute.xlu1 %2020  ;;  %v2157_v62 = vld [vmem:[%s5915_s7] sm:$0xf] }
 0x39b   : > { %v2015_v15 = vmul.f32 %v2013_v60, %v1986_v20 }
 0x39c   : > { %2187 = vmatpush.msra.mxu3 %v2153_v58  ;;  %v1752_v61 = vpop.f32.mrf.mxu1 }
 0x39d   : > { %v5221_v55 = vadd.f32 %v1771_v25, %v1752_v61  ;;  %v2023_v29 = vadd.f32 %v2021_v52, %v2015_v15  ;;  %v1957_v58 = vpop.permute.xlu2 %1956 }
 0x39e   : > { %v1959_v25 = vadd.f32 %v1957_v58, %v1951_v44 }
 0x39f   : > { %6027 = vst [vmem:[#allocation46_spill] sm:$0xff] %v5221_v55  ;;  %v2025_v55 = vmax.f32 %v2023_v29, 0.0 }
 0x3a1   : > { %v1695_v46 = vpop.f32.mrf.mxu2 }
 0x3a2   : > { %v1715_v56 = vadd.f32 %v1714_v53, %v1695_v46  ;;  %v2070_v14 = vpop.f32.mrf.mxu3 }
 0x3a3   : > { %v2080_v53 = vmul.f32 %v2077_v32, %v2070_v14 }
 0x3a4   : > { %v1942_v34 = vpop.f32.mrf.mxu1  ;;  %v5223_v49 = vadd.f32 %v1733_v21, %v1715_v56  ;;  %v2016_v56 = vmul.f32 %v2013_v60, %v2006_v9  ;;  %v1961_v21 = vmax.f32 %v1959_v25, 0.0 }
 0x3a5   : > { %v2088_v20 = vadd.f32 %v2085_v4, %v2080_v53 }
 0x3a6   : > { %6028 = vst [vmem:[#allocation47_spill] sm:$0xff] %v5223_v49 }
 0x3a7   : > { %v2090_v29 = vmax.f32 %v2088_v20, 0.0 }
 0x3ac   : > { %v2050_v59 = vpop.f32.mrf.mxu1 }
 0x3ad   : > { %v2079_v57 = vmul.f32 %v2077_v32, %v2050_v59  ;;  %v1952_v59 = vmul.f32 %v1949_v50, %v1942_v34 }
 0x3af   : > { %v2087_v48 = vadd.f32 %v2085_v4, %v2079_v57  ;;  %v2024_v57 = vadd.f32 %v2021_v52, %v2016_v56  ;;  %v1960_v14 = vadd.f32 %v1957_v58, %v1952_v59 }
 0x3b1   : > { %v2089_v61 = vmax.f32 %v2087_v48, 0.0  ;;  %v2026_v32 = vmax.f32 %v2024_v57, 0.0  ;;  %v1962_v60 = vmax.f32 %v1960_v14, 0.0 }
 0x3b3   : > { %2188 = vmatpush.msra.mxu3 %v2089_v61 }
 0x3b4   : > { %v2134_v46 = vpop.f32.mrf.mxu1 }
 0x3b5   : > { %v2144_v49 = vmul.f32 %v2141_v27, %v2134_v46  ;;  %2189 = vmatpush.msra.mxu3 %v2025_v55  ;;  %v2170_v27 = vpop.permute.xlu0 %2169 }
 0x3b7   : > { %v2152_v15 = vadd.f32 %v2149_v41, %v2144_v49  ;;  %2190 = vmatpush.msra.mxu3 %v1961_v21 }
 0x3b8   : > { %3473 = vmatmul.msk.f32.vlgmr.msra.gmra.mxu3 %vm639_vm0, %v2157_v62 }
 0x3b9   : > { %v2154_v48 = vmax.f32 %v2152_v15, 0.0 }
 0x3bb   : > { %2207 = vmatpush.msrb.mxu0 %v2154_v48 }
 0x3bd   : > { %2208 = vmatpush.msrb.mxu0 %v2090_v29 }
 0x3bf   : > { %2209 = vmatpush.msrb.mxu0 %v2026_v32 }
 0x3c1   : > { %2210 = vmatpush.msrb.mxu0 %v1962_v60 }
 0x3c2   : > { %3474 = vmatmul.msk.f32.vlgmr.msrb.gmra.mxu0 %vm639_vm0, %v2157_v62 }
 0x43b   : > { %v2192_v9 = vpop.f32.mrf.mxu3 }
 0x43c   : > { %v2193_v55 = vadd.f32 %v2192_v9, %v2170_v27 }
 0x43e   : > { %v2215_v49 = vsel %vm962_vm1, %v2193_v55, -inf }
 0x43f   : > { %v2216_v34 = vrot.slane %v2215_v49, 4  ;;  %v2212_v50 = vpop.f32.mrf.mxu0 }
 0x440   : > { %v2213_v41 = vadd.f32 %v2212_v50, %v2170_v27 }
 0x441   : > { %v2217_v52 = vmax.f32 %v2215_v49, %v2216_v34 }
 0x442   : > { %v2222_v4 = vsel %vm962_vm1, %v2213_v41, -inf }
 0x443   : > { %v2218_v44 = vrot.slane %v2217_v52, 2  ;;  %v2223_v58 = vrot.slane %v2222_v4, 4 }
 0x445   : > { %v2219_v25 = vmax.f32 %v2217_v52, %v2218_v44  ;;  %v2224_v61 = vmax.f32 %v2222_v4, %v2223_v58 }
 0x447   : > { %v2220_v53 = vrot.slane %v2219_v25, 1  ;;  %v2225_v46 = vrot.slane %v2224_v61, 2 }
 0x449   : > { %v2221_v56 = vmax.f32 %v2219_v25, %v2220_v53  ;;  %v2226_v21 = vmax.f32 %v2224_v61, %v2225_v46 }
 0x44b   : > { %v2229_v62 = vsub.f32 %v2193_v55, %v2221_v56  ;;  %v2227_v20 = vrot.slane %v2226_v21, 1 }
 0x44d   : > { %v2231_v59 = vmul.f32 1.442695, %v2229_v62  ;;  %v2228_v15 = vmax.f32 %v2226_v21, %v2227_v20 }
 0x44f   : > { %3841 = vpow2.f32 %v2231_v59  ;;  %v2230_v57 = vsub.f32 %v2213_v41, %v2228_v15 }
 0x451   : > { %v2233_v48 = vmul.f32 1.442695, %v2230_v57 }
 0x453   : > { %3843 = vpow2.f32 %v2233_v48 }
 0x455   : > { %v3842_v29 = vpop.eup %3841 }
 0x456   : > { %v2235_v14 = vsel %vm962_vm1, %v3842_v29, 0.0 }
 0x457   : > { %v2236_v32 = vrot.slane %v2235_v14, 4 }
 0x459   : > { %v3844_v60 = vpop.eup %3843  ;;  %v2237_v27 = vadd.f32 %v2236_v32, %v2235_v14 }
 0x45a   : > { %v2242_v9 = vsel %vm962_vm1, %v3844_v60, 0.0 }
 0x45b   : > { %v2238_v49 = vrot.slane %v2237_v27, 2  ;;  %v2243_v34 = vrot.slane %v2242_v9, 4 }
 0x45d   : > { %v2239_v50 = vadd.f32 %v2238_v49, %v2237_v27  ;;  %v2244_v52 = vadd.f32 %v2243_v34, %v2242_v9 }
 0x45f   : > { %v2240_v55 = vrot.slane %v2239_v50, 1  ;;  %v2245_v4 = vrot.slane %v2244_v52, 2 }
 0x461   : > { %v2241_v44 = vadd.f32 %v2240_v55, %v2239_v50  ;;  %v2246_v58 = vadd.f32 %v2245_v4, %v2244_v52 }
 0x463   : > { %3845 = vrcp.f32 %v2241_v44  ;;  %v2247_v41 = vrot.slane %v2246_v58, 1 }
 0x465   : > { %v2248_v25 = vadd.f32 %v2247_v41, %v2246_v58 }
 0x467   : > { %3847 = vrcp.f32 %v2248_v25 }
 0x469   : > { %v3846_v61 = vpop.eup %3845 }
 0x46a   : > { %v2251_v53 = vmul.f32 %v3846_v61, %v3842_v29 }
 0x46c   : > { %v2253_v46 = vperm.slane %v2251_v53, 0  ;;  %v2263_v56 = vperm.slane %v2251_v53, 1  ;;  %v2281_v29 = vperm.slane %v2251_v53, 2  ;;  %v2299_v27 = vperm.slane %v2251_v53, 3 }
 0x46d   : > { %v3848_v32 = vpop.eup %3847 }
 0x46e   : > { %v2255_v21 = vmul.f32 %v5045_v8, %v2253_v46  ;;  %v2257_v62 = vmul.f32 %v5036_v40, %v2253_v46  ;;  %v2259_v20 = vmul.f32 %v5026_v33, %v2253_v46  ;;  %v2261_v59 = vmul.f32 %v5016_v3, %v2253_v46 }
 0x46f   : > { %v2265_v15 = vmul.f32 %v5088_v39, %v2263_v56  ;;  %v2267_v57 = vmul.f32 %v5074_v12, %v2263_v56  ;;  %v2269_v48 = vmul.f32 %v5064_v54, %v2263_v56  ;;  %v2271_v14 = vmul.f32 %v5052_v30, %v2263_v56 }
 0x470   : > { %v2283_v40 = vmul.f32 %v5152_v63, %v2281_v29  ;;  %v2285_v33 = vmul.f32 %v5136_v35, %v2281_v29  ;;  %v2287_v3 = vmul.f32 %v5126_v26, %v2281_v29  ;;  %v2252_v39 = vmul.f32 %v3848_v32, %v3844_v60 }
 0x471   : > { %v2273_v9 = vadd.f32 %v2265_v15, %v2255_v21  ;;  %v2275_v49 = vadd.f32 %v2267_v57, %v2257_v62  ;;  %v2277_v8 = vadd.f32 %v2269_v48, %v2259_v20  ;;  %v2279_v34 = vadd.f32 %v2271_v14, %v2261_v59 }
 0x472   : > { %v2289_v12 = vmul.f32 %v5119_v17, %v2281_v29  ;;  %v2301_v54 = vmul.f32 %v5091_v45, %v2299_v27  ;;  %v2305_v30 = vmul.f32 %v5067_v24, %v2299_v27  ;;  %v2307_v50 = vmul.f32 %v5055_v7, %v2299_v27 }
 0x473   : > { %v2291_v52 = vadd.f32 %v2283_v40, %v2273_v9  ;;  %v2254_v55 = vperm.slane %v2252_v39, 0  ;;  %v2264_v4 = vperm.slane %v2252_v39, 1  ;;  %v2282_v44 = vperm.slane %v2252_v39, 2 }
 0x474   : > { %v2293_v58 = vadd.f32 %v2285_v33, %v2275_v49  ;;  %v2295_v41 = vadd.f32 %v2287_v3, %v2277_v8  ;;  %v2297_v63 = vadd.f32 %v2289_v12, %v2279_v34  ;;  %v2300_v25 = vperm.slane %v2252_v39, 3 }
 0x475   : > { %v2256_v35 = vmul.f32 %v5115_v2, %v2254_v55  ;;  %v2258_v26 = vmul.f32 %v5111_v6, %v2254_v55  ;;  %v2260_v17 = vmul.f32 %v5108_v23, %v2254_v55  ;;  %v2262_v45 = vmul.f32 %v5104_v31, %v2254_v55 }
 0x476   : > { %v2266_v24 = vmul.f32 %v5048_v11, %v2264_v4  ;;  %v2268_v7 = vmul.f32 %v5040_v10, %v2264_v4  ;;  %v2270_v60 = vmul.f32 %v5033_v42, %v2264_v4  ;;  %v2272_v61 = vmul.f32 %v5019_v36, %v2264_v4 }
 0x477   : > { %v2284_v53 = vmul.f32 %v5160_v51, %v2282_v44  ;;  %v2286_v46 = vmul.f32 %v5155_v38, %v2282_v44  ;;  %v2288_v2 = vmul.f32 %v5140_v28, %v2282_v44  ;;  %v2290_v6 = vmul.f32 %v5132_v22, %v2282_v44 }
 0x478   : > { %v2274_v56 = vadd.f32 %v2266_v24, %v2256_v35  ;;  %v2276_v23 = vadd.f32 %v2268_v7, %v2258_v26  ;;  %v2278_v21 = vadd.f32 %v2270_v60, %v2260_v17  ;;  %v2280_v31 = vadd.f32 %v2272_v61, %v2262_v45 }
 0x479   : > { %v2302_v11 = vmul.f32 %v5189_v16, %v2300_v25  ;;  %v2304_v10 = vmul.f32 %v5185_v1, %v2300_v25  ;;  %v2306_v42 = vmul.f32 %v5181_v47, %v2300_v25  ;;  %v2308_v36 = vmul.f32 %v5175_v5, %v2300_v25 }
 0x47a   : > { %v2292_v62 = vadd.f32 %v2284_v53, %v2274_v56  ;;  %v2294_v51 = vadd.f32 %v2286_v46, %v2276_v23  ;;  %v2296_v20 = vadd.f32 %v2288_v2, %v2278_v21  ;;  %v2298_v38 = vadd.f32 %v2290_v6, %v2280_v31  ;;  %v602_v6 = vld [vmem:[%s6030_s15] sm:$0xff] }
 0x47b   : > { %v2303_v28 = vmul.f32 %v5077_v37, %v2299_v27  ;;  %v5266_v59 = vadd.f32 %v2301_v54, %v2291_v52  ;;  %v5268_v22 = vadd.f32 %v2305_v30, %v2295_v41  ;;  %v5270_v15 = vadd.f32 %v2307_v50, %v2297_v63 }
 0x47c   : > { %v5272_v57 = vadd.f32 %v2302_v11, %v2292_v62  ;;  %v5274_v16 = vadd.f32 %v2304_v10, %v2294_v51  ;;  %v2314_v1 = vadd.f32 %v2306_v42, %v2296_v20  ;;  %v2316_v47 = vadd.f32 %v2308_v36, %v2298_v38  ;;  %v605_v20 = vld [vmem:[%s6030_s15 + $0x18] sm:$0xff]  ;;  %v603_v38 = vld [vmem:[%s6030_s15 + $0x8] sm:$0xff] }
 0x47d   : > { %v5276_v48 = vadd.f32 %v2303_v28, %v2293_v58  ;;  %v604_v28 = vld [vmem:[%s6030_s15 + $0x10] sm:$0xff] }
 0x47e   : > { %2451 = vrot.lane.b32.xlu1 %v2316_v47, %s4052_s24  ;;  %2449 = vrot.lane.b32.xlu0 %v2314_v1, %s4052_s24  ;;  %v2479_v37 = vpack.c.bf16 %v2314_v1, %v5268_v22  ;;  %v2480_v5 = vpack.c.bf16 %v2316_v47, %v5270_v15  ;;  %v2477_v14 = vpack.c.bf16 %v5272_v57, %v5266_v59 }
 0x47f   : > { %2447 = vrot.lane.b32.xlu2 %v5274_v16, %s4052_s24  ;;  %v2478_v29 = vpack.c.bf16 %v5274_v16, %v5276_v48 }
 0x480   : > { %2483 = vst [vmem:[#allocation3 + $0x90] sm:$0xff] %v2479_v37 }
 0x481   : > { %2484 = vst [vmem:[#allocation3 + $0x98] sm:$0xff] %v2480_v5 }
 0x482   : > { %2481 = vst [vmem:[#allocation3 + $0x80] sm:$0xff] %v2477_v14 }
 0x483   : > { %2482 = vst [vmem:[#allocation3 + $0x88] sm:$0xff] %v2478_v29 }
 0x486   : > { %2411 = vrot.lane.b32.xlu0 %v2316_v47, %s4054_s18  ;;  %2445 = vrot.lane.b32.xlu1 %v5272_v57, %s4052_s24 }
 0x487   : > { %2409 = vrot.lane.b32.xlu2 %v2314_v1, %s4054_s18 }
 0x48e   : > { %2405 = vrot.lane.b32.xlu0 %v5272_v57, %s4054_s18  ;;  %2407 = vrot.lane.b32.xlu1 %v5274_v16, %s4054_s18 }
 0x48f   : > { %2371 = vrot.lane.b32.xlu2 %v2316_v47, %s4056_s16 }
 0x496   : > { %2367 = vrot.lane.b32.xlu0 %v5274_v16, %s4056_s16  ;;  %2369 = vrot.lane.b32.xlu1 %v2314_v1, %s4056_s16 }
 0x497   : > { %2365 = vrot.lane.b32.xlu2 %v5272_v57, %s4056_s16 }
 0x49e   : > { %2329 = vrot.lane.b32.xlu0 %v2314_v1, %s4057_s20  ;;  %2331 = vrot.lane.b32.xlu1 %v2316_v47, %s4057_s20 }
 0x49f   : > { %2619 = vrot.lane.b32.xlu2 %v2316_v47, %s4050_s17 }
 0x4a6   : > { %2327 = vrot.lane.b32.xlu0 %v5274_v16, %s4057_s20  ;;  %2617 = vrot.lane.b32.xlu1 %v2314_v1, %s4050_s17 }
 0x4a7   : > { %2325 = vrot.lane.b32.xlu2 %v5272_v57, %s4057_s20 }
 0x4ae   : > { %2613 = vrot.lane.b32.xlu0 %v5272_v57, %s4050_s17  ;;  %2615 = vrot.lane.b32.xlu1 %v5274_v16, %s4050_s17 }
 0x4af   : > { %2579 = vrot.lane.b32.xlu2 %v2316_v47, %s4051_s10 }
 0x4b6   : > { %2575 = vrot.lane.b32.xlu0 %v5274_v16, %s4051_s10  ;;  %2577 = vrot.lane.b32.xlu1 %v2314_v1, %s4051_s10 }
 0x4b7   : > { %2573 = vrot.lane.b32.xlu2 %v5272_v57, %s4051_s10 }
 0x4be   : > { %2537 = vrot.lane.b32.xlu0 %v2314_v1, %s4053_s28  ;;  %2539 = vrot.lane.b32.xlu1 %v2316_v47, %s4053_s28 }
 0x4bf   : > { %2535 = vrot.lane.b32.xlu2 %v5274_v16, %s4053_s28 }
 0x4c6   : > { %2499 = vrot.lane.b32.xlu0 %v2316_v47, %s4055_s14  ;;  %2533 = vrot.lane.b32.xlu1 %v5272_v57, %s4053_s28 }
 0x4c7   : > { %2497 = vrot.lane.b32.xlu2 %v2314_v1, %s4055_s14 }
 0x4ce   : > { %2439 = vrot.lane.b32.xlu0 %v5276_v48, %s4052_s24  ;;  %2441 = vrot.lane.b32.xlu1 %v5268_v22, %s4052_s24 }
 0x4cf   : > { %2443 = vrot.lane.b32.xlu2 %v5270_v15, %s4052_s24 }
 0x4d6   : > { %2401 = vrot.lane.b32.xlu0 %v5268_v22, %s4054_s18  ;;  %2403 = vrot.lane.b32.xlu1 %v5270_v15, %s4054_s18 }
 0x4d7   : > { %2437 = vrot.lane.b32.xlu2 %v5266_v59, %s4052_s24  ;;  %s6029_s24 = sld [smem:[#allocation51_spill]] }
 0x4d9   : > { %v5340_v32 = vpop.permute.xlu2 %2447 }
 0x4dd   : > { %v599_v17 = vld [vmem:[%s6029_s24 + $0x8] sm:$0xff]  ;;  %v598_v45 = vld [vmem:[%s6029_s24] sm:$0xff]  ;;  %v600_v56 = vld [vmem:[%s6029_s24 + $0x10] sm:$0xff] }
 0x4de   : > { %2363 = vrot.lane.b32.xlu0 %v5270_v15, %s4056_s16  ;;  %2397 = vrot.lane.b32.xlu1 %v5266_v59, %s4054_s18  ;;  %v601_v23 = vld [vmem:[%s6029_s24 + $0x18] sm:$0xff] }
 0x4df   : > { %2399 = vrot.lane.b32.xlu2 %v5276_v48, %s4054_s18 }
 0x4e1   : > { %v5348_v27 = vpop.permute.xlu2 %2409 }
 0x4e6   : > { %2357 = vrot.lane.b32.xlu0 %v5266_v59, %s4056_s16  ;;  %2359 = vrot.lane.b32.xlu1 %v5276_v48, %s4056_s16 }
 0x4e7   : > { %2361 = vrot.lane.b32.xlu2 %v5268_v22, %s4056_s16 }
 0x4e9   : > { %v5356_v9 = vpop.permute.xlu2 %2371 }
 0x4ee   : > { %2611 = vrot.lane.b32.xlu0 %v5270_v15, %s4050_s17  ;;  %2321 = vrot.lane.b32.xlu1 %v5268_v22, %s4057_s20 }
 0x4ef   : > { %2323 = vrot.lane.b32.xlu2 %v5270_v15, %s4057_s20 }
 0x4f0   : > { %v2452_v49 = vpop.permute.xlu1 %2451  ;;  %v5364_v8 = vpop.permute.xlu0 %2449 }
 0x4f1   : > { %v5366_v34 = vpop.permute.xlu2 %2365 }
 0x4f6   : > { %2317 = vrot.lane.b32.xlu0 %v5266_v59, %s4057_s20  ;;  %2319 = vrot.lane.b32.xlu1 %v5276_v48, %s4057_s20 }
 0x4f7   : > { %2609 = vrot.lane.b32.xlu2 %v5268_v22, %s4050_s17 }
 0x4f8   : > { %v5374_v40 = vpop.permute.xlu0 %2411  ;;  %v2446_v33 = vpop.permute.xlu1 %2445 }
 0x4f9   : > { %v5376_v3 = vpop.permute.xlu2 %2619 }
 0x4fe   : > { %2571 = vrot.lane.b32.xlu0 %v5270_v15, %s4051_s10  ;;  %2605 = vrot.lane.b32.xlu1 %v5266_v59, %s4050_s17 }
 0x4ff   : > { %2607 = vrot.lane.b32.xlu2 %v5276_v48, %s4050_s17 }
 0x500   : > { %v5384_v39 = vpop.permute.xlu0 %2405  ;;  %v5386_v12 = vpop.permute.xlu1 %2407 }
 0x501   : > { %v5388_v54 = vpop.permute.xlu2 %2325 }
 0x506   : > { %2565 = vrot.lane.b32.xlu0 %v5266_v59, %s4051_s10  ;;  %2567 = vrot.lane.b32.xlu1 %v5276_v48, %s4051_s10 }
 0x507   : > { %2569 = vrot.lane.b32.xlu2 %v5268_v22, %s4051_s10 }
 0x508   : > { %v5396_v30 = vpop.permute.xlu0 %2367  ;;  %v5398_v50 = vpop.permute.xlu1 %2369 }
 0x509   : > { %v5400_v52 = vpop.permute.xlu2 %2579 }
 0x50e   : > { %2527 = vrot.lane.b32.xlu0 %v5276_v48, %s4053_s28  ;;  %2529 = vrot.lane.b32.xlu1 %v5268_v22, %s4053_s28 }
 0x50f   : > { %2531 = vrot.lane.b32.xlu2 %v5270_v15, %s4053_s28 }
 0x510   : > { %v5408_v55 = vpop.permute.xlu0 %2329  ;;  %v5410_v4 = vpop.permute.xlu1 %2331 }
 0x511   : > { %v5412_v44 = vpop.permute.xlu2 %2573 }
 0x516   : > { %2489 = vrot.lane.b32.xlu0 %v5268_v22, %s4055_s14  ;;  %2491 = vrot.lane.b32.xlu1 %v5270_v15, %s4055_s14 }
 0x517   : > { %2525 = vrot.lane.b32.xlu2 %v5266_v59, %s4053_s28  ;;  %s6055_s28 = sld [smem:[#allocation54_spill]] }
 0x518   : > { %v5420_v58 = vpop.permute.xlu0 %2327  ;;  %v5422_v41 = vpop.permute.xlu1 %2617 }
 0x519   : > { %v5424_v63 = vpop.permute.xlu2 %2535 }
 0x51d   : > { %s6056_s18 = smov %s6055_s28  ;;  %s3065_s0 = scalar_lea.hbm %s6055_s28, %s3754_s12 }
 0x51e   : > { %2493 = vrot.lane.b32.xlu0 %v5272_v57, %s4055_s14  ;;  %2485 = vrot.lane.b32.xlu1 %v5266_v59, %s4055_s14  ;;  %s3068_s29 = sshll.u32 %s3065_s0, 4  ;;  %s3991_s22 = scalar_lea.hbm %s6056_s18, 256  ;;  %s3069_s29 = int_to_ptr.hbm [resolvable:$true] %s3068_s29 }
 0x51f   : > { %2487 = vrot.lane.b32.xlu2 %v5276_v48, %s4055_s14  ;;  %s3985_s1 = sshra.s32 %s3069_s29, 4  ;;  %s3986_s1 = int_to_ptr.hbm [resolvable:$true] %s3985_s1 }
 0x520   : > { %v5432_v25 = vpop.permute.xlu0 %2613  ;;  %v5434_v35 = vpop.permute.xlu1 %2615  ;;  %s3987_s25 = scalar_lea.hbm %s3986_s1, 128  ;;  %p3992_p3 = scmp.lt.s32.totalorder %s3986_s1, %s6056_s18 }
 0x521   : > { %v5436_v26 = vpop.permute.xlu2 %2497  ;;  %p3988_p6 = scmp.ne.s32.totalorder %s3986_s1, %s3987_s25  ;;  %p3993_p4 = scmp.lt.s32.totalorder %s3991_s22, %s3987_s25 }
 0x523   : > { %p3989_p13 = pnand %p3988_p6, %p4175_p11  ;;  %p3994_p5 = por %p3993_p4, %p3992_p3 }
 0x525   : > { %p3990_p2 = pneg %p3989_p13 }
 0x526   : > { %1800 = vperm.xlu0 %3828, %v599_v17   ;;  %2495 = vrot.lane.b32.xlu1 %v5274_v16, %s4055_s14  ;;  %s5810_s14 = scalar_lea.vmem [#allocation12], %s4295_s23 }
 0x527   : > { %1795 = vperm.xlu2 %3830, %v598_v45   ;;  %s3066_s23 = sshll.u32 %s5810_s14, 4  ;;  %p3995_p7 = pnand %p3994_p5, %p3990_p2  ;;  %s3067_s23 = int_to_ptr.vmem [resolvable:$true] %s3066_s23 }
 0x528   : > { %v5446_v24 = vpop.permute.xlu0 %2575  ;;  %v5448_v7 = vpop.permute.xlu1 %2577 }
 0x529   : > { %v2444_v60 = vpop.permute.xlu2 %2443 }
 0x52a   : > { %v2456_v61 = vsel %vm1212_vm4, %v2444_v60, %v2452_v49  ;;  %v2460_v53 = vsel %vm1212_vm4, %v2452_v49, %v2444_v60 }
 0x52b   : > { %v2467_v46 = vmul.f32 %v2460_v53, %v4766_v0  ;;  %v2468_v2 = vmul.f32 %v2456_v61, %v4769_v19  ;;  %v6031_v53 = vld [vmem:[#allocation28_spill] sm:$0xff] }
 0x52d   : > { %v2472_v21 = vpack.c.bf16 %v2468_v2, %v2467_v46  ;;  %v6032_v2 = vld [vmem:[#allocation29_spill] sm:$0xff] }
 0x52e   : > { %1823 = vperm.xlu0 %3828, %v602_v6   ;;  %1805 = vperm.xlu1 %3829, %v600_v56  }
 0x52f   : > { %2476 = vst [vmem:[#allocation3 + $0x78] sm:$0xff] %v2472_v21  ;;  %1810 = vperm.xlu2 %3830, %v601_v23  }
 0x530   : > { %v5465_v31 = vpop.permute.xlu0 %2537  ;;  %v5467_v11 = vpop.permute.xlu1 %2539 }
 0x531   : > { %v2438_v10 = vpop.permute.xlu2 %2437 }
 0x532   : > { %v2453_v42 = vsel %vm1212_vm4, %v2438_v10, %v2446_v33  ;;  %v2457_v36 = vsel %vm1212_vm4, %v2446_v33, %v2438_v10 }
 0x533   : > { %v2461_v62 = vmul.f32 %v2457_v36, %v4766_v0  ;;  %v2462_v51 = vmul.f32 %v2453_v42, %v4769_v19 }
 0x535   : > { %v2469_v59 = vpack.c.bf16 %v2462_v51, %v2461_v62 }
 0x536   : > { %1838 = vperm.xlu0 %3828, %v605_v20   ;;  %1828 = vperm.xlu1 %3829, %v603_v38  }
 0x537   : > { %2473 = vst [vmem:[#allocation3 + $0x60] sm:$0xff] %v2469_v59  ;;  %1833 = vperm.xlu2 %3830, %v604_v28   ;;  %v6033_v59 = vld [vmem:[#allocation31_spill] sm:$0xff] }
 0x538   : > { %v5484_v22 = vpop.permute.xlu0 %2499  ;;  %v5486_v15 = vpop.permute.xlu1 %2533 }
 0x539   : > { %v2400_v57 = vpop.permute.xlu2 %2399 }
 0x53a   : > { %v2414_v16 = vsel %vm1169_vm6, %v2400_v57, %v5386_v12  ;;  %v2418_v1 = vsel %vm1169_vm6, %v5386_v12, %v2400_v57 }
 0x53b   : > { %v2423_v47 = vmul.f32 %v2418_v1, %v4863_v13  ;;  %v2424_v48 = vmul.f32 %v2414_v16, %v4866_v43  ;;  %v6034_v16 = vld [vmem:[#allocation30_spill] sm:$0xff] }
 0x53d   : > { %v2430_v37 = vpack.c.bf16 %v2424_v48, %v2423_v47 }
 0x53f   : > { %2434 = vst [vmem:[#allocation3 + $0x48] sm:$0xff] %v2430_v37 }
 0x540   : > { %v2440_v5 = vpop.permute.xlu0 %2439  ;;  %v2442_v14 = vpop.permute.xlu1 %2441 }
 0x541   : > { %v2362_v29 = vpop.permute.xlu2 %2361  ;;  %v2454_v49 = vsel %vm1212_vm4, %v2440_v5, %v5340_v32  ;;  %v2458_v33 = vsel %vm1212_vm4, %v5340_v32, %v2440_v5  ;;  %v2455_v12 = vsel %vm1212_vm4, %v2442_v14, %v5364_v8  ;;  %v2459_v17 = vsel %vm1212_vm4, %v5364_v8, %v2442_v14  ;;  %v3732_v14 = vld [vmem:[#allocation3 + $0x74] sm:$0xf0] }
 0x542   : > { %v2375_v45 = vsel %vm1126_vm8, %v2362_v29, %v5398_v50  ;;  %v2379_v60 = vsel %vm1126_vm8, %v5398_v50, %v2362_v29  ;;  %v2463_v61 = vmul.f32 %v2458_v33, %v4766_v0  ;;  %v2464_v32 = vmul.f32 %v2454_v49, %v4769_v19  ;;  %v3559_v29 = vld [vmem:[#allocation3 + $0x78] sm:$0xf0] }
 0x543   : > { %v2385_v46 = vmul.f32 %v2379_v60, %v6031_v53  ;;  %v2386_v6 = vmul.f32 %v2375_v45, %v6032_v2  ;;  %v2465_v56 = vmul.f32 %v2459_v17, %v4766_v0  ;;  %v2466_v8 = vmul.f32 %v2455_v12, %v4769_v19 }
 0x544   : > { %v2470_v23 = vpack.c.bf16 %v2464_v32, %v2463_v61 }
 0x545   : > { %v2391_v21 = vpack.c.bf16 %v2386_v6, %v2385_v46  ;;  %v2471_v10 = vpack.c.bf16 %v2466_v8, %v2465_v56 }
 0x546   : > { %2474 = vst [vmem:[#allocation3 + $0x68] sm:$0xff] %v2470_v23 }
 0x547   : > { %2395 = vst [vmem:[#allocation3 + $0x30] sm:$0xff] %v2391_v21 }
 0x548   : > { %2475 = vst [vmem:[#allocation3 + $0x70] sm:$0xff] %v2471_v10  ;;  %v2402_v42 = vpop.permute.xlu0 %2401  ;;  %v2404_v50 = vpop.permute.xlu1 %2403 }
 0x549   : > { %v2324_v36 = vpop.permute.xlu2 %2323  ;;  %v2415_v62 = vsel %vm1169_vm6, %v2402_v42, %v5348_v27  ;;  %v2419_v51 = vsel %vm1169_vm6, %v5348_v27, %v2402_v42  ;;  %v2416_v0 = vsel %vm1169_vm6, %v2404_v50, %v5374_v40  ;;  %v2420_v19 = vsel %vm1169_vm6, %v5374_v40, %v2404_v50  ;;  %v5567_v42 = vld [vmem:[%s5995_s11 + $0x10] ss:$0 sm:$0xff]  ;;  %v5573_v50 = vld [vmem:[%s5995_s11 + $0x18] ss:$0 sm:$0xff] }
 0x54a   : > { %v2336_v20 = vsel %vm1083_vm9, %v2324_v36, %v5410_v4  ;;  %v2340_v38 = vsel %vm1083_vm9, %v5410_v4, %v2324_v36  ;;  %v2425_v28 = vmul.f32 %v2419_v51, %v4863_v13  ;;  %v2426_v27 = vmul.f32 %v2415_v62, %v4866_v43  ;;  %v3549_v51 = vld [vmem:[#allocation3 + $0x60] sm:$0xf] }
 0x54b   : > { %v2347_v57 = vmul.f32 %v2340_v38, %v6033_v59  ;;  %v2348_v1 = vmul.f32 %v2336_v20, %v6034_v16  ;;  %v2427_v47 = vmul.f32 %v2420_v19, %v4863_v13  ;;  %v2428_v40 = vmul.f32 %v2416_v0, %v4866_v43  ;;  %v3729_v20 = vld [vmem:[#allocation3 + $0x64] sm:$0xf] }
 0x54c   : > { %v2431_v48 = vpack.c.bf16 %v2426_v27, %v2425_v28 }
 0x54d   : > { %v2352_v37 = vpack.c.bf16 %v2348_v1, %v2347_v57  ;;  %v2432_v5 = vpack.c.bf16 %v2428_v40, %v2427_v47  ;;  %v3730_v56 = vld [vmem:[#allocation3 + $0x64] sm:$0xf0]  ;;  %v3551_v10 = vld [vmem:[#allocation3 + $0x68] sm:$0xf0] }
 0x54e   : > { %2435 = vst [vmem:[#allocation3 + $0x50] sm:$0xff] %v2431_v48  ;;  %v3550_v19 = vor.u32 %v3730_v56, %v3549_v51  ;;  %v3554_v27 = vor.u32 %v3729_v20, %v3551_v10  ;;  %v3726_v56 = vld [vmem:[#allocation3 + $0x44] sm:$0xf0] }
 0x54f   : > { %2356 = vst [vmem:[#allocation3 + $0x18] sm:$0xff] %v2352_v37  ;;  %v3557_v4 = vld [vmem:[#allocation3 + $0x70] sm:$0xf]  ;;  %v3731_v49 = vld [vmem:[#allocation3 + $0x74] sm:$0xf] }
 0x550   : > { %2436 = vst [vmem:[#allocation3 + $0x58] sm:$0xff] %v2432_v5  ;;  %v2364_v33 = vpop.permute.xlu0 %2363  ;;  %v3558_v12 = vor.u32 %v3732_v14, %v3557_v4  ;;  %v3562_v17 = vor.u32 %v3731_v49, %v3559_v29  ;;  %v2398_v45 = vpop.permute.xlu1 %2397 }
 0x551   : > { %v2610_v60 = vpop.permute.xlu2 %2609  ;;  %v2376_v61 = vsel %vm1126_vm8, %v2364_v33, %v5356_v9  ;;  %v2380_v32 = vsel %vm1126_vm8, %v5356_v9, %v2364_v33  ;;  %v2413_v46 = vsel %vm1169_vm6, %v2398_v45, %v5384_v39  ;;  %v2417_v6 = vsel %vm1169_vm6, %v5384_v39, %v2398_v45 }
 0x552   : > { %v2623_v8 = vsel %vm1392_vm2, %v2610_v60, %v5422_v41  ;;  %v2627_v23 = vsel %vm1392_vm2, %v5422_v41, %v2610_v60  ;;  %v2387_v21 = vmul.f32 %v2380_v32, %v6031_v53  ;;  %v2388_v9 = vmul.f32 %v2376_v61, %v6032_v2  ;;  %2905 = vmatpush.bf16.msra.mxu2 %v3558_v12 }
 0x553   : > { %v2633_v39 = vmul.f32 %v5567_v42, %v2623_v8  ;;  %v2634_v41 = vmul.f32 %v5573_v50, %v2627_v23  ;;  %2962 = vmatpush.bf16.msra.mxu0 %v3562_v17  ;;  %v2421_v36 = vmul.f32 %v2417_v6, %v4863_v13  ;;  %v2422_v62 = vmul.f32 %v2413_v46, %v4866_v43 }
 0x554   : > { %v2392_v0 = vpack.c.bf16 %v2388_v9, %v2387_v21 }
 0x555   : > { %v2639_v38 = vpack.c.bf16 %v2634_v41, %v2633_v39  ;;  %v2429_v28 = vpack.c.bf16 %v2422_v62, %v2421_v36  ;;  %v3541_v57 = vld [vmem:[#allocation3 + $0x50] sm:$0xf]  ;;  %v3727_v1 = vld [vmem:[#allocation3 + $0x54] sm:$0xf] }
 0x556   : > { %2396 = vst [vmem:[#allocation3 + $0x38] sm:$0xff] %v2392_v0  ;;  %2906 = vmatpush.bf16.msra.mxu2 %v3550_v19 }
 0x557   : > { %2643 = vst [vmem:[#allocation3 + $0x110] sm:$0xff] %v2639_v38  ;;  %2963 = vmatpush.bf16.msra.mxu0 %v3554_v27  ;;  %v3728_v47 = vld [vmem:[#allocation3 + $0x54] sm:$0xf0]  ;;  %v3543_v40 = vld [vmem:[#allocation3 + $0x58] sm:$0xf0] }
 0x558   : > { %2433 = vst [vmem:[#allocation3 + $0x40] sm:$0xff] %v2429_v28  ;;  %v2358_v48 = vpop.permute.xlu0 %2357  ;;  %v3542_v13 = vor.u32 %v3728_v47, %v3541_v57  ;;  %v3546_v37 = vor.u32 %v3727_v1, %v3543_v40  ;;  %v2360_v43 = vpop.permute.xlu1 %2359  ;;  %v6035_v28 = vld [vmem:[#allocation32_spill] sm:$0xff]  ;;  %v6036_v57 = vld [vmem:[#allocation33_spill] sm:$0xff]  ;;  %v3525_v40 = vld [vmem:[#allocation3 + $0x30] sm:$0xf] }
 0x559   : > { %v2608_v5 = vpop.permute.xlu2 %2607  ;;  %v2373_v14 = vsel %vm1126_vm8, %v2358_v48, %v5366_v34  ;;  %v2377_v29 = vsel %vm1126_vm8, %v5366_v34, %v2358_v48  ;;  %v2374_v4 = vsel %vm1126_vm8, %v2360_v43, %v5396_v30  ;;  %v2378_v49 = vsel %vm1126_vm8, %v5396_v30, %v2360_v43 }
 0x55a   : > { %v2622_v33 = vsel %vm1392_vm2, %v2608_v5, %v5434_v35  ;;  %v2626_v12 = vsel %vm1392_vm2, %v5434_v35, %v2608_v5  ;;  %v2381_v17 = vmul.f32 %v2377_v29, %v6031_v53  ;;  %v2382_v34 = vmul.f32 %v2373_v14, %v6032_v2  ;;  %2907 = vmatpush.bf16.msra.mxu2 %v3542_v13  ;;  %v3535_v35 = vld [vmem:[#allocation3 + $0x48] sm:$0xf0] }
 0x55b   : > { %v2631_v45 = vmul.f32 %v5567_v42, %v2622_v33  ;;  %v2632_v60 = vmul.f32 %v5573_v50, %v2626_v12  ;;  %2964 = vmatpush.bf16.msra.mxu0 %v3546_v37  ;;  %v2383_v30 = vmul.f32 %v2378_v49, %v6031_v53  ;;  %v2384_v61 = vmul.f32 %v2374_v4, %v6032_v2  ;;  %v3723_v37 = vld [vmem:[#allocation3 + $0x34] sm:$0xf] }
 0x55c   : > { %v2389_v32 = vpack.c.bf16 %v2382_v34, %v2381_v17 }
 0x55d   : > { %v2638_v46 = vpack.c.bf16 %v2632_v60, %v2631_v45  ;;  %v2390_v6 = vpack.c.bf16 %v2384_v61, %v2383_v30  ;;  %v3724_v51 = vld [vmem:[#allocation3 + $0x34] sm:$0xf0]  ;;  %v3527_v38 = vld [vmem:[#allocation3 + $0x38] sm:$0xf0] }
 0x55e   : > { %2393 = vst [vmem:[#allocation3 + $0x20] sm:$0xff] %v2389_v32  ;;  %v3526_v13 = vor.u32 %v3724_v51, %v3525_v40  ;;  %v3530_v5 = vor.u32 %v3723_v37, %v3527_v38 }
 0x55f   : > { %2642 = vst [vmem:[#allocation3 + $0x108] sm:$0xff] %v2638_v46  ;;  %v3533_v8 = vld [vmem:[#allocation3 + $0x40] sm:$0xf]  ;;  %v3725_v23 = vld [vmem:[#allocation3 + $0x44] sm:$0xf] }
 0x560   : > { %2394 = vst [vmem:[#allocation3 + $0x28] sm:$0xff] %v2390_v6  ;;  %v2612_v21 = vpop.permute.xlu0 %2611  ;;  %v3534_v9 = vor.u32 %v3726_v56, %v3533_v8  ;;  %v3538_v10 = vor.u32 %v3725_v23, %v3535_v35  ;;  %v2322_v39 = vpop.permute.xlu1 %2321  ;;  %v6037_v35 = vld [vmem:[#allocation24_spill] sm:$0xff]  ;;  %v6038_v23 = vld [vmem:[#allocation26_spill] sm:$0xff] }
 0x561   : > { %v2570_v41 = vpop.permute.xlu2 %2569  ;;  %v2624_v53 = vsel %vm1392_vm2, %v2612_v21, %v5376_v3  ;;  %v2628_v2 = vsel %vm1392_vm2, %v5376_v3, %v2612_v21  ;;  %v2335_v36 = vsel %vm1083_vm9, %v2322_v39, %v5408_v55  ;;  %v2339_v62 = vsel %vm1083_vm9, %v5408_v55, %v2322_v39 }
 0x562   : > { %v2583_v0 = vsel %vm1349_vm3, %v2570_v41, %v5448_v7  ;;  %v2587_v19 = vsel %vm1349_vm3, %v5448_v7, %v2570_v41  ;;  %v2635_v20 = vmul.f32 %v5567_v42, %v2624_v53  ;;  %v2636_v3 = vmul.f32 %v5573_v50, %v2628_v2  ;;  %2908 = vmatpush.bf16.msra.mxu2 %v3534_v9  ;;  %v3637_v53 = vld [vmem:[#allocation3 + $0x110] sm:$0xf] }
 0x563   : > { %v2593_v27 = vmul.f32 %v2583_v0, %v6035_v28  ;;  %v2594_v1 = vmul.f32 %v2587_v19, %v6036_v57  ;;  %2965 = vmatpush.bf16.msra.mxu0 %v3538_v10  ;;  %v2345_v55 = vmul.f32 %v2339_v62, %v6033_v59  ;;  %v2346_v47 = vmul.f32 %v2335_v36, %v6034_v16  ;;  %v3511_v62 = vld [vmem:[#allocation3 + $0x18] sm:$0xf0] }
 0x564   : > { %v2640_v48 = vpack.c.bf16 %v2636_v3, %v2635_v20 }
 0x565   : > { %v2599_v7 = vpack.c.bf16 %v2594_v1, %v2593_v27  ;;  %v2351_v43 = vpack.c.bf16 %v2346_v47, %v2345_v55  ;;  %v3517_v14 = vld [vmem:[#allocation3 + $0x20] sm:$0xf]  ;;  %v3721_v29 = vld [vmem:[#allocation3 + $0x24] sm:$0xf] }
 0x566   : > { %2644 = vst [vmem:[#allocation3 + $0x118] sm:$0xff] %v2640_v48  ;;  %2909 = vmatpush.bf16.msra.mxu2 %v3526_v13 }
 0x567   : > { %2603 = vst [vmem:[#allocation3 + $0xf0] sm:$0xff] %v2599_v7  ;;  %2966 = vmatpush.bf16.msra.mxu0 %v3530_v5  ;;  %v3722_v4 = vld [vmem:[#allocation3 + $0x24] sm:$0xf0]  ;;  %v3519_v49 = vld [vmem:[#allocation3 + $0x28] sm:$0xf0] }
 0x568   : > { %2355 = vst [vmem:[#allocation3 + $0x10] sm:$0xff] %v2351_v43  ;;  %v2318_v33 = vpop.permute.xlu0 %2317  ;;  %v3518_v12 = vor.u32 %v3722_v4, %v3517_v14  ;;  %v3522_v17 = vor.u32 %v3721_v29, %v3519_v49  ;;  %v2320_v34 = vpop.permute.xlu1 %2319  ;;  %v3477_v5 = vld [vmem:[%s6008_s30] sm:$0xf]  ;;  %v3712_v49 = vld [vmem:[%s6008_s30 + $0x8] sm:$0xf0] }
 0x569   : > { %v2532_v45 = vpop.permute.xlu2 %2531  ;;  %v2333_v60 = vsel %vm1083_vm9, %v2318_v33, %v5388_v54  ;;  %v2337_v30 = vsel %vm1083_vm9, %v5388_v54, %v2318_v33  ;;  %v2334_v61 = vsel %vm1083_vm9, %v2320_v34, %v5420_v58  ;;  %v2338_v32 = vsel %vm1083_vm9, %v5420_v58, %v2320_v34 }
 0x56a   : > { %v2544_v46 = vsel %vm1306_vm5, %v2532_v45, %v5467_v11  ;;  %v2548_v6 = vsel %vm1306_vm5, %v5467_v11, %v2532_v45  ;;  %v2341_v56 = vmul.f32 %v2337_v30, %v6033_v59  ;;  %v2342_v54 = vmul.f32 %v2333_v60, %v6034_v16  ;;  %2910 = vmatpush.bf16.msra.mxu2 %v3518_v12  ;;  %v3720_v11 = vld [vmem:[#allocation3 + $0x14] sm:$0xf0] }
 0x56b   : > { %v2555_v8 = vmul.f32 %v2544_v46, %v6037_v35  ;;  %v2556_v21 = vmul.f32 %v2548_v6, %v6038_v23  ;;  %2967 = vmatpush.bf16.msra.mxu0 %v3522_v17  ;;  %v2343_v58 = vmul.f32 %v2338_v32, %v6033_v59  ;;  %v2344_v9 = vmul.f32 %v2334_v61, %v6034_v16 }
 0x56c   : > { %v2349_v10 = vpack.c.bf16 %v2342_v54, %v2341_v56  ;;  %v3478_v45 = vor.u32 %v3712_v49, %v3477_v5 }
 0x56d   : > { %v2560_v39 = vpack.c.bf16 %v2556_v21, %v2555_v8  ;;  %v2350_v41 = vpack.c.bf16 %v2344_v9, %v2343_v58  ;;  %v3752_v2 = vld [vmem:[#allocation3 + $0x114] sm:$0xf0]  ;;  %v3639_v8 = vld [vmem:[#allocation3 + $0x118] sm:$0xf0]  ;;  %v3485_v9 = vld [vmem:[%s6008_s30 + $0x8] sm:$0xf] }
 0x56e   : > { %2353 = vst [vmem:[#allocation3] sm:$0xff] %v2349_v10  ;;  %v3638_v36 = vor.u32 %v3752_v2, %v3637_v53  ;;  %v3621_v21 = vld [vmem:[#allocation3 + $0xf0] sm:$0xf]  ;;  %v3747_v58 = vld [vmem:[#allocation3 + $0xf4] sm:$0xf] }
 0x56f   : > { %2564 = vst [vmem:[#allocation3 + $0xd8] sm:$0xff] %v2560_v39  ;;  %v3509_v51 = vld [vmem:[#allocation3 + $0x10] sm:$0xf]  ;;  %v3719_v0 = vld [vmem:[#allocation3 + $0x14] sm:$0xf] }
 0x570   : > { %2354 = vst [vmem:[#allocation3 + $0x8] sm:$0xff] %v2350_v41  ;;  %v2572_v19 = vpop.permute.xlu0 %2571  ;;  %v3510_v20 = vor.u32 %v3720_v11, %v3509_v51  ;;  %2949 = vmatpush.bf16.msrb.mxu3 %v3638_v36  ;;  %v3514_v3 = vor.u32 %v3719_v0, %v3511_v62  ;;  %v2606_v59 = vpop.permute.xlu1 %2605  ;;  %v3713_v41 = vld [vmem:[%s6008_s30 + $0x10] sm:$0xf0]  ;;  %v3750_v11 = vld [vmem:[#allocation3 + $0x104] sm:$0xf0] }
 0x571   : > { %v2526_v38 = vpop.permute.xlu2 %2525  ;;  %v2584_v16 = vsel %vm1349_vm3, %v2572_v19, %v5400_v52  ;;  %v2588_v27 = vsel %vm1349_vm3, %v5400_v52, %v2572_v19  ;;  %v2621_v1 = vsel %vm1392_vm2, %v2606_v59, %v5432_v25  ;;  %v2625_v55 = vsel %vm1392_vm2, %v5432_v25, %v2606_v59  ;;  %v3751_v53 = vld [vmem:[#allocation3 + $0x114] sm:$0xf] }
 0x572   : > { %v2541_v47 = vsel %vm1306_vm5, %v2526_v38, %v5486_v15  ;;  %v2545_v40 = vsel %vm1306_vm5, %v5486_v15, %v2526_v38  ;;  %v2595_v48 = vmul.f32 %v2584_v16, %v6035_v28  ;;  %v2596_v52 = vmul.f32 %v2588_v27, %v6036_v57  ;;  %2911 = vmatpush.bf16.msra.mxu2 %v3510_v20 }
 0x573   : > { %v2549_v13 = vmul.f32 %v2541_v47, %v6037_v35  ;;  %v2550_v37 = vmul.f32 %v2545_v40, %v6038_v23  ;;  %2968 = vmatpush.bf16.msra.mxu0 %v3514_v3  ;;  %v2629_v25 = vmul.f32 %v5567_v42, %v2621_v1  ;;  %v2630_v7 = vmul.f32 %v5573_v50, %v2625_v55  ;;  %v5718_v55 = vpop.f32.mrf.mxu2 }
 0x574   : > { %v2600_v43 = vpack.c.bf16 %v2596_v52, %v2595_v48  ;;  %v3642_v0 = vor.u32 %v3751_v53, %v3639_v8  ;;  %v5702_v19 = vor.u32 %v3713_v41, %v3485_v9  ;;  %v3631_v52 = vld [vmem:[#allocation3 + $0x108] sm:$0xf0] }
 0x575   : > { %v2557_v15 = vpack.c.bf16 %v2550_v37, %v2549_v13  ;;  %v2637_v14 = vpack.c.bf16 %v2630_v7, %v2629_v25  ;;  %v3501_v29 = vld [vmem:[#allocation3] sm:$0xf]  ;;  %v3717_v4 = vld [vmem:[#allocation3 + $0x4] sm:$0xf] }
 0x576   : > { %2604 = vst [vmem:[#allocation3 + $0xf8] sm:$0xff] %v2600_v43 }
 0x577   : > { %2561 = vst [vmem:[#allocation3 + $0xc0] sm:$0xff] %v2557_v15  ;;  %v3718_v33 = vld [vmem:[#allocation3 + $0x4] sm:$0xf0]  ;;  %v3503_v12 = vld [vmem:[#allocation3 + $0x8] sm:$0xf0] }
 0x578   : > { %2641 = vst [vmem:[#allocation3 + $0x100] sm:$0xff] %v2637_v14  ;;  %v2566_v42 = vpop.permute.xlu0 %2565  ;;  %v3502_v50 = vor.u32 %v3718_v33, %v3501_v29  ;;  %v3506_v17 = vor.u32 %v3717_v4, %v3503_v12  ;;  %v2568_v34 = vpop.permute.xlu1 %2567 }
 0x579   : > { %v2581_v60 = vsel %vm1349_vm3, %v2566_v42, %v5412_v44  ;;  %v2585_v30 = vsel %vm1349_vm3, %v5412_v44, %v2566_v42  ;;  %v2582_v61 = vsel %vm1349_vm3, %v2568_v34, %v5446_v24  ;;  %v2586_v32 = vsel %vm1349_vm3, %v5446_v24, %v2568_v34  ;;  %v5720_v47 = vpop.permute.xlu2 %2487  ;;  %v6039_v42 = vld [vmem:[#allocation27_spill] sm:$0xff] }
 0x57a   : > { %v2589_v46 = vmul.f32 %v2581_v60, %v6035_v28  ;;  %v2590_v6 = vmul.f32 %v2585_v30, %v6036_v57  ;;  %2912 = vmatpush.bf16.msra.mxu2 %v3502_v50  ;;  %2969 = vmatpush.bf16.msra.mxu0 %v3506_v17  ;;  %v2591_v56 = vmul.f32 %v2582_v61, %v6035_v28  ;;  %v6040_v17 = vld [vmem:[#allocation25_spill] sm:$0xff] }
 0x57b   : > { %v2592_v54 = vmul.f32 %v2586_v32, %v6036_v57 }
 0x57c   : > { %v2597_v44 = vpack.c.bf16 %v2590_v6, %v2589_v46  ;;  %v3744_v6 = vld [vmem:[#allocation3 + $0xd4] sm:$0xf0] }
 0x57d   : > { %v2598_v10 = vpack.c.bf16 %v2592_v54, %v2591_v56  ;;  %v3748_v24 = vld [vmem:[#allocation3 + $0xf4] sm:$0xf0]  ;;  %v3623_v39 = vld [vmem:[#allocation3 + $0xf8] sm:$0xf0]  ;;  %2913 = vmatmul.bf16.vlgmr.msra.gmra.mxu2 %v3478_v45  ;;  %2970 = vmatmul.bf16.vlgmr.msra.gmra.mxu0 %v3478_v45 }
 0x57e   : > { %2601 = vst [vmem:[#allocation3 + $0xe0] sm:$0xff] %v2597_v44  ;;  %v3622_v28 = vor.u32 %v3748_v24, %v3621_v21  ;;  %v3626_v57 = vor.u32 %v3747_v58, %v3623_v39  ;;  %v3607_v56 = vld [vmem:[#allocation3 + $0xd8] sm:$0xf0]  ;;  %v3497_v21 = vld [vmem:[%s6008_s30 + $0x20] sm:$0xf] }
 0x57f   : > { %2602 = vst [vmem:[#allocation3 + $0xe8] sm:$0xff] %v2598_v10  ;;  %v3629_v2 = vld [vmem:[#allocation3 + $0x100] sm:$0xf]  ;;  %v3749_v1 = vld [vmem:[#allocation3 + $0x104] sm:$0xf] }
 0x580   : > { %v2528_v36 = vpop.permute.xlu0 %2527  ;;  %2924 = vmatpush.bf16.msrb.mxu1 %v3622_v28  ;;  %v3630_v62 = vor.u32 %v3750_v11, %v3629_v2  ;;  %2981 = vmatpush.bf16.msrb.mxu2 %v3626_v57  ;;  %v2530_v51 = vpop.permute.xlu1 %2529  ;;  %v3634_v37 = vor.u32 %v3749_v1, %v3631_v52  ;;  %v3716_v58 = vld [vmem:[%s6008_s30 + $0x28] sm:$0xf0]  ;;  %v3597_v2 = vld [vmem:[#allocation3 + $0xc0] sm:$0xf]  ;;  %v3741_v11 = vld [vmem:[#allocation3 + $0xc4] sm:$0xf] }
 0x581   : > { %v2542_v20 = vsel %vm1306_vm5, %v2528_v36, %v5424_v63  ;;  %v2546_v3 = vsel %vm1306_vm5, %v5424_v63, %v2528_v36  ;;  %v2543_v59 = vsel %vm1306_vm5, %v2530_v51, %v5465_v31  ;;  %v2547_v38 = vsel %vm1306_vm5, %v5465_v31, %v2530_v51  ;;  %v3489_v31 = vld [vmem:[%s6008_s30 + $0x18] sm:$0xf]  ;;  %v5750_v32 = vpop.permute.xlu2 %1795  ;;  %v6041_v52 = vld [vmem:[#allocation41_spill] sm:$0xff] }
 0x582   : > { %v2551_v16 = vmul.f32 %v2542_v20, %v6037_v35  ;;  %v2552_v27 = vmul.f32 %v2546_v3, %v6038_v23  ;;  %2950 = vmatpush.bf16.msrb.mxu3 %v3630_v62  ;;  %v2553_v63 = vmul.f32 %v2543_v59, %v6037_v35  ;;  %v2554_v40 = vmul.f32 %v2547_v38, %v6038_v23  ;;  %v3715_v35 = vld [vmem:[%s6008_s30 + $0x20] sm:$0xf0] }
 0x583   : > { %v3490_v4 = vor.u32 %v3715_v35, %v3489_v31  ;;  %v5764_v36 = vor.u32 %v3716_v58, %v3497_v21  ;;  %v6042_v31 = vld [vmem:[#allocation37_spill] sm:$0xff]  ;;  %v6051_v58 = vld [vmem:[#allocation35_spill] sm:$0xff] }
 0x584   : > { %v2558_v48 = vpack.c.bf16 %v2552_v27, %v2551_v16  ;;  %v2559_v13 = vpack.c.bf16 %v2554_v40, %v2553_v63 }
 0x585   : > { %v3613_v25 = vld [vmem:[#allocation3 + $0xe0] sm:$0xf]  ;;  %v3745_v7 = vld [vmem:[#allocation3 + $0xe4] sm:$0xf]  ;;  %3643 = vmatmul.msk.bf16.vlgmr.msrb.gmra.mxu3 %vm639_vm0, %v5702_v19 }
 0x586   : > { %3006 = vmatpush.bf16.msra.mxu3 %v3642_v0  ;;  %2562 = vst [vmem:[#allocation3 + $0xc8] sm:$0xff] %v2558_v48  ;;  %v3746_v23 = vld [vmem:[#allocation3 + $0xe4] sm:$0xf0]  ;;  %v3615_v43 = vld [vmem:[#allocation3 + $0xe8] sm:$0xf0] }
 0x587   : > { %2563 = vst [vmem:[#allocation3 + $0xd0] sm:$0xff] %v2559_v13  ;;  %v3614_v5 = vor.u32 %v3746_v23, %v3613_v25  ;;  %v3618_v15 = vor.u32 %v3745_v7, %v3615_v43  ;;  %v1708_v13 = vadd.f32 %v6042_v31, %v6041_v52  ;;  %v6043_v23 = vld [vmem:[#allocation45_spill] sm:$0xff]  ;;  %v6044_v43 = vld [vmem:[#allocation40_spill] sm:$0xff] }
 0x588   : > { %v2490_v14 = vpop.permute.xlu0 %2489  ;;  %v2492_v29 = vpop.permute.xlu1 %2491 }
 0x589   : > { %v2503_v49 = vsel %vm1263_vm7, %v2490_v14, %v5436_v26  ;;  %v2507_v33 = vsel %vm1263_vm7, %v5436_v26, %v2490_v14  ;;  %2925 = vmatpush.bf16.msrb.mxu1 %v3614_v5  ;;  %2982 = vmatpush.bf16.msrb.mxu2 %v3618_v15  ;;  %v2504_v12 = vsel %vm1263_vm7, %v2492_v29, %v5484_v22  ;;  %v5748_v26 = vpop.f32.mrf.mxu2  ;;  %v5768_v27 = vpop.permute.xlu2 %1810  ;;  %v6045_v14 = vld [vmem:[#allocation34_spill] sm:$0xff] }
 0x58a   : > { %3007 = vmatpush.bf16.msra.mxu3 %v3634_v37  ;;  %v2513_v50 = vmul.f32 %v2503_v49, %v6039_v42  ;;  %v2514_v34 = vmul.f32 %v2507_v33, %v6040_v17  ;;  %v2508_v45 = vsel %vm1263_vm7, %v5484_v22, %v2492_v29  ;;  %v2515_v60 = vmul.f32 %v2504_v12, %v6039_v42  ;;  %v6047_v33 = vld [vmem:[#allocation36_spill] sm:$0xff] }
 0x58b   : > { %v2516_v30 = vmul.f32 %v2508_v45, %v6040_v17  ;;  %v1713_v5 = vadd.f32 %v6044_v43, %v6043_v23  ;;  %v1727_v29 = vadd.f32 %v6045_v14, %v1708_v13  ;;  %v3565_v23 = vld [vmem:[#allocation3 + $0x80] sm:$0xf]  ;;  %v3734_v43 = vld [vmem:[#allocation3 + $0x84] sm:$0xf0] }
 0x58c   : > { %v2519_v61 = vpack.c.bf16 %v2514_v34, %v2513_v50  ;;  %v6048_v50 = vld [vmem:[#allocation44_spill] sm:$0xff] }
 0x58d   : > { %v2520_v46 = vpack.c.bf16 %v2516_v30, %v2515_v60  ;;  %2918 = vmatmul.bf16.gmra.mxu2 %v3490_v4  ;;  %2975 = vmatmul.bf16.gmra.mxu0 %v3490_v4  ;;  %v3742_v24 = vld [vmem:[#allocation3 + $0xc4] sm:$0xf0]  ;;  %v3599_v39 = vld [vmem:[#allocation3 + $0xc8] sm:$0xf0]  ;;  %v6046_v4 = vld [vmem:[#allocation39_spill] sm:$0xff]  ;;  %v1732_v12 = vadd.f32 %v6047_v33, %v1713_v5  ;;  %v1813_v18 = vmul.f32 %v5750_v32, %v1727_v29 }
 0x58e   : > { %2523 = vst [vmem:[#allocation3 + $0xb0] sm:$0xff] %v2519_v61  ;;  %v3605_v54 = vld [vmem:[#allocation3 + $0xd0] sm:$0xf]  ;;  %v3743_v8 = vld [vmem:[#allocation3 + $0xd4] sm:$0xf]  ;;  %v3598_v62 = vor.u32 %v3742_v24, %v3597_v2  ;;  %v3602_v51 = vor.u32 %v3741_v11, %v3599_v39  ;;  %v1784_v49 = vadd.f32 %v5718_v55, %v6046_v4 }
 0x58f   : > { %2524 = vst [vmem:[#allocation3 + $0xb8] sm:$0xff] %v2520_v46  ;;  %v3606_v44 = vor.u32 %v3744_v6, %v3605_v54  ;;  %v3610_v22 = vor.u32 %v3743_v8, %v3607_v56  ;;  %v6052_v39 = vld [vmem:[#allocation42_spill] sm:$0xff]  ;;  %v3733_v5 = vld [vmem:[#allocation3 + $0x84] sm:$0xf]  ;;  %v3567_v4 = vld [vmem:[#allocation3 + $0x88] sm:$0xf0] }
 0x590   : > { %v2494_v9 = vpop.permute.xlu0 %2493  ;;  %v2486_v10 = vpop.permute.xlu1 %2485  ;;  %v3711_v33 = vld [vmem:[%s6008_s30 + $0x4] sm:$0xf] }
 0x591   : > { %2926 = vmatpush.bf16.msrb.mxu1 %v3606_v44  ;;  %2983 = vmatpush.bf16.msrb.mxu2 %v3610_v22  ;;  %v2501_v41 = vsel %vm1263_vm7, %v2486_v10, %v2494_v9  ;;  %v2505_v28 = vsel %vm1263_vm7, %v2494_v9, %v2486_v10  ;;  %v1788_v16 = vpop.f32.mrf.mxu2  ;;  %v5801_v54 = vpop.permute.xlu2 %1833 }
 0x592   : > { %v2509_v57 = vmul.f32 %v2501_v41, %v6039_v42  ;;  %v2510_v53 = vmul.f32 %v2505_v28, %v6040_v17  ;;  %v1789_v34 = vadd.f32 %v1788_v16, %v6048_v50  ;;  %v1786_v41 = vadd.f32 %v5748_v26, %v6052_v39  ;;  %v6053_v28 = vld [vmem:[#allocation46_spill] sm:$0xff]  ;;  %v6054_v26 = vld [vmem:[#allocation47_spill] sm:$0xff] }
 0x593   : > { %v3566_v50 = vor.u32 %v3734_v43, %v3565_v23 }
 0x594   : > { %v2517_v0 = vpack.c.bf16 %v2510_v53, %v2509_v57 }
 0x595   : > { %2927 = vmatpush.bf16.msrb.mxu1 %v3598_v62  ;;  %2984 = vmatpush.bf16.msrb.mxu2 %v3602_v51  ;;  %v3589_v20 = vld [vmem:[#allocation3 + $0xb0] sm:$0xf]  ;;  %v3739_v3 = vld [vmem:[#allocation3 + $0xb4] sm:$0xf] }
 0x596   : > { %2521 = vst [vmem:[#allocation3 + $0xa0] sm:$0xff] %v2517_v0  ;;  %v3740_v59 = vld [vmem:[#allocation3 + $0xb4] sm:$0xf0]  ;;  %v3591_v38 = vld [vmem:[#allocation3 + $0xb8] sm:$0xf0]  ;;  %3644 = vmatmul.msk.bf16.gmra.mxu3 %vm639_vm0, %v5764_v36 }
 0x597   : > { %v3590_v1 = vor.u32 %v3740_v59, %v3589_v20  ;;  %v3594_v63 = vor.u32 %v3739_v3, %v3591_v38  ;;  %v3573_v20 = vld [vmem:[#allocation3 + $0x90] sm:$0xf]  ;;  %v3735_v3 = vld [vmem:[#allocation3 + $0x94] sm:$0xf]  ;;  %v1819_v59 = vmul.f32 %v5768_v27, %v6054_v26 }
 0x598   : > { %v5770_v40 = vpop.permute.xlu0 %1800  ;;  %v2496_v48 = vpop.permute.xlu1 %2495 }
 0x599   : > { %2928 = vmatpush.bf16.msrb.mxu1 %v3590_v1  ;;  %2985 = vmatpush.bf16.msrb.mxu2 %v3594_v63  ;;  %v2502_v37 = vsel %vm1263_vm7, %v5720_v47, %v2496_v48  ;;  %v2506_v25 = vsel %vm1263_vm7, %v2496_v48, %v5720_v47  ;;  %v1814_v47 = vmul.f32 %v5750_v32, %v1784_v49  ;;  %v1790_v56 = vpop.f32.mrf.mxu2  ;;  %v3736_v63 = vld [vmem:[#allocation3 + $0x94] sm:$0xf0]  ;;  %v3575_v48 = vld [vmem:[#allocation3 + $0x98] sm:$0xf0] }
 0x59a   : > { %v2511_v7 = vmul.f32 %v2502_v37, %v6039_v42  ;;  %v2512_v35 = vmul.f32 %v2506_v25, %v6040_v17  ;;  %v6049_v42 = vld [vmem:[#allocation43_spill] sm:$0xff]  ;;  %v6050_v17 = vld [vmem:[#allocation38_spill] sm:$0xff]  ;;  %v1791_v57 = vadd.f32 %v1790_v56, %v6053_v28  ;;  %v1816_v1 = vmul.f32 %v5770_v40, %v1786_v41 }
 0x59b   : > { %v1710_v45 = vadd.f32 %v6050_v17, %v6049_v42  ;;  %v3491_v42 = vld [vmem:[%s6008_s30 + $0x24] sm:$0xf0] }
 0x59c   : > { %v2518_v15 = vpack.c.bf16 %v2512_v35, %v2511_v7  ;;  %v1820_v38 = vmul.f32 %v5768_v27, %v1791_v57  ;;  %v3574_v7 = vor.u32 %v3736_v63, %v3573_v20  ;;  %v3578_v35 = vor.u32 %v3735_v3, %v3575_v48 }
 0x59d   : > { %v1729_v9 = vadd.f32 %v6051_v58, %v1710_v45  ;;  %v3581_v10 = vld [vmem:[#allocation3 + $0xa0] sm:$0xf]  ;;  %v3737_v24 = vld [vmem:[#allocation3 + $0xa4] sm:$0xf] }
 0x59e   : > { %2522 = vst [vmem:[#allocation3 + $0xa8] sm:$0xff] %v2518_v15 }
 0x59f   : > { %v1815_v16 = vmul.f32 %v5770_v40, %v1729_v9 }
 0x5a0   : > { %v5793_v60 = vpop.permute.xlu0 %1823  ;;  %v5795_v30 = vpop.permute.xlu1 %1805 }
 0x5a1   : > { %v1841_v61 = vadd.f32 %v5793_v60, %v1813_v18  ;;  %v1842_v55 = vadd.f32 %v5793_v60, %v1814_v47  ;;  %v1817_v46 = vmul.f32 %v5795_v30, %v1732_v12  ;;  %v1818_v6 = vmul.f32 %v5795_v30, %v1789_v34  ;;  %v3479_v12 = vld [vmem:[%s6008_s30 + $0xc] sm:$0xf0]  ;;  %v3714_v47 = vld [vmem:[%s6008_s30 + $0x1c] sm:$0xf] }
 0x5a2   : > { %v3570_v34 = vor.u32 %v3733_v5, %v3567_v4  ;;  %v3482_v18 = vor.u32 %v3711_v33, %v3479_v12  ;;  %v3494_v17 = vor.u32 %v3714_v47, %v3491_v42 }
 0x5a3   : > { %v1849_v8 = vmax.f32 %v1841_v61, 0.0  ;;  %v1850_v44 = vmax.f32 %v1842_v55, 0.0  ;;  %v1845_v22 = vadd.f32 %v5801_v54, %v1817_v46  ;;  %v1846_v21 = vadd.f32 %v5801_v54, %v1818_v6 }
 0x5a5   : > { %1857 = vst [vmem:[%s5810_s14] sm:$0xff] %v1849_v8  ;;  %v1853_v53 = vmax.f32 %v1845_v22, 0.0  ;;  %v1854_v2 = vmax.f32 %v1846_v21, 0.0  ;;  %v3738_v11 = vld [vmem:[#allocation3 + $0xa4] sm:$0xf0]  ;;  %v3583_v62 = vld [vmem:[#allocation3 + $0xa8] sm:$0xf0] }
 0x5a6   : > { %1858 = vst [vmem:[%s5810_s14 + $0x8] sm:$0xff] %v1850_v44  ;;  %v3582_v51 = vor.u32 %v3738_v11, %v3581_v10  ;;  %v3586_v0 = vor.u32 %v3737_v24, %v3583_v62  ;;  %3645 = vmatmul.msk.bf16.vlgmr.msra.gmra.mxu3 %vm639_vm0, %v5702_v19 }
 0x5a7   : > { %1861 = vst [vmem:[%s5810_s14 + $0x20] sm:$0xff] %v1853_v53 }
 0x5a8   : > { %1862 = vst [vmem:[%s5810_s14 + $0x28] sm:$0xff] %v1854_v2  ;;  %v5823_v52 = vpop.permute.xlu0 %1838  ;;  %2929 = vmatpush.bf16.msrb.mxu1 %v3582_v51  ;;  %2986 = vmatpush.bf16.msrb.mxu2 %v3586_v0  ;;  %v5825_v31 = vpop.permute.xlu1 %1828 }
 0x5a9   : > { %v1847_v19 = vadd.f32 %v5823_v52, %v1819_v59  ;;  %v1848_v13 = vadd.f32 %v5823_v52, %v1820_v38  ;;  %v1843_v37 = vadd.f32 %v5825_v31, %v1815_v16  ;;  %v1844_v25 = vadd.f32 %v5825_v31, %v1816_v1 }
 0x5ab   : > { %v1855_v15 = vmax.f32 %v1847_v19, 0.0  ;;  %v1856_v14 = vmax.f32 %v1848_v13, 0.0  ;;  %v1851_v29 = vmax.f32 %v1843_v37, 0.0  ;;  %v1852_v49 = vmax.f32 %v1844_v25, 0.0 }
 0x5ac   : > { %2930 = vmatpush.bf16.msrb.mxu1 %v3574_v7  ;;  %2987 = vmatpush.bf16.msrb.mxu2 %v3578_v35 }
 0x5ad   : > { %1863 = vst [vmem:[%s5810_s14 + $0x30] sm:$0xff] %v1855_v15 }
 0x5ae   : > { %1864 = vst [vmem:[%s5810_s14 + $0x38] sm:$0xff] %v1856_v14 }
 0x5af   : > { %1859 = vst [vmem:[%s5810_s14 + $0x10] sm:$0xff] %v1851_v29 }
 0x5b0   : > { %1860 = vst [vmem:[%s5810_s14 + $0x18] sm:$0xff] %v1852_v49  ;;  %2931 = vmatpush.bf16.msrb.mxu1 %v3566_v50  ;;  %2988 = vmatpush.bf16.msrb.mxu2 %v3570_v34 }
 0x5b3   : > { %2932 = vmatmul.bf16.vlgmr.msrb.gmra.mxu1 %v3482_v18  ;;  %2989 = vmatmul.bf16.vlgmr.msrb.gmra.mxu2 %v3482_v18 }
 0x5b6   : > { %3646 = vmatmul.msk.bf16.gmra.mxu3 %vm639_vm0, %v5764_v36 }
 0x5c3   : > { %2937 = vmatmul.bf16.gmra.mxu1 %v3494_v17  ;;  %2994 = vmatmul.bf16.gmra.mxu2 %v3494_v17 }
 0x5fa   : > { %v2971_v44 = vpop.f32.mrf.mxu0 }
 0x600   : > { %v2914_v61 = vpop.f32.mrf.mxu2 }
 0x602   : > { %v2973_v11 = vpop.f32.mrf.mxu0 }
 0x608   : > { %v2952_v45 = vpop.f32.mrf.mxu3  ;;  %v2916_v46 = vpop.f32.mrf.mxu2 }
 0x60a   : > { %v2976_v37 = vpop.f32.mrf.mxu0 }
 0x610   : > { %v2954_v55 = vpop.f32.mrf.mxu3  ;;  %v2919_v56 = vpop.f32.mrf.mxu2 }
 0x612   : > { %v2978_v12 = vpop.f32.mrf.mxu0 }
 0x618   : > { %v2921_v36 = vpop.f32.mrf.mxu2 }
 0x619   : > { %v2957_v6 = vpop.f32.mrf.mxu3 }
 0x621   : > { %v2959_v8 = vpop.f32.mrf.mxu3 }
 0x629   : > { %v3009_v58 = vpop.f32.mrf.mxu3 }
 0x630   : > { %v2933_v22 = vpop.f32.mrf.mxu1 }
 0x631   : > { %v2934_v21 = vadd.f32 %v2933_v22, %v2914_v61  ;;  %v3011_v0 = vpop.f32.mrf.mxu3 }
 0x633   : > { %v2953_v9 = vadd.f32 %v2952_v45, %v2934_v21 }
 0x635   : > { %v3019_v10 = vmul.f32 %v2953_v9, %v5750_v32 }
 0x636   : > { %v2990_v24 = vpop.f32.mrf.mxu2 }
 0x637   : > { %v3027_v39 = vadd.f32 %v3019_v10, %v5793_v60  ;;  %v2991_v41 = vadd.f32 %v2990_v24, %v2971_v44 }
 0x638   : > { %v2935_v28 = vpop.f32.mrf.mxu1 }
 0x639   : > { %v3035_v57 = vmax.f32 %v3027_v39, 0.0  ;;  %v3010_v53 = vadd.f32 %v3009_v58, %v2991_v41  ;;  %v2936_v2 = vadd.f32 %v2935_v28, %v2916_v46  ;;  %v3014_v7 = vpop.f32.mrf.mxu3 }
 0x63b   : > { %3647 = vst [vmem:[%s5810_s14 + $0x40] sm:$0xff] %v3035_v57  ;;  %v3020_v62 = vmul.f32 %v3010_v53, %v5750_v32  ;;  %v2955_v51 = vadd.f32 %v2954_v55, %v2936_v2 }
 0x63d   : > { %v3028_v20 = vadd.f32 %v3020_v62, %v5793_v60  ;;  %v3021_v3 = vmul.f32 %v2955_v51, %v5770_v40 }
 0x63e   : > { %v2992_v26 = vpop.f32.mrf.mxu2 }
 0x63f   : > { %v3036_v59 = vmax.f32 %v3028_v20, 0.0  ;;  %v3029_v38 = vadd.f32 %v3021_v3, %v5825_v31  ;;  %v2993_v16 = vadd.f32 %v2992_v26, %v2973_v11 }
 0x640   : > { %v2938_v1 = vpop.f32.mrf.mxu1 }
 0x641   : > { %3648 = vst [vmem:[%s5810_s14 + $0x48] sm:$0xff] %v3036_v59  ;;  %v3037_v63 = vmax.f32 %v3029_v38, 0.0  ;;  %v3012_v48 = vadd.f32 %v3011_v0, %v2993_v16  ;;  %v2939_v19 = vadd.f32 %v2938_v1, %v2919_v56  ;;  %v3016_v42 = vpop.f32.mrf.mxu3 }
 0x643   : > { %3649 = vst [vmem:[%s5810_s14 + $0x50] sm:$0xff] %v3037_v63  ;;  %v3022_v32 = vmul.f32 %v3012_v48, %v5770_v40  ;;  %v2958_v13 = vadd.f32 %v2957_v6, %v2939_v19 }
 0x645   : > { %v3030_v60 = vadd.f32 %v3022_v32, %v5825_v31  ;;  %v3023_v25 = vmul.f32 %v2958_v13, %v5795_v30 }
 0x646   : > { %v2995_v35 = vpop.f32.mrf.mxu2 }
 0x647   : > { %v3038_v23 = vmax.f32 %v3030_v60, 0.0  ;;  %v3031_v43 = vadd.f32 %v3023_v25, %v5801_v54  ;;  %v2996_v5 = vadd.f32 %v2995_v35, %v2976_v37 }
 0x648   : > { %v2940_v15 = vpop.f32.mrf.mxu1 }
 0x649   : > { %3650 = vst [vmem:[%s5810_s14 + $0x58] sm:$0xff] %v3038_v23  ;;  %v3039_v14 = vmax.f32 %v3031_v43, 0.0  ;;  %v3015_v29 = vadd.f32 %v3014_v7, %v2996_v5  ;;  %v2941_v4 = vadd.f32 %v2940_v15, %v2921_v36 }
 0x64b   : > { %3651 = vst [vmem:[%s5810_s14 + $0x60] sm:$0xff] %v3039_v14  ;;  %v3024_v40 = vmul.f32 %v3015_v29, %v5795_v30  ;;  %v2960_v31 = vadd.f32 %v2959_v8, %v2941_v4 }
 0x64d   : > { %v3032_v49 = vadd.f32 %v3024_v40, %v5801_v54  ;;  %v3025_v33 = vmul.f32 %v2960_v31, %v5768_v27 }
 0x64e   : > { %v2997_v50 = vpop.f32.mrf.mxu2 }
 0x64f   : > { %v3040_v34 = vmax.f32 %v3032_v49, 0.0  ;;  %v3033_v18 = vadd.f32 %v3025_v33, %v5823_v52  ;;  %v2998_v47 = vadd.f32 %v2997_v50, %v2978_v12 }
 0x651   : > { %3652 = vst [vmem:[%s5810_s14 + $0x68] sm:$0xff] %v3040_v34  ;;  %v3041_v17 = vmax.f32 %v3033_v18, 0.0  ;;  %v3017_v45 = vadd.f32 %v3016_v42, %v2998_v47 }
 0x653   : > { %3653 = vst [vmem:[%s5810_s14 + $0x70] sm:$0xff] %v3041_v17  ;;  %v3026_v30 = vmul.f32 %v3017_v45, %v5768_v27 }
 0x655   : > { %v3034_v54 = vadd.f32 %v3026_v30, %v5823_v52 }
 0x657   : > { %v3042_v61 = vmax.f32 %v3034_v54, 0.0 }
 0x659   : > { %3654 = vst [vmem:[%s5810_s14 + $0x78] sm:$0xff] %v3042_v61 }
 0x65a   : > { %3998 = shalt.err (!%p3995_p7)
}
 0x65b   : > { %s4058_s21 = smov 256  }
 0x65c   : > { %3763 = dma.vmem_to_hbm [thread:$0]  (%p4175_p11), %s3067_s23, 2048, %s3069_s29, %s3053_s13, %s4058_s21, %s4058_s21, %s4056_s16  }
 0x65d PF: > { %s6058_s14 = sld [smem:[#allocation17_spill]]  ;;  %p3779_p0 = pnand %p3210_p9, %p4179_p12 }
 0x65f   : > { %p3780_p8 = pneg %p3779_p0 }
 0x663   : > { %s3083_s28 = sand.u32 1, %s6058_s14  }
 0x664   : > { %s3084_s0 = scalar_lea.sflag [#allocation6], %s3083_s28 }
 0x665   : > { %4028 = dma.done.wait (%p3780_p8), %s3084_s0, 2048  }
 0x666   : > { %4030 = vsyncadd (%p3780_p8), %s3084_s0, 4294965248  ;;  %s6061_s28 = sld [smem:[#allocation20_spill]]  ;;  %s6064_s25 = smov %s4037_s26 }
 0x667   : > { %s6062_s1 = sld [smem:[#allocation18_spill]] }
 0x668   : > { %s6063_s27 = sld [smem:[#allocation21_spill]] }
 0x66c   : > { %p32_p10 = scmp.ge.s32.totalorder %s6061_s28, 4  }
 0x66d   : > { %s6065_s26 = smov %s6062_s1 }
 0x66e   :  { %34 = sbr.rel (!%p32_p10) target bundleno = 17 (0x11), region = 168 }
 0x673   :  { %3090 = vsyncpa [#allocation5], 1 }
 0x674   :  { %3092 = vsyncpa [#allocation5 + $0x1], 1 }
 0x675   :  { %3093 = vsyncpa [#allocation8], 1 }
 0x676   :  { %3095 = vsyncpa [#allocation8 + $0x1], 1 }
 0x677   :  { %3096 = vsyncpa [#allocation11], 1 }
 0x678   :  { %3098 = vsyncpa [#allocation11 + $0x1], 1 }
 0x679   :  { %3099 = vsyncpa [#allocation6], 1 }
 0x67a   :  { %3101 = vsyncpa [#allocation6 + $0x1], 1 }

</bundles_post_ra>
